<compile_context>
chip_gen: v7x
topology: tpu7x:2x2x1
jax: 0.10.0
libtpu: 0.0.40
codegen_flags: <defaults>
</compile_context>

<pallas_src>
import functools

import jax
import jax.numpy as jnp
from jax.experimental import pallas as pl
from jax.experimental.pallas import tpu as pltpu

CP = 128  # padded channel / lane width used everywhere inside the kernel


def _elu(v):
    # ELU(alpha=1): v if v > 0 else exp(v) - 1   (min() keeps exp() in range)
    return jnp.where(v > 0, v, jnp.exp(jnp.minimum(v, 0.0)) - 1.0)


def _fused_kernel(x_ref, w_ref, b_ref, heads_ref, angle_ref, *,
                  nb, H, W, kc, pool, woffs):
    """Shared projection + fused 4 heads + W-pooling + angle Conv1d stack.

    nb   : samples processed in this grid step
    kc   : padded input-channel count (multiple of 16, matches x lane dim)
    woffs: static row offsets of the 6 weight blocks inside the bf16 weight slab
    """
    HW = H * W
    M = nb * HW

    # ---- bias / affine slab: one (8,128) f32 load, static row slices ------------
    bmat = b_ref[...]
    b_sh, b1, g, be, b2, bc1, bc2, bc3 = (bmat[r:r + 1, :] for r in range(8))

    # ---- weight slab: static, 16-row-aligned slices of the bf16 (R,128) slab ----
    o_ws, o_w1, o_w2, o_c1, o_c2, o_c3 = woffs
    ws = w_ref[o_ws:o_ws + kc, :]          # (kc, 128)
    w1 = w_ref[o_w1:o_w1 + CP, :]          # (128, 128)   4 heads' first convs, concat
    w2 = w_ref[o_w2:o_w2 + CP, :]          # (128, 128)   4 heads' second convs, block-diag
    wc1 = w_ref[o_c1:o_c1 + 3 * CP, :]     # (384, 128)   Conv1d k=3 taps merged
    wc2 = w_ref[o_c2:o_c2 + 3 * CP, :]     # (384, 128)
    wc3 = w_ref[o_c3:o_c3 + CP, :]         # (128, 128)

    # ---- shared backbone stand-in: 1x1 conv + ELU --------------------------------
    x = x_ref[...].reshape(M, kc)                                        # bf16
    feat = _elu(jnp.dot(x, ws, preferred_element_type=jnp.float32) + b_sh)  # (M,128) f32
    # columns >= C of feat are exactly 0 (zero weights, zero bias, ELU(0)=0)

    # ---- AdaptiveMax/AvgPool2d((1, C)) over W, done right after feat --------------
    f3 = feat.reshape(nb * H, W, CP)
    if pool == "Max":
        p2 = jnp.max(f3, axis=1)                                         # (nb*H, 128)
    else:
        p2 = jnp.mean(f3, axis=1)

    # ---- fused dist/omega/theta/phi heads ----------------------------------------
    h = jnp.dot(feat.astype(jnp.bfloat16), w1,
                preferred_element_type=jnp.float32) + b1                 # (M, 128)
    # InstanceNorm2d (per-sample, per-channel stats over H*W), eps=1e-5, biased var.
    h3 = h.reshape(nb, HW, CP)
    mean = jnp.mean(h3, axis=1, keepdims=True)
    d = h3 - mean
    var = jnp.mean(d * d, axis=1, keepdims=True)
    hn = _elu(d * jax.lax.rsqrt(var + 1e-5) * g + be)                    # (nb, HW, 128)
    heads = jnp.dot(hn.reshape(M, CP).astype(jnp.bfloat16), w2,
                    preferred_element_type=jnp.float32) + b2             # (M, 128)
    # Per-sample 2-D transpose (XLU) -> channel-major, lane-dense (128, HW) stores.
    for i in range(nb):
        heads_ref[i] = heads[i * HW:(i + 1) * HW, :].T

    # ---- angle head: Conv1d(C,128,3) -> Conv1d(128,128,3) -> Conv1d(128,Oa,1) ----
    N = nb * H
    rowidx = jax.lax.broadcasted_iota(jnp.int32, (N, 1), 0)
    rH = rowidx % H
    first = rH == 0           # hoisted boundary masks, reused by both conv layers
    last = rH == H - 1

    def conv1d_k3(v, w, b):
        # roll(v, 1)[h] = v[h-1]; roll(v, N-1)[h] = v[h+1]; per-sample zero padding
        # (masks also kill cross-sample leakage when nb > 1).
        up = jnp.where(first, 0.0, pltpu.roll(v, 1, 0))
        dn = jnp.where(last, 0.0, pltpu.roll(v, N - 1, 0))
        cat = jnp.concatenate([up, v, dn], axis=-1)                      # (N, 384)
        return jnp.dot(cat.astype(jnp.bfloat16), w,
                       preferred_element_type=jnp.float32) + b

    a = conv1d_k3(p2, wc1, bc1)                                          # (N, 128)
    a = conv1d_k3(a, wc2, bc2)                                           # (N, 128)
    a = jnp.dot(a.astype(jnp.bfloat16), wc3,
                preferred_element_type=jnp.float32) + bc3                # (N, 128)
    angle_ref[...] = a.reshape(nb, H, CP)


# --------------------------------------------------------------------------------
# Host-side packing: 6 weight blocks -> one bf16 (R,128) slab, 8 bias rows -> one
# f32 (8,128) slab.  All blocks are 128 lanes wide; junk columns are zero so the
# padded math is exact.
# --------------------------------------------------------------------------------
def pack_params(params):
    head_names = ("dist", "omega", "theta", "phi")
    Cin, C = params["ws"].shape
    assert 4 * C <= CP and C <= CP
    head_out_dims = tuple(int(params[f"{n}_w2"].shape[1]) for n in head_names)
    assert sum(head_out_dims) <= CP
    Oa = int(params["wc3"].shape[1])
    assert Oa <= CP
    KC = -(-Cin // 16) * 16            # bf16 sublane tile -> keep slab offsets 16-aligned

    def pad2(a, rows, cols=CP):
        out = jnp.zeros((rows, cols), jnp.float32)
        a = jnp.asarray(a, jnp.float32)
        return out.at[:a.shape[0], :a.shape[1]].set(a)

    ws_pad = pad2(params["ws"], KC)                                       # (KC, 128)

    w1cat = jnp.concatenate([params[f"{n}_w1"] for n in head_names], axis=1)  # (C, 4C)
    w1_pad = pad2(w1cat, CP)                                              # (128, 128)

    w2_pad = jnp.zeros((CP, CP), jnp.float32)                             # block-diagonal
    b2_row = jnp.zeros((1, CP), jnp.float32)
    off = 0
    for i, n in enumerate(head_names):
        od = head_out_dims[i]
        w2_pad = w2_pad.at[i * C:(i + 1) * C, off:off + od].set(
            jnp.asarray(params[f"{n}_w2"], jnp.float32))
        b2_row = b2_row.at[:, off:off + od].set(
            jnp.asarray(params[f"{n}_b2"], jnp.float32).reshape(1, -1))
        off += od

    def merge_taps(w_taps):
        # w_taps: (3, Cin_tap, 128); tap t goes to rows [t*128 : t*128+Cin_tap],
        # matching the in-kernel concat order [up | v | dn] (each block 128 lanes).
        out = jnp.zeros((3 * CP, CP), jnp.float32)
        for t in range(3):
            wt = jnp.asarray(w_taps[t], jnp.float32)
            out = out.at[t * CP:t * CP + wt.shape[0], :wt.shape[1]].set(wt)
        return out

    wc1r = merge_taps(params["wc1"])                                      # (384, 128)
    wc2r = merge_taps(params["wc2"])                                      # (384, 128)
    wc3_pad = pad2(params["wc3"], CP)                                     # (128, 128)

    blocks = [ws_pad, w1_pad, w2_pad, wc1r, wc2r, wc3_pad]
    woffs, r = [], 0
    for blk in blocks:
        woffs.append(r)
        r += blk.shape[0]
    wslab = jnp.concatenate(blocks, axis=0).astype(jnp.bfloat16)          # (R, 128) bf16

    def brow(a):
        out = jnp.zeros((1, CP), jnp.float32)
        a = jnp.asarray(a, jnp.float32).reshape(1, -1)
        return out.at[:, :a.shape[1]].set(a)

    b1cat = jnp.concatenate([params[f"{n}_b1"] for n in head_names], axis=1)
    gcat = jnp.concatenate([params[f"{n}_g"] for n in head_names], axis=1)
    becat = jnp.concatenate([params[f"{n}_be"] for n in head_names], axis=1)
    bslab = jnp.concatenate([
        brow(params["bs"]), brow(b1cat), brow(gcat), brow(becat),
        b2_row, brow(params["bc1"]), brow(params["bc2"]), brow(params["bc3"]),
    ], axis=0)                                                            # (8, 128) f32

    meta = dict(head_out_dims=head_out_dims, Oa=Oa, Cin=Cin, kc=KC,
                woffs=tuple(woffs))
    return wslab, bslab, meta


def _samples_per_step(B):
    """Whole batch per grid step on single-TC chips (v5e/v6e); one sample per step
    on dual-TC v7x so the 'parallel' batch axis splits across the two cores."""
    try:
        kind = jax.devices()[0].device_kind.lower()
        if "v7" in kind:
            return 1
    except Exception:
        pass
    return B


def attentive_dist_forward(x1, wslab, bslab, *, head_out_dims, Oa, woffs, kc,
                           pool="Max", samples_per_step=None):
    """x1: (B, Cin, H, W) float32 (PyTorch NCHW). Returns the 6-tuple of the
    non-attention AttentiveDist.forward (PyTorch conventions)."""
    B, Cin, H, W = x1.shape
    HW = H * W

    if samples_per_step is None:
        samples_per_step = _samples_per_step(B)
    nb = max(1, min(B, samples_per_step))
    while B % nb:
        nb -= 1
    G = B // nb

    # NCHW -> (B, H*W, kc) bf16 (zero-padded channels; halves the activation DMA).
    x = jnp.transpose(x1, (0, 2, 3, 1)).reshape(B, HW, Cin)
    if kc != Cin:
        x = jnp.pad(x, ((0, 0), (0, 0), (0, kc - Cin)))
    x = x.astype(jnp.bfloat16)

    kern = functools.partial(_fused_kernel, nb=nb, H=H, W=W, kc=kc,
                             pool=pool, woffs=woffs)

    in_specs = [
        pl.BlockSpec((nb, HW, kc), lambda i: (i, 0, 0)),
        pl.BlockSpec(wslab.shape, lambda i: (0, 0)),   # constant index_map -> resident
        pl.BlockSpec(bslab.shape, lambda i: (0, 0)),
    ]
    out_shape = (jax.ShapeDtypeStruct((B, CP, HW), jnp.float32),   # heads, channel-major
                 jax.ShapeDtypeStruct((B, H, CP), jnp.float32))    # angle, lane-dense
    out_specs = (pl.BlockSpec((nb, CP, HW), lambda i: (i, 0, 0)),
                 pl.BlockSpec((nb, H, CP), lambda i: (i, 0, 0)))

    heads, angle = pl.pallas_call(
        kern,
        grid=(G,),
        in_specs=in_specs,
        out_specs=out_specs,
        out_shape=out_shape,
        compiler_params=pltpu.CompilerParams(dimension_semantics=("parallel",)),
    )(x, wslab, bslab)

    # heads is (B, 128, H*W) channel-major: per-head handling is slice + reshape only.
    outs2d = []
    off = 0
    for od in head_out_dims:
        outs2d.append(heads[:, off:off + od, :].reshape(B, od, H, W))
        off += od
    ang = jnp.swapaxes(angle[:, :, :Oa], 1, 2)                     # (B, Oa, H) — tiny
    half = Oa // 2
    return (outs2d[0], outs2d[1], outs2d[2], outs2d[3],
            ang[:, :half, :], ang[:, half:, :])


def init_params(key, Cin, C, Od, Oo, Ot, Op, Oa):
    keys = iter(jax.random.split(key, 64))

    def w(shape, scale=0.1):
        return (scale * jax.random.normal(next(keys), shape)).astype(jnp.float32)

    p = {"ws": w((Cin, C)), "bs": w((1, C), 0.01)}
    for n, od in zip(("dist", "omega", "theta", "phi"), (Od, Oo, Ot, Op)):
        p[f"{n}_w1"] = w((C, C))
        p[f"{n}_b1"] = w((1, C), 0.01)
        p[f"{n}_g"] = jnp.ones((1, C), jnp.float32)    # InstanceNorm affine weight init
        p[f"{n}_be"] = jnp.zeros((1, C), jnp.float32)  # InstanceNorm affine bias init
        p[f"{n}_w2"] = w((C, od))
        p[f"{n}_b2"] = w((1, od), 0.01)
    # Conv1d weights stored as (kernel_tap, Cin, Cout) == PyTorch (Cout, Cin, k) transposed
    p["wc1"] = w((3, C, 128));   p["bc1"] = w((1, 128), 0.01)
    p["wc2"] = w((3, 128, 128)); p["bc2"] = w((1, 128), 0.01)
    p["wc3"] = w((128, Oa));     p["bc3"] = w((1, Oa), 0.01)
    return p


if __name__ == "__main__":
    B, Cin, H, W = 2, 8, 16, 16
    C = 32
    Od, Oo, Ot, Op, Oa = 10, 25, 25, 13, 8   # dist / omega / theta / phi / angle channels

    key = jax.random.PRNGKey(0)
    kx, kp = jax.random.split(key)
    x1 = jax.random.normal(kx, (B, Cin, H, W), jnp.float32)
    params = init_params(kp, Cin, C, Od, Oo, Ot, Op, Oa)
    wslab, bslab, meta = pack_params(params)

    fwd = jax.jit(functools.partial(
        attentive_dist_forward,
        head_out_dims=meta["head_out_dims"], Oa=meta["Oa"],
        woffs=meta["woffs"], kc=meta["kc"], pool="Max"))
    outs = jax.block_until_ready(fwd(x1, wslab, bslab))

    assert outs[0].shape == (B, Od, H, W)
    assert outs[1].shape == (B, Oo, H, W)
    assert outs[2].shape == (B, Ot, H, W)
    assert outs[3].shape == (B, Op, H, W)
    assert outs[4].shape == (B, Oa // 2, H)
    assert outs[5].shape == (B, Oa - Oa // 2, H)
    print("KERNEL_OK")
</pallas_src>

<mosaic_0001>
module attributes {stable_mosaic.version = 11 : i64} {
  func.func @_fused_kernel(%arg0: i32, %arg1: memref<2x256x16xbf16, #tpu.memory_space<vmem>>, %arg2: memref<1168x128xbf16, #tpu.memory_space<vmem>>, %arg3: memref<8x128xf32, #tpu.memory_space<vmem>>, %arg4: memref<2x128x256xf32, #tpu.memory_space<vmem>>, %arg5: memref<2x16x128xf32, #tpu.memory_space<vmem>>) attributes {dimension_semantics = [#tpu.dimension_semantics<parallel>], iteration_bounds = array<i64: 1>, scalar_prefetch = 0 : i64, scratch_operands = 0 : i64, tpu.core_type = #tpu.core_type<tc>, window_params = [{transform_indices = @transform_0, window_bounds = array<i64: 2, 256, 16>}, {pipeline_mode = #tpu.pipeline_mode<synchronous>, transform_indices = @transform_1, window_bounds = array<i64: 1168, 128>}, {pipeline_mode = #tpu.pipeline_mode<synchronous>, transform_indices = @transform_2, window_bounds = array<i64: 8, 128>}, {transform_indices = @transform_3, window_bounds = array<i64: 2, 128, 256>}, {transform_indices = @transform_4, window_bounds = array<i64: 2, 16, 128>}]} {
    %c0 = arith.constant 0 : index
    %c0_0 = arith.constant 0 : index
    %0 = vector.load %arg3[%c0, %c0_0] : memref<8x128xf32, #tpu.memory_space<vmem>>, vector<8x128xf32>
    %1 = vector.extract_strided_slice %0 {offsets = [0, 0], sizes = [1, 128], strides = [1, 1]} : vector<8x128xf32> to vector<1x128xf32>
    %2 = vector.extract_strided_slice %0 {offsets = [1, 0], sizes = [1, 128], strides = [1, 1]} : vector<8x128xf32> to vector<1x128xf32>
    %3 = vector.extract_strided_slice %0 {offsets = [2, 0], sizes = [1, 128], strides = [1, 1]} : vector<8x128xf32> to vector<1x128xf32>
    %4 = vector.extract_strided_slice %0 {offsets = [3, 0], sizes = [1, 128], strides = [1, 1]} : vector<8x128xf32> to vector<1x128xf32>
    %5 = vector.extract_strided_slice %0 {offsets = [4, 0], sizes = [1, 128], strides = [1, 1]} : vector<8x128xf32> to vector<1x128xf32>
    %6 = vector.extract_strided_slice %0 {offsets = [5, 0], sizes = [1, 128], strides = [1, 1]} : vector<8x128xf32> to vector<1x128xf32>
    %7 = vector.extract_strided_slice %0 {offsets = [6, 0], sizes = [1, 128], strides = [1, 1]} : vector<8x128xf32> to vector<1x128xf32>
    %8 = vector.extract_strided_slice %0 {offsets = [7, 0], sizes = [1, 128], strides = [1, 1]} : vector<8x128xf32> to vector<1x128xf32>
    %c0_1 = arith.constant 0 : index
    %c0_2 = arith.constant 0 : index
    %9 = vector.load %arg2[%c0_1, %c0_2] : memref<1168x128xbf16, #tpu.memory_space<vmem>>, vector<16x128xbf16>
    %c16 = arith.constant 16 : index
    %c0_3 = arith.constant 0 : index
    %10 = vector.load %arg2[%c16, %c0_3] : memref<1168x128xbf16, #tpu.memory_space<vmem>>, vector<128x128xbf16>
    %c144 = arith.constant 144 : index
    %c0_4 = arith.constant 0 : index
    %11 = vector.load %arg2[%c144, %c0_4] : memref<1168x128xbf16, #tpu.memory_space<vmem>>, vector<128x128xbf16>
    %c272 = arith.constant 272 : index
    %c0_5 = arith.constant 0 : index
    %12 = vector.load %arg2[%c272, %c0_5] : memref<1168x128xbf16, #tpu.memory_space<vmem>>, vector<384x128xbf16>
    %c656 = arith.constant 656 : index
    %c0_6 = arith.constant 0 : index
    %13 = vector.load %arg2[%c656, %c0_6] : memref<1168x128xbf16, #tpu.memory_space<vmem>>, vector<384x128xbf16>
    %c1040 = arith.constant 1040 : index
    %c0_7 = arith.constant 0 : index
    %14 = vector.load %arg2[%c1040, %c0_7] : memref<1168x128xbf16, #tpu.memory_space<vmem>>, vector<128x128xbf16>
    %c0_8 = arith.constant 0 : index
    %c0_9 = arith.constant 0 : index
    %c0_10 = arith.constant 0 : index
    %15 = vector.load %arg1[%c0_8, %c0_9, %c0_10] : memref<2x256x16xbf16, #tpu.memory_space<vmem>>, vector<2x256x16xbf16>
    %16 = vector.shape_cast %15 : vector<2x256x16xbf16> to vector<512x16xbf16>
    %cst = arith.constant dense<0.000000e+00> : vector<512x128xf32>
    %17 = tpu.matmul %16, %9, %cst {dimension_numbers = #tpu.dot_dimension_numbers<[1], [0], [0], [1], [0, 0, 1, 1], [], []>} : vector<512x16xbf16>, vector<16x128xbf16>, vector<512x128xf32> -> vector<512x128xf32>
    %18 = vector.broadcast %1 : vector<1x128xf32> to vector<512x128xf32>
    %19 = arith.addf %17, %18 : vector<512x128xf32>
    %cst_11 = arith.constant 0.000000e+00 : f32
    %20 = vector.broadcast %cst_11 : f32 to vector<512x128xf32>
    %21 = arith.cmpf ogt, %19, %20 : vector<512x128xf32>
    %cst_12 = arith.constant 0.000000e+00 : f32
    %22 = vector.broadcast %cst_12 : f32 to vector<512x128xf32>
    %23 = arith.minimumf %19, %22 : vector<512x128xf32>
    %24 = math.exp %23 : vector<512x128xf32>
    %cst_13 = arith.constant 1.000000e+00 : f32
    %25 = vector.broadcast %cst_13 : f32 to vector<512x128xf32>
    %26 = arith.subf %24, %25 : vector<512x128xf32>
    %27 = arith.select %21, %19, %26 : vector<512x128xi1>, vector<512x128xf32>
    %28 = vector.shape_cast %27 : vector<512x128xf32> to vector<32x16x128xf32>
    %cst_14 = arith.constant dense<0xFF800000> : vector<32x128xf32>
    %29 = vector.multi_reduction <maximumf>, %28, %cst_14 [1] : vector<32x16x128xf32> to vector<32x128xf32>
    %30 = arith.truncf %27 : vector<512x128xf32> to vector<512x128xbf16>
    %cst_15 = arith.constant dense<0.000000e+00> : vector<512x128xf32>
    %31 = tpu.matmul %30, %10, %cst_15 {dimension_numbers = #tpu.dot_dimension_numbers<[1], [0], [0], [1], [0, 0, 1, 1], [], []>} : vector<512x128xbf16>, vector<128x128xbf16>, vector<512x128xf32> -> vector<512x128xf32>
    %32 = vector.broadcast %2 : vector<1x128xf32> to vector<512x128xf32>
    %33 = arith.addf %31, %32 : vector<512x128xf32>
    %34 = vector.shape_cast %33 : vector<512x128xf32> to vector<2x256x128xf32>
    %cst_16 = arith.constant dense<0.000000e+00> : vector<2x128xf32>
    %35 = vector.multi_reduction <add>, %34, %cst_16 [1] : vector<2x256x128xf32> to vector<2x128xf32>
    %36 = vector.shape_cast %35 : vector<2x128xf32> to vector<2x1x128xf32>
    %cst_17 = arith.constant 2.560000e+02 : f32
    %37 = vector.broadcast %cst_17 : f32 to vector<2x1x128xf32>
    %38 = arith.divf %36, %37 : vector<2x1x128xf32>
    %39 = vector.broadcast %38 : vector<2x1x128xf32> to vector<2x256x128xf32>
    %40 = arith.subf %34, %39 : vector<2x256x128xf32>
    %41 = arith.mulf %40, %40 : vector<2x256x128xf32>
    %cst_18 = arith.constant dense<0.000000e+00> : vector<2x128xf32>
    %42 = vector.multi_reduction <add>, %41, %cst_18 [1] : vector<2x256x128xf32> to vector<2x128xf32>
    %43 = vector.shape_cast %42 : vector<2x128xf32> to vector<2x1x128xf32>
    %cst_19 = arith.constant 2.560000e+02 : f32
    %44 = vector.broadcast %cst_19 : f32 to vector<2x1x128xf32>
    %45 = arith.divf %43, %44 : vector<2x1x128xf32>
    %cst_20 = arith.constant 9.99999974E-6 : f32
    %46 = vector.broadcast %cst_20 : f32 to vector<2x1x128xf32>
    %47 = arith.addf %45, %46 : vector<2x1x128xf32>
    %48 = math.rsqrt %47 : vector<2x1x128xf32>
    %49 = vector.broadcast %48 : vector<2x1x128xf32> to vector<2x256x128xf32>
    %50 = arith.mulf %40, %49 : vector<2x256x128xf32>
    %51 = vector.shape_cast %3 : vector<1x128xf32> to vector<1x1x128xf32>
    %52 = vector.broadcast %51 : vector<1x1x128xf32> to vector<2x256x128xf32>
    %53 = arith.mulf %50, %52 : vector<2x256x128xf32>
    %54 = vector.shape_cast %4 : vector<1x128xf32> to vector<1x1x128xf32>
    %55 = vector.broadcast %54 : vector<1x1x128xf32> to vector<2x256x128xf32>
    %56 = arith.addf %53, %55 : vector<2x256x128xf32>
    %cst_21 = arith.constant 0.000000e+00 : f32
    %57 = vector.broadcast %cst_21 : f32 to vector<2x256x128xf32>
    %58 = arith.cmpf ogt, %56, %57 : vector<2x256x128xf32>
    %cst_22 = arith.constant 0.000000e+00 : f32
    %59 = vector.broadcast %cst_22 : f32 to vector<2x256x128xf32>
    %60 = arith.minimumf %56, %59 : vector<2x256x128xf32>
    %61 = math.exp %60 : vector<2x256x128xf32>
    %cst_23 = arith.constant 1.000000e+00 : f32
    %62 = vector.broadcast %cst_23 : f32 to vector<2x256x128xf32>
    %63 = arith.subf %61, %62 : vector<2x256x128xf32>
    %64 = arith.select %58, %56, %63 : vector<2x256x128xi1>, vector<2x256x128xf32>
    %65 = vector.shape_cast %64 : vector<2x256x128xf32> to vector<512x128xf32>
    %66 = arith.truncf %65 : vector<512x128xf32> to vector<512x128xbf16>
    %cst_24 = arith.constant dense<0.000000e+00> : vector<512x128xf32>
    %67 = tpu.matmul %66, %11, %cst_24 {dimension_numbers = #tpu.dot_dimension_numbers<[1], [0], [0], [1], [0, 0, 1, 1], [], []>} : vector<512x128xbf16>, vector<128x128xbf16>, vector<512x128xf32> -> vector<512x128xf32>
    %68 = vector.broadcast %5 : vector<1x128xf32> to vector<512x128xf32>
    %69 = arith.addf %67, %68 : vector<512x128xf32>
    %70 = vector.extract_strided_slice %69 {offsets = [0, 0], sizes = [256, 128], strides = [1, 1]} : vector<512x128xf32> to vector<256x128xf32>
    %71 = tpu.transpose %70, [1, 0] : vector<256x128xf32> -> vector<128x256xf32>
    %c0_25 = arith.constant 0 : index
    %c0_26 = arith.constant 0 : index
    %c0_27 = arith.constant 0 : index
    %72 = vector.load %arg4[%c0_25, %c0_26, %c0_27] : memref<2x128x256xf32, #tpu.memory_space<vmem>>, vector<1x128x256xf32>
    %73 = vector.shape_cast %72 : vector<1x128x256xf32> to vector<128x256xf32>
    %74 = vector.shape_cast %71 : vector<128x256xf32> to vector<1x128x256xf32>
    tpu.vector_store %arg4[%c0_25, %c0_26, %c0_27], %74 {strides = array<i32>} : memref<2x128x256xf32, #tpu.memory_space<vmem>>, vector<1x128x256xf32>,
    %75 = vector.extract_strided_slice %69 {offsets = [256, 0], sizes = [256, 128], strides = [1, 1]} : vector<512x128xf32> to vector<256x128xf32>
    %76 = tpu.transpose %75, [1, 0] : vector<256x128xf32> -> vector<128x256xf32>
    %c1 = arith.constant 1 : index
    %c0_28 = arith.constant 0 : index
    %c0_29 = arith.constant 0 : index
    %77 = vector.load %arg4[%c1, %c0_28, %c0_29] : memref<2x128x256xf32, #tpu.memory_space<vmem>>, vector<1x128x256xf32>
    %78 = vector.shape_cast %77 : vector<1x128x256xf32> to vector<128x256xf32>
    %79 = vector.shape_cast %76 : vector<128x256xf32> to vector<1x128x256xf32>
    tpu.vector_store %arg4[%c1, %c0_28, %c0_29], %79 {strides = array<i32>} : memref<2x128x256xf32, #tpu.memory_space<vmem>>, vector<1x128x256xf32>,
    %80 = tpu.iota {dimensions = array<i32: 0>} : vector<32x1xi32>
    %c16_i32 = arith.constant 16 : i32
    %c0_i32 = arith.constant 0 : i32
    %81 = arith.cmpi eq, %c16_i32, %c0_i32 : i32
    %c1_i32 = arith.constant 1 : i32
    %82 = arith.select %81, %c1_i32, %c16_i32 : i32
    %83 = vector.broadcast %82 : i32 to vector<32x1xi32>
    %84 = arith.remsi %80, %83 : vector<32x1xi32>
    %c0_i32_30 = arith.constant 0 : i32
    %85 = vector.broadcast %c0_i32_30 : i32 to vector<32x1xi32>
    %86 = arith.cmpi ne, %84, %85 : vector<32x1xi32>
    %c0_i32_31 = arith.constant 0 : i32
    %87 = vector.broadcast %c0_i32_31 : i32 to vector<32x1xi32>
    %88 = arith.cmpi slt, %84, %87 : vector<32x1xi32>
    %c0_i32_32 = arith.constant 0 : i32
    %89 = arith.cmpi slt, %82, %c0_i32_32 : i32
    %90 = vector.broadcast %89 : i1 to vector<32x1xi1>
    %91 = vector.broadcast %90 : vector<32x1xi1> to vector<32x1xi1>
    %92 = arith.xori %88, %91 : vector<32x1xi1>
    %93 = arith.andi %92, %86 : vector<32x1xi1>
    %94 = vector.broadcast %82 : i32 to vector<32x1xi32>
    %95 = arith.addi %84, %94 : vector<32x1xi32>
    %96 = arith.select %93, %95, %84 : vector<32x1xi1>, vector<32x1xi32>
    %c0_i32_33 = arith.constant 0 : i32
    %97 = vector.broadcast %c0_i32_33 : i32 to vector<32x1xi32>
    %98 = arith.cmpi eq, %96, %97 : vector<32x1xi32>
    %c15_i32 = arith.constant 15 : i32
    %99 = vector.broadcast %c15_i32 : i32 to vector<32x1xi32>
    %100 = arith.cmpi eq, %96, %99 : vector<32x1xi32>
    %c1_i32_34 = arith.constant 1 : i32
    %101 = tpu.dynamic_rotate %29 by %c1_i32_34 dim 0 : vector<32x128xf32>, i32 -> vector<32x128xf32>
    %cst_35 = arith.constant 0.000000e+00 : f32
    %102 = vector.shape_cast %98 : vector<32x1xi1> to vector<32x1xi1>
    %103 = vector.broadcast %102 : vector<32x1xi1> to vector<32x128xi1>
    %104 = vector.broadcast %cst_35 : f32 to vector<32x128xf32>
    %105 = arith.select %103, %104, %101 : vector<32x128xi1>, vector<32x128xf32>
    %c31_i32 = arith.constant 31 : i32
    %106 = tpu.dynamic_rotate %29 by %c31_i32 dim 0 : vector<32x128xf32>, i32 -> vector<32x128xf32>
    %cst_36 = arith.constant 0.000000e+00 : f32
    %107 = vector.shape_cast %100 : vector<32x1xi1> to vector<32x1xi1>
    %108 = vector.broadcast %107 : vector<32x1xi1> to vector<32x128xi1>
    %109 = vector.broadcast %cst_36 : f32 to vector<32x128xf32>
    %110 = arith.select %108, %109, %106 : vector<32x128xi1>, vector<32x128xf32>
    %111 = tpu.concatenate %105, %29, %110 in 1 : vector<32x128xf32>, vector<32x128xf32>, vector<32x128xf32> -> vector<32x384xf32>
    %112 = arith.truncf %111 : vector<32x384xf32> to vector<32x384xbf16>
    %cst_37 = arith.constant dense<0.000000e+00> : vector<32x128xf32>
    %113 = tpu.matmul %112, %12, %cst_37 {dimension_numbers = #tpu.dot_dimension_numbers<[1], [0], [0], [1], [0, 0, 1, 1], [], []>} : vector<32x384xbf16>, vector<384x128xbf16>, vector<32x128xf32> -> vector<32x128xf32>
    %114 = vector.broadcast %6 : vector<1x128xf32> to vector<32x128xf32>
    %115 = arith.addf %113, %114 : vector<32x128xf32>
    %c1_i32_38 = arith.constant 1 : i32
    %116 = tpu.dynamic_rotate %115 by %c1_i32_38 dim 0 : vector<32x128xf32>, i32 -> vector<32x128xf32>
    %cst_39 = arith.constant 0.000000e+00 : f32
    %117 = vector.shape_cast %98 : vector<32x1xi1> to vector<32x1xi1>
    %118 = vector.broadcast %117 : vector<32x1xi1> to vector<32x128xi1>
    %119 = vector.broadcast %cst_39 : f32 to vector<32x128xf32>
    %120 = arith.select %118, %119, %116 : vector<32x128xi1>, vector<32x128xf32>
    %c31_i32_40 = arith.constant 31 : i32
    %121 = tpu.dynamic_rotate %115 by %c31_i32_40 dim 0 : vector<32x128xf32>, i32 -> vector<32x128xf32>
    %cst_41 = arith.constant 0.000000e+00 : f32
    %122 = vector.shape_cast %100 : vector<32x1xi1> to vector<32x1xi1>
    %123 = vector.broadcast %122 : vector<32x1xi1> to vector<32x128xi1>
    %124 = vector.broadcast %cst_41 : f32 to vector<32x128xf32>
    %125 = arith.select %123, %124, %121 : vector<32x128xi1>, vector<32x128xf32>
    %126 = tpu.concatenate %120, %115, %125 in 1 : vector<32x128xf32>, vector<32x128xf32>, vector<32x128xf32> -> vector<32x384xf32>
    %127 = arith.truncf %126 : vector<32x384xf32> to vector<32x384xbf16>
    %cst_42 = arith.constant dense<0.000000e+00> : vector<32x128xf32>
    %128 = tpu.matmul %127, %13, %cst_42 {dimension_numbers = #tpu.dot_dimension_numbers<[1], [0], [0], [1], [0, 0, 1, 1], [], []>} : vector<32x384xbf16>, vector<384x128xbf16>, vector<32x128xf32> -> vector<32x128xf32>
    %129 = vector.broadcast %7 : vector<1x128xf32> to vector<32x128xf32>
    %130 = arith.addf %128, %129 : vector<32x128xf32>
    %131 = arith.truncf %130 : vector<32x128xf32> to vector<32x128xbf16>
    %cst_43 = arith.constant dense<0.000000e+00> : vector<32x128xf32>
    %132 = tpu.matmul %131, %14, %cst_43 {dimension_numbers = #tpu.dot_dimension_numbers<[1], [0], [0], [1], [0, 0, 1, 1], [], []>} : vector<32x128xbf16>, vector<128x128xbf16>, vector<32x128xf32> -> vector<32x128xf32>
    %133 = vector.broadcast %8 : vector<1x128xf32> to vector<32x128xf32>
    %134 = arith.addf %132, %133 : vector<32x128xf32>
    %135 = vector.shape_cast %134 : vector<32x128xf32> to vector<2x16x128xf32>
    %c0_44 = arith.constant 0 : index
    %c0_45 = arith.constant 0 : index
    %c0_46 = arith.constant 0 : index
    %136 = vector.load %arg5[%c0_44, %c0_45, %c0_46] : memref<2x16x128xf32, #tpu.memory_space<vmem>>, vector<2x16x128xf32>
    tpu.vector_store %arg5[%c0_44, %c0_45, %c0_46], %135 {strides = array<i32>} : memref<2x16x128xf32, #tpu.memory_space<vmem>>, vector<2x16x128xf32>,
    return
  }
  func.func @transform_0(%arg0: i32) -> (i32, i32, i32) {
    %c0_i32 = arith.constant 0 : i32
    %c0_i32_0 = arith.constant 0 : i32
    %c0_i32_1 = arith.constant 0 : i32
    return %arg0, %c0_i32, %c0_i32_0 : i32, i32, i32
  }
  func.func @transform_1(%arg0: i32) -> (i32, i32) {
    %c0_i32 = arith.constant 0 : i32
    %c0_i32_0 = arith.constant 0 : i32
    %c0_i32_1 = arith.constant 0 : i32
    return %c0_i32, %c0_i32_0 : i32, i32
  }
  func.func @transform_2(%arg0: i32) -> (i32, i32) {
    %c0_i32 = arith.constant 0 : i32
    %c0_i32_0 = arith.constant 0 : i32
    %c0_i32_1 = arith.constant 0 : i32
    return %c0_i32, %c0_i32_0 : i32, i32
  }
  func.func @transform_3(%arg0: i32) -> (i32, i32, i32) {
    %c0_i32 = arith.constant 0 : i32
    %c0_i32_0 = arith.constant 0 : i32
    %c0_i32_1 = arith.constant 0 : i32
    return %arg0, %c0_i32, %c0_i32_0 : i32, i32, i32
  }
  func.func @transform_4(%arg0: i32) -> (i32, i32, i32) {
    %c0_i32 = arith.constant 0 : i32
    %c0_i32_0 = arith.constant 0 : i32
    %c0_i32_1 = arith.constant 0 : i32
    return %arg0, %c0_i32, %c0_i32_0 : i32, i32, i32
  }
}

</mosaic_0001>

<bundles_post_ra>
// kernel: attentive_dist_forward.1
= control target key start
LH: loop header
LB: loop body
LE: loop exit
PB: predicated region body
PF: predicated region fallthrough
CT: control target
= control target key end

     0   :  { %vm398_vm0 = vcmask 130048   ;;  %v228_v41 = vlaneseq  ;;  %vm3293_vm9 = vcmask 1041409   ;;  %vm3295_vm10 = vcmask 1042434   ;;  %s8095_s1 = inlined_call_operand.vmem [shape: bf16[1168,128], index: 1, kind: input, shape index: {}]   ;;  %s8096_s0 = inlined_call_operand.vmem [shape: bf16[2,256,16], index: 0, kind: input, shape index: {}]   ;;  %s8097_s2 = inlined_call_operand.vmem [shape: f32[8,128], index: 2, kind: input, shape index: {}]   ;;  %s8098_s3 = inlined_call_operand.vmem [shape: f32[2,128,256], index: 3, kind: output, shape index: {0}]   ;;  %s8099_s4 = inlined_call_operand.vmem [shape: f32[2,16,128], index: 4, kind: output, shape index: {1}]  }
   0x1   :  { %v4836_v0 = vld [vmem:[%s8095_s1] sm:$0xff]   ;;  %v4838_v2 = vld [vmem:[%s8096_s0 + $0x8] sm:$0xff]   ;;  %v4839_v3 = vld [vmem:[%s8096_s0 + $0x10] sm:$0xff]  }
   0x2   :  { %v4837_v1 = vld [vmem:[%s8096_s0] sm:$0xff]   ;;  %4549 = vmatprep.subr.bf16.mxu0 %v4836_v0  ;;  %v4840_v4 = vld [vmem:[%s8096_s0 + $0x18] sm:$0xff]   ;;  %v4842_v6 = vld [vmem:[%s8096_s0 + $0x28] sm:$0xff]   ;;  %v5385_v42 = vshrl.u32 %v228_v41, 7 }
   0x3   :  { %4550 = vmatpush3.bf16.msra.mxu0 %v4836_v0  ;;  %4551 = vmatprep.mubr.msk.bf16.mxu0 %vm398_vm0, %v4837_v1  ;;  %v4841_v5 = vld [vmem:[%s8096_s0 + $0x20] sm:$0xff]   ;;  %v4843_v7 = vld [vmem:[%s8096_s0 + $0x30] sm:$0xff]   ;;  %v4844_v8 = vld [vmem:[%s8096_s0 + $0x38] sm:$0xff]  }
   0x4   :  { %v4845_v9 = vld [vmem:[%s8096_s0 + $0x40] sm:$0xff]   ;;  %v4846_v10 = vld [vmem:[%s8096_s0 + $0x48] sm:$0xff]   ;;  %v4870_v12 = vld [vmem:[%s8095_s1 + $0x10] sm:$0xff]   ;;  %8167 = vst [vmem:[#allocation2_spill] sm:$0xff] %v5385_v42  ;;  %v230_v43 = vsub.s32 0, %v5385_v42 }
   0x5   :  { %v4869_v11 = vld [vmem:[%s8095_s1 + $0x8] sm:$0xff]   ;;  %v4847_v13 = vld [vmem:[%s8096_s0 + $0x50] sm:$0xff]   ;;  %v4848_v14 = vld [vmem:[%s8096_s0 + $0x58] sm:$0xff]  }
   0x6   :  { %4552 = vmatmul.mubr.msk.bf16.vlgmr.msra.gmra.mrb[0].mxu0 %vm398_vm0, %v4838_v2  ;;  %4615 = vmatprep.subr.bf16.mxu1 %v4869_v11  ;;  %v4849_v15 = vld [vmem:[%s8096_s0 + $0x60] sm:$0xff]   ;;  %v4850_v16 = vld [vmem:[%s8096_s0 + $0x68] sm:$0xff]   ;;  %v4851_v17 = vld [vmem:[%s8096_s0 + $0x70] sm:$0xff]  }
   0x7   :  { %4555 = vmatprep.mubr.msk.bf16.mxu0 %vm398_vm0, %v4839_v3  ;;  %4616 = vmatpush3.bf16.msra.mxu1 %v4869_v11  ;;  %v4852_v18 = vld [vmem:[%s8096_s0 + $0x78] sm:$0xff]   ;;  %v4853_v19 = vld [vmem:[%s8096_s0 + $0x80] sm:$0xff]   ;;  %v4854_v20 = vld [vmem:[%s8096_s0 + $0x88] sm:$0xff]  }
   0x8   :  { %4617 = vmatprep.subr.bf16.mxu1 %v4870_v12  ;;  %v4855_v21 = vld [vmem:[%s8096_s0 + $0x90] sm:$0xff]   ;;  %v4856_v22 = vld [vmem:[%s8096_s0 + $0x98] sm:$0xff]   ;;  %v4857_v23 = vld [vmem:[%s8096_s0 + $0xa0] sm:$0xff]  }
   0x9   :  { %v4858_v24 = vld [vmem:[%s8096_s0 + $0xa8] sm:$0xff]   ;;  %v4859_v25 = vld [vmem:[%s8096_s0 + $0xb0] sm:$0xff]   ;;  %v4860_v26 = vld [vmem:[%s8096_s0 + $0xb8] sm:$0xff]  }
   0xa   :  { %v4871_v27 = vld [vmem:[%s8095_s1 + $0x18] sm:$0xff]   ;;  %v4861_v28 = vld [vmem:[%s8096_s0 + $0xc0] sm:$0xff]   ;;  %v4862_v30 = vld [vmem:[%s8096_s0 + $0xc8] sm:$0xff]  }
   0xb   :  { %4618 = vmatpush3.bf16.msra.mxu1 %v4870_v12  ;;  %v4872_v29 = vld [vmem:[%s8095_s1 + $0x20] sm:$0xff]   ;;  %v4873_v31 = vld [vmem:[%s8095_s1 + $0x28] sm:$0xff]   ;;  %v4863_v32 = vld [vmem:[%s8096_s0 + $0xd0] sm:$0xff]  }
   0xc   :  { %4619 = vmatprep.subr.bf16.mxu1 %v4871_v27  ;;  %v4874_v33 = vld [vmem:[%s8095_s1 + $0x30] sm:$0xff]   ;;  %v4864_v34 = vld [vmem:[%s8096_s0 + $0xd8] sm:$0xff]   ;;  %v4865_v36 = vld [vmem:[%s8096_s0 + $0xe0] sm:$0xff]  }
   0xd   :  { %v4875_v35 = vld [vmem:[%s8095_s1 + $0x38] sm:$0xff]   ;;  %v4876_v37 = vld [vmem:[%s8095_s1 + $0x40] sm:$0xff]   ;;  %v4866_v38 = vld [vmem:[%s8096_s0 + $0xe8] sm:$0xff]  }
   0xe   :  { %4556 = vmatmul.mubr.msk.bf16.gmra.mrb[4].mxu0 %vm398_vm0, %v4840_v4  ;;  %v4867_v39 = vld [vmem:[%s8096_s0 + $0xf0] sm:$0xff]   ;;  %v4868_v40 = vld [vmem:[%s8096_s0 + $0xf8] sm:$0xff]   ;;  %v17_v44 = vld [vmem:[%s8097_s2] sm:$0xff] }
   0xf   :  { %4559 = vmatprep.mubr.msk.bf16.mxu0 %vm398_vm0, %v4841_v5  ;;  %4620 = vmatpush3.bf16.msra.mxu1 %v4871_v27  ;;  %v5391_v45 = vrot.slane %v17_v44, %v230_v43  ;;  %v4877_v51 = vld [vmem:[%s8095_s1 + $0xc8] sm:$0xff]  }
  0x10   :  { %4621 = vmatprep.subr.bf16.mxu1 %v4872_v29 }
  0x13   :  { %4622 = vmatpush3.bf16.msra.mxu1 %v4872_v29 }
  0x14   :  { %4623 = vmatprep.subr.bf16.mxu1 %v4873_v31 }
  0x16   :  { %4560 = vmatmul.mubr.msk.bf16.gmra.mrb[8].mxu0 %vm398_vm0, %v4842_v6 }
  0x17   :  { %4563 = vmatprep.mubr.msk.bf16.mxu0 %vm398_vm0, %v4843_v7  ;;  %4624 = vmatpush3.bf16.msra.mxu1 %v4873_v31 }
  0x18   :  { %4625 = vmatprep.subr.bf16.mxu1 %v4874_v33 }
  0x1b   :  { %4626 = vmatpush3.bf16.msra.mxu1 %v4874_v33 }
  0x1c   :  { %4627 = vmatprep.subr.bf16.mxu1 %v4875_v35 }
  0x1e   :  { %4564 = vmatmul.mubr.msk.bf16.gmra.mrb[12].mxu0 %vm398_vm0, %v4844_v8 }
  0x1f   :  { %4567 = vmatprep.mubr.msk.bf16.mxu0 %vm398_vm0, %v4845_v9  ;;  %4628 = vmatpush3.bf16.msra.mxu1 %v4875_v35 }
  0x20   :  { %4629 = vmatprep.subr.bf16.mxu1 %v4876_v37 }
  0x23   :  { %4630 = vmatpush3.bf16.msra.mxu1 %v4876_v37 }
  0x24   :  { %4463 = vmatprep.subr.bf16.mxu1 %v4877_v51 }
  0x26   :  { %4568 = vmatmul.mubr.msk.bf16.gmra.mrb[16].mxu0 %vm398_vm0, %v4846_v10 }
  0x27   :  { %4571 = vmatprep.mubr.msk.bf16.mxu0 %vm398_vm0, %v4847_v13 }
  0x2e   :  { %4572 = vmatmul.mubr.msk.bf16.gmra.mrb[20].mxu0 %vm398_vm0, %v4848_v14 }
  0x2f   :  { %4575 = vmatprep.mubr.msk.bf16.mxu0 %vm398_vm0, %v4849_v15 }
  0x36   :  { %4576 = vmatmul.mubr.msk.bf16.gmra.mrb[24].mxu0 %vm398_vm0, %v4850_v16 }
  0x37   :  { %4579 = vmatprep.mubr.msk.bf16.mxu0 %vm398_vm0, %v4851_v17 }
  0x3e   :  { %4580 = vmatmul.mubr.msk.bf16.gmra.mrb[28].mxu0 %vm398_vm0, %v4852_v18 }
  0x3f   :  { %4583 = vmatprep.mubr.msk.bf16.mxu0 %vm398_vm0, %v4853_v19 }
  0x46   :  { %4584 = vmatmul.mubr.msk.bf16.gmra.mrb[32].mxu0 %vm398_vm0, %v4854_v20 }
  0x47   :  { %4587 = vmatprep.mubr.msk.bf16.mxu0 %vm398_vm0, %v4855_v21 }
  0x4e   :  { %4588 = vmatmul.mubr.msk.bf16.gmra.mrb[36].mxu0 %vm398_vm0, %v4856_v22 }
  0x4f   :  { %4591 = vmatprep.mubr.msk.bf16.mxu0 %vm398_vm0, %v4857_v23 }
  0x56   :  { %4592 = vmatmul.mubr.msk.bf16.gmra.mrb[40].mxu0 %vm398_vm0, %v4858_v24 }
  0x57   :  { %4595 = vmatprep.mubr.msk.bf16.mxu0 %vm398_vm0, %v4859_v25 }
  0x5e   :  { %4596 = vmatmul.mubr.msk.bf16.gmra.mrb[44].mxu0 %vm398_vm0, %v4860_v26 }
  0x5f   :  { %4599 = vmatprep.mubr.msk.bf16.mxu0 %vm398_vm0, %v4861_v28 }
  0x66   :  { %4600 = vmatmul.mubr.msk.bf16.gmra.mrb[48].mxu0 %vm398_vm0, %v4862_v30 }
  0x67   :  { %4603 = vmatprep.mubr.msk.bf16.mxu0 %vm398_vm0, %v4863_v32 }
  0x6e   :  { %4604 = vmatmul.mubr.msk.bf16.gmra.mrb[52].mxu0 %vm398_vm0, %v4864_v34 }
  0x6f   :  { %4607 = vmatprep.mubr.msk.bf16.mxu0 %vm398_vm0, %v4865_v36 }
  0x76   :  { %4608 = vmatmul.mubr.msk.bf16.gmra.mrb[56].mxu0 %vm398_vm0, %v4866_v38 }
  0x77   :  { %4611 = vmatprep.mubr.msk.bf16.mxu0 %vm398_vm0, %v4867_v39 }
  0x7e   :  { %4612 = vmatmul.mubr.msk.bf16.gmra.mrb[60].mxu0 %vm398_vm0, %v4868_v40 }
  0xd9   :  { %v4553_v46 = vpop.f32.mrb[0].mxu0 }
  0xda   :  { %v5394_v47 = vadd.f32 %v4553_v46, %v5391_v45  ;;  %v529_v48 = vpop.f32.mrb[1].mxu0 }
  0xdb   :  { %v530_v49 = vadd.f32 %v529_v48, %v5391_v45  ;;  %v4554_v50 = vpop.f32.mrb[2].mxu0 }
  0xdc   :  { %v5401_v52 = vadd.f32 %v4554_v50, %v5391_v45  ;;  %v532_v53 = vpop.f32.mrb[3].mxu0  ;;  %v850_v54 = vmin.f32 %v5394_v47, 0.0  ;;  %vm786_vm4 = vcmp.gt.f32.partialorder %v5394_v47, 0.0 }
  0xdd   :  { %v848_v55 = vmin.f32 %v530_v49, 0.0  ;;  %v533_v56 = vadd.f32 %v532_v53, %v5391_v45  ;;  %vm784_vm1 = vcmp.gt.f32.partialorder %v530_v49, 0.0 }
  0xde   :  { %v851_v57 = vmin.f32 %v5401_v52, 0.0  ;;  %v916_v61 = vmul.f32 1.442695, %v850_v54  ;;  %vm787_vm3 = vcmp.gt.f32.partialorder %v5401_v52, 0.0 }
  0xdf   :  { %v912_v58 = vmul.f32 1.442695, %v848_v55  ;;  %v849_v59 = vmin.f32 %v533_v56, 0.0  ;;  %vm785_vm2 = vcmp.gt.f32.partialorder %v533_v56, 0.0 }
  0xe0   :  { %v918_v60 = vmul.f32 1.442695, %v851_v57 }
  0xe1   :  { %4941 = vpow2.f32 %v912_v58  ;;  %v914_v62 = vmul.f32 1.442695, %v849_v59  ;;  %v4557_v63 = vpop.f32.mrb[4].mxu0 }
  0xe2   :  { %4943 = vpow2.f32 %v918_v60  ;;  %v5407_v0 = vadd.f32 %v4557_v63, %v5391_v45  ;;  %v545_v1 = vpop.f32.mrb[5].mxu0  ;;  %v4879_v63 = vld [vmem:[%s8095_s1 + $0xd0] sm:$0xff]  }
  0xe3   :  { %4945 = vpow2.f32 %v914_v62  ;;  %v5410_v2 = vadd.f32 %v545_v1, %v5391_v45  ;;  %v4558_v3 = vpop.f32.mrb[6].mxu0 }
  0xe4   :  { %v5413_v4 = vadd.f32 %v4558_v3, %v5391_v45  ;;  %v548_v5 = vpop.f32.mrb[7].mxu0  ;;  %4947 = vpow2.f32 %v916_v61  ;;  %v854_v8 = vmin.f32 %v5407_v0, 0.0  ;;  %vm790_vm7 = vcmp.gt.f32.partialorder %v5407_v0, 0.0 }
  0xe5   :  { %v852_v6 = vmin.f32 %v5410_v2, 0.0  ;;  %v5417_v7 = vadd.f32 %v548_v5, %v5391_v45  ;;  %vm788_vm5 = vcmp.gt.f32.partialorder %v5410_v2, 0.0 }
  0xe6   :  { %v855_v9 = vmin.f32 %v5413_v4, 0.0  ;;  %v924_v14 = vmul.f32 1.442695, %v854_v8  ;;  %vm791_vm8 = vcmp.gt.f32.partialorder %v5413_v4, 0.0 }
  0xe7   :  { %v853_v10 = vmin.f32 %v5417_v7, 0.0  ;;  %v920_v11 = vmul.f32 1.442695, %v852_v6  ;;  %vm789_vm6 = vcmp.gt.f32.partialorder %v5417_v7, 0.0 }
  0xe8   :  { %v926_v17 = vmul.f32 1.442695, %v855_v9 }
  0xe9   :  { %v922_v12 = vmul.f32 1.442695, %v853_v10  ;;  %v4561_v13 = vpop.f32.mrb[8].mxu0 }
  0xea   :  { %v561_v15 = vpop.f32.mrb[9].mxu0  ;;  %v5429_v28 = vadd.f32 %v4561_v13, %v5391_v45 }
  0xeb   :  { %v4942_v16 = vpop.eup %4941  ;;  %4949 = vpow2.f32 %v922_v12  ;;  %v4562_v18 = vpop.f32.mrb[10].mxu0  ;;  %v5426_v24 = vadd.f32 %v561_v15, %v5391_v45 }
  0xec   :  { %v4944_v19 = vpop.eup %4943  ;;  %v564_v20 = vpop.f32.mrb[11].mxu0  ;;  %v4082_v21 = vadd.f32 -1.0, %v4942_v16  ;;  %4951 = vpow2.f32 %v920_v11  ;;  %v5432_v31 = vadd.f32 %v4562_v18, %v5391_v45  ;;  %v858_v41 = vmin.f32 %v5429_v28, 0.0 }
  0xed   :  { %v4946_v22 = vpop.eup %4945  ;;  %v5423_v23 = vadd.f32 %v564_v20, %v5391_v45  ;;  %4953 = vpow2.f32 %v924_v14  ;;  %v4085_v27 = vadd.f32 -1.0, %v4944_v19  ;;  %v856_v37 = vmin.f32 %v5426_v24, 0.0  ;;  %v4880_v14 = vld [vmem:[%s8095_s1 + $0x90] sm:$0xff]  }
  0xee   :  { %v4083_v25 = vadd.f32 -1.0, %v4946_v22  ;;  %v4948_v26 = vpop.eup %4947  ;;  %4955 = vpow2.f32 %v926_v17  ;;  %v1104_v29 = vsel %vm784_vm1, %v530_v49, %v4082_v21  ;;  %v859_v48 = vmin.f32 %v5432_v31, 0.0 }
  0xef   :  { %v857_v32 = vmin.f32 %v5423_v23, 0.0  ;;  %v4084_v36 = vadd.f32 -1.0, %v4948_v26  ;;  %v1107_v44 = vsel %vm787_vm3, %v5401_v52, %v4085_v27  ;;  %v928_v51 = vmul.f32 1.442695, %v856_v37  ;;  %v4878_v52 = vld [vmem:[%s8095_s1 + $0x88] sm:$0xff]  }
  0xf0   :  { %v1105_v30 = vsel %vm785_vm2, %v533_v56, %v4083_v25  ;;  %v932_v61 = vmul.f32 1.442695, %v858_v41  ;;  %v934_v3 = vmul.f32 1.442695, %v859_v48  ;;  %vm794_vm11 = vcmp.gt.f32.partialorder %v5429_v28, 0.0 }
  0xf1   :  { %v4565_v33 = vpop.f32.mrb[12].mxu0  ;;  %v1168_v34 = vmax.f32 %v1104_v29, %v1105_v30  ;;  %v1392_v35 = vpack.c.bf16 %v1105_v30, %v1104_v29  ;;  %v930_v49 = vmul.f32 1.442695, %v857_v32  ;;  %v1106_v53 = vsel %vm786_vm4, %v5394_v47, %v4084_v36 }
  0xf2   :  { %v577_v38 = vpop.f32.mrb[13].mxu0  ;;  %v1175_v58 = vmax.f32 %v1106_v53, %v1107_v44  ;;  %v5452_v62 = vadd.f32 %v4565_v33, %v5391_v45  ;;  %v1393_v47 = vpack.c.bf16 %v1107_v44, %v1106_v53  ;;  %vm792_vm12 = vcmp.gt.f32.partialorder %v5426_v24, 0.0 }
  0xf3   :  { %v4566_v39 = vpop.f32.mrb[14].mxu0  ;;  %v1169_v40 = vrot.slane %v1168_v34, 4  ;;  %4631 = vmatprep.mubr.bf16.mxu1 %v1392_v35  ;;  %v5443_v55 = vadd.f32 %v577_v38, %v5391_v45  ;;  %4957 = vpow2.f32 %v930_v49  ;;  %vm793_vm13 = vcmp.gt.f32.partialorder %v5423_v23, 0.0 }
  0xf4   :  { %v580_v43 = vpop.f32.mrb[15].mxu0  ;;  %4959 = vpow2.f32 %v928_v51  ;;  %v1176_v10 = vrot.slane %v1175_v58, 4  ;;  %4632 = vmatmul.mubr.bf16.vlgmr.msra.gmra.mrb[0].mxu1 %v1393_v47  ;;  %v862_v15 = vmin.f32 %v5452_v62, 0.0  ;;  %v5467_v20 = vadd.f32 %v4566_v39, %v5391_v45 }
  0xf5   :  { %v4950_v46 = vpop.eup %4949  ;;  %v1170_v50 = vmax.f32 %v1168_v34, %v1169_v40  ;;  %v5446_v57 = vadd.f32 %v580_v43, %v5391_v45  ;;  %v860_v12 = vmin.f32 %v5443_v55, 0.0  ;;  %4464 = vmatpush3.bf16.msra.mxu1 %v4878_v52  ;;  %4961 = vpow2.f32 %v932_v61 }
  0xf6   :  { %v4952_v54 = vpop.eup %4951  ;;  %v4087_v60 = vadd.f32 -1.0, %v4950_v46  ;;  %v1177_v16 = vmax.f32 %v1175_v58, %v1176_v10  ;;  %4465 = vmatprep.subr.bf16.mxu1 %v4879_v63  ;;  %4963 = vpow2.f32 %v934_v3  ;;  %v863_v34 = vmin.f32 %v5467_v20, 0.0  ;;  %v4881_v3 = vld [vmem:[%s8095_s1 + $0xd8] sm:$0xff]  }
  0xf7   :  { %v1171_v56 = vrot.slane %v1170_v50, 2  ;;  %v4954_v59 = vpop.eup %4953  ;;  %v4086_v8 = vadd.f32 -1.0, %v4952_v54  ;;  %v861_v9 = vmin.f32 %v5446_v57, 0.0  ;;  %v936_v29 = vmul.f32 1.442695, %v860_v12 }
  0xf8   :  { %v4956_v1 = vpop.eup %4955  ;;  %v1109_v17 = vsel %vm789_vm6, %v5417_v7, %v4087_v60  ;;  %v4088_v19 = vadd.f32 -1.0, %v4954_v59  ;;  %v1178_v26 = vrot.slane %v1177_v16, 2  ;;  %v940_v7 = vmul.f32 1.442695, %v862_v15 }
  0xf9   :  { %v1172_v5 = vmax.f32 %v1170_v50, %v1171_v56  ;;  %v4569_v6 = vpop.f32.mrb[16].mxu0  ;;  %v4089_v22 = vadd.f32 -1.0, %v4956_v1  ;;  %v938_v25 = vmul.f32 1.442695, %v861_v9  ;;  %v1108_v27 = vsel %vm788_vm5, %v5410_v2, %v4086_v8  ;;  %4466 = vmatpush3.bf16.msra.mxu1 %v4880_v14 }
  0xfa   :  { %v593_v11 = vpop.f32.mrb[17].mxu0  ;;  %v1182_v30 = vmax.f32 %v1108_v27, %v1109_v17  ;;  %v1394_v32 = vpack.c.bf16 %v1109_v17, %v1108_v27  ;;  %v1179_v33 = vmax.f32 %v1177_v16, %v1178_v26  ;;  %v1110_v39 = vsel %vm790_vm7, %v5407_v0, %v4088_v19  ;;  %4467 = vmatprep.subr.bf16.mxu1 %v4881_v3 }
  0xfb   :  { %v4570_v13 = vpop.f32.mrb[18].mxu0  ;;  %v1173_v21 = vrot.slane %v1172_v5, 1  ;;  %v5476_v36 = vadd.f32 %v593_v11, %v5391_v45  ;;  %4965 = vpow2.f32 %v938_v25  ;;  %v1111_v40 = vsel %vm791_vm8, %v5413_v4, %v4089_v22 }
  0xfc   :  { %v596_v18 = vpop.f32.mrb[19].mxu0  ;;  %v1183_v37 = vrot.slane %v1182_v30, 4  ;;  %4635 = vmatprep.mubr.bf16.mxu1 %v1394_v32  ;;  %v1180_v2 = vrot.slane %v1179_v33, 1  ;;  %4967 = vpow2.f32 %v936_v29  ;;  %v5480_v46 = vmax.f32 %v1110_v39, %v1111_v40 }
  0xfd   :  { %v1174_v35 = vmax.f32 %v1172_v5, %v1173_v21  ;;  %v4958_v43 = vpop.eup %4957  ;;  %v5483_v51 = vadd.f32 %v596_v18, %v5391_v45  ;;  %v1395_v53 = vpack.c.bf16 %v1111_v40, %v1110_v39  ;;  %4969 = vpow2.f32 %v940_v7 }
  0xfe   :  { %v1184_v44 = vmax.f32 %v1182_v30, %v1183_v37  ;;  %v4960_v49 = vpop.eup %4959  ;;  %v1181_v50 = vmax.f32 %v1179_v33, %v1180_v2  ;;  %v942_v56 = vmul.f32 1.442695, %v863_v34  ;;  %v5486_v0 = vadd.f32 %v4569_v6, %v5391_v45  ;;  %v4882_v30 = vld [vmem:[%s8095_s1 + $0x98] sm:$0xff]  }
  0xff   :  { %v4962_v58 = vpop.eup %4961  ;;  %v4091_v52 = vadd.f32 -1.0, %v4958_v43  ;;  %v864_v60 = vmin.f32 %v5476_v36, 0.0  ;;  %v5491_v61 = vadd.f32 %v4570_v13, %v5391_v45  ;;  %4636 = vmatmul.mubr.bf16.gmra.mrb[4].mxu1 %v1395_v53  ;;  %v4090_v63 = vadd.f32 -1.0, %v4960_v49 }
 0x100   :  { %v1185_v4 = vrot.slane %v1184_v44, 2  ;;  %v3294_v59 = vsel %vm3293_vm9, %v1181_v50, %v1174_v35  ;;  %v4964_v47 = vpop.eup %4963  ;;  %v865_v5 = vmin.f32 %v5483_v51, 0.0  ;;  %v4092_v6 = vadd.f32 -1.0, %v4962_v58  ;;  %4468 = vmatpush3.bf16.msra.mxu1 %v4882_v30 }
 0x101   :  { %v4573_v38 = vpop.f32.mrb[20].mxu0  ;;  %4971 = vpow2.f32 %v942_v56  ;;  %v866_v11 = vmin.f32 %v5486_v0, 0.0  ;;  %v944_v12 = vmul.f32 1.442695, %v864_v60  ;;  %v867_v13 = vmin.f32 %v5491_v61, 0.0  ;;  %v4883_v60 = vld [vmem:[%s8095_s1 + $0xe0] sm:$0xff]  }
 0x102   :  { %v609_v41 = vpop.f32.mrb[21].mxu0  ;;  %v1186_v1 = vmax.f32 %v1184_v44, %v1185_v4  ;;  %v5501_v9 = vadd.f32 %v4573_v38, %v5391_v45  ;;  %v1113_v14 = vsel %vm793_vm13, %v5423_v23, %v4091_v52  ;;  %v4093_v16 = vadd.f32 -1.0, %v4964_v47  ;;  %v4884_v47 = vld [vmem:[%s8095_s1 + $0xa0] sm:$0xff]   ;;  %4469 = vmatprep.subr.bf16.mxu1 %v4883_v60 }
 0x103   :  { %v4574_v48 = vpop.f32.mrb[22].mxu0  ;;  %v5511_v18 = vadd.f32 %v609_v41, %v5391_v45  ;;  %v1112_v19 = vsel %vm792_vm12, %v5426_v24, %v4090_v63  ;;  %v946_v25 = vmul.f32 1.442695, %v865_v5  ;;  %v1190_v26 = vrot.slane %v5480_v46, 4 }
 0x104   :  { %v612_v54 = vpop.f32.mrb[23].mxu0  ;;  %v1187_v8 = vrot.slane %v1186_v1, 1  ;;  %v1196_v27 = vmax.f32 %v1112_v19, %v1113_v14  ;;  %v1396_v29 = vpack.c.bf16 %v1113_v14, %v1112_v19  ;;  %vm795_vm14 = vcmp.gt.f32.partialorder %v5432_v31, 0.0  ;;  %4470 = vmatpush3.bf16.msra.mxu1 %v4884_v47 }
 0x105   :  { %v4966_v22 = vpop.eup %4965  ;;  %v870_v24 = vmin.f32 %v5501_v9, 0.0  ;;  %v5530_v33 = vadd.f32 %v4574_v48, %v5391_v45  ;;  %v948_v34 = vmul.f32 1.442695, %v866_v11  ;;  %4973 = vpow2.f32 %v944_v12 }
 0x106   :  { %v1188_v17 = vmax.f32 %v1186_v1, %v1187_v8  ;;  %v4968_v32 = vpop.eup %4967  ;;  %v950_v35 = vmul.f32 1.442695, %v867_v13  ;;  %4639 = vmatprep.mubr.bf16.mxu1 %v1396_v29  ;;  %v5533_v37 = vadd.f32 %v612_v54, %v5391_v45  ;;  %v4095_v2 = vadd.f32 -1.0, %v4966_v22 }
 0x107   :  { %v4970_v38 = vpop.eup %4969  ;;  %v868_v39 = vmin.f32 %v5511_v18, 0.0  ;;  %v1114_v40 = vsel %vm794_vm11, %v5429_v28, %v4092_v6  ;;  %v1115_v41 = vsel %vm795_vm14, %v5432_v31, %v4093_v16  ;;  %v4094_v43 = vadd.f32 -1.0, %v4968_v32 }
 0x108   :  { %v5526_v7 = vsel %vm3295_vm10, %v1188_v17, %v3294_v59  ;;  %4975 = vpow2.f32 %v946_v25  ;;  %v1191_v44 = vmax.f32 %v5480_v46, %v1190_v26  ;;  %v1203_v48 = vmax.f32 %v1114_v40, %v1115_v41 }
 0x109   :  { %v5503_v10 = vpop.f32.mrb[24].mxu0  ;;  %v956_v49 = vmul.f32 1.442695, %v870_v24  ;;  %v871_v50 = vmin.f32 %v5530_v33, 0.0  ;;  %v1397_v53 = vpack.c.bf16 %v1115_v41, %v1114_v40  ;;  %vm796_vm15 = vcmp.gt.f32.partialorder %v5443_v55, 0.0 }
 0x10a   :  { %v5508_v15 = vpop.f32.mrb[25].mxu0  ;;  %vm797_vm0 = vcmp.gt.f32.partialorder %v5446_v57, 0.0  ;;  %v1197_v56 = vrot.slane %v1196_v27, 4  ;;  %v869_v28 = vmin.f32 %v5533_v37, 0.0  ;;  %v4096_v58 = vadd.f32 -1.0, %v4970_v38 }
 0x10b   :  { %v5516_v21 = vpop.f32.mrb[26].mxu0  ;;  %v4972_v31 = vpop.eup %4971  ;;  %4977 = vpow2.f32 %v948_v34  ;;  %v952_v46 = vmul.f32 1.442695, %v868_v39  ;;  %4640 = vmatmul.mubr.bf16.gmra.mrb[8].mxu1 %v1397_v53  ;;  %v1117_v52 = vsel %vm797_vm0, %v5446_v57, %v4095_v2  ;;  %v1192_v63 = vrot.slane %v1191_v44, 2 }
 0x10c   :  { %v5519_v23 = vpop.f32.mrb[27].mxu0  ;;  %4979 = vpow2.f32 %v950_v35  ;;  %v1204_v1 = vrot.slane %v1203_v48, 4  ;;  %v1116_v3 = vsel %vm796_vm15, %v5443_v55, %v4094_v43  ;;  %v958_v57 = vmul.f32 1.442695, %v871_v50 }
 0x10d   :  { %4981 = vpow2.f32 %v956_v49  ;;  %v5565_v6 = vadd.f32 %v5503_v10, %v5391_v45  ;;  %v5567_v8 = vmax.f32 %v1116_v3, %v1117_v52  ;;  %v4097_v11 = vadd.f32 -1.0, %v4972_v31 }
 0x10e   :  { %v1198_v12 = vmax.f32 %v1196_v27, %v1197_v56  ;;  %v954_v13 = vmul.f32 1.442695, %v869_v28  ;;  %v1398_v14 = vpack.c.bf16 %v1117_v52, %v1116_v3  ;;  %4983 = vpow2.f32 %v952_v46  ;;  %v4887_v3 = vld [vmem:[%s8095_s1 + $0xf0] sm:$0xff]  }
 0x10f   :  { %v4974_v16 = vpop.eup %4973  ;;  %v1193_v17 = vmax.f32 %v1191_v44, %v1192_v63  ;;  %v1205_v55 = vmax.f32 %v1203_v48, %v1204_v1  ;;  %v5571_v19 = vadd.f32 %v5508_v15, %v5391_v45  ;;  %vm798_vm1 = vcmp.gt.f32.partialorder %v5452_v62, 0.0  ;;  %v4885_v15 = vld [vmem:[%s8095_s1 + $0xe8] sm:$0xff]  }
 0x110   :  { %4643 = vmatprep.mubr.bf16.mxu1 %v1398_v14  ;;  %vm799_vm2 = vcmp.gt.f32.partialorder %v5467_v20, 0.0  ;;  %4985 = vpow2.f32 %v958_v57  ;;  %v874_v10 = vmin.f32 %v5565_v6, 0.0  ;;  %v1199_v26 = vrot.slane %v1198_v12, 2  ;;  %4471 = vmatprep.subr.bf16.mxu1 %v4885_v15  ;;  %v4886_v1 = vld [vmem:[%s8095_s1 + $0xa8] sm:$0xff]  }
 0x111   :  { %v5542_v54 = vpop.f32.mrb[28].mxu0  ;;  %4987 = vpow2.f32 %v954_v13  ;;  %v1118_v27 = vsel %vm798_vm1, %v5452_v62, %v4096_v58  ;;  %v1119_v29 = vsel %vm799_vm2, %v5467_v20, %v4097_v11  ;;  %v5587_v32 = vadd.f32 %v5516_v21, %v5391_v45  ;;  %4472 = vmatpush3.bf16.msra.mxu1 %v4886_v1 }
 0x112   :  { %v5547_v4 = vpop.f32.mrb[29].mxu0  ;;  %v4976_v25 = vpop.eup %4975  ;;  %v5591_v24 = vadd.f32 %v5519_v23, %v5391_v45  ;;  %v5593_v34 = vmax.f32 %v1118_v27, %v1119_v29  ;;  %v1399_v35 = vpack.c.bf16 %v1119_v29, %v1118_v27  ;;  %v1194_v20 = vrot.slane %v1193_v17, 1  ;;  %4473 = vmatprep.subr.bf16.mxu1 %v4887_v3 }
 0x113   :  { %v5550_v59 = vpop.f32.mrb[30].mxu0  ;;  %v1206_v38 = vrot.slane %v1205_v55, 2  ;;  %v872_v2 = vmin.f32 %v5571_v19, 0.0  ;;  %v4098_v41 = vadd.f32 -1.0, %v4974_v16  ;;  %v4099_v21 = vadd.f32 -1.0, %v4976_v25  ;;  %v4888_v25 = vld [vmem:[%s8095_s1 + $0xb0] sm:$0xff]  }
 0x114   :  { %v5561_v5 = vpop.f32.mrb[31].mxu0  ;;  %v964_v43 = vmul.f32 1.442695, %v874_v10  ;;  %4644 = vmatmul.mubr.bf16.gmra.mrb[12].mxu1 %v1399_v35  ;;  %vm802_vm3 = vcmp.gt.f32.partialorder %v5486_v0, 0.0  ;;  %vm800_vm4 = vcmp.gt.f32.partialorder %v5476_v36, 0.0  ;;  %vm803_vm5 = vcmp.gt.f32.partialorder %v5491_v61, 0.0 }
 0x115   :  { %v4978_v40 = vpop.eup %4977  ;;  %v1200_v23 = vmax.f32 %v1198_v12, %v1199_v26  ;;  %vm801_vm6 = vcmp.gt.f32.partialorder %v5483_v51, 0.0  ;;  %v875_v49 = vmin.f32 %v5587_v32, 0.0  ;;  %v1211_v50 = vrot.slane %v5567_v8, 4  ;;  %4474 = vmatpush3.bf16.msra.mxu1 %v4888_v25 }
 0x116   :  { %v4980_v44 = vpop.eup %4979  ;;  %v873_v53 = vmin.f32 %v5591_v24, 0.0  ;;  %v4100_v56 = vadd.f32 -1.0, %v4978_v40  ;;  %v5607_v28 = vmax.f32 %v1193_v17, %v1194_v20  ;;  %v1207_v31 = vmax.f32 %v1205_v55, %v1206_v38 }
 0x117   :  { %v4982_v48 = vpop.eup %4981  ;;  %v960_v58 = vmul.f32 1.442695, %v872_v2  ;;  %v4101_v52 = vadd.f32 -1.0, %v4980_v44  ;;  %4989 = vpow2.f32 %v964_v43  ;;  %v1120_v60 = vsel %vm800_vm4, %v5476_v36, %v4098_v41 }
 0x118   :  { %v4984_v46 = vpop.eup %4983  ;;  %v1121_v47 = vsel %vm801_vm6, %v5483_v51, %v4099_v21  ;;  %v5619_v57 = vadd.f32 -1.0, %v4982_v48  ;;  %v1201_v11 = vrot.slane %v1200_v23, 1  ;;  %vm805_vm7 = vcmp.gt.f32.partialorder %v5533_v37, 0.0 }
 0x119   :  { %v5576_v22 = vpop.f32.mrb[32].mxu0  ;;  %v1224_v12 = vmax.f32 %v1120_v60, %v1121_v47  ;;  %v1400_v13 = vpack.c.bf16 %v1121_v47, %v1120_v60  ;;  %vm804_vm8 = vcmp.gt.f32.partialorder %v5511_v18, 0.0  ;;  %v966_v14 = vmul.f32 1.442695, %v875_v49 }
 0x11a   :  { %v5580_v30 = vpop.f32.mrb[33].mxu0  ;;  %v4986_v51 = vpop.eup %4985  ;;  %v1212_v16 = vmax.f32 %v5567_v8, %v1211_v50  ;;  %v962_v17 = vmul.f32 1.442695, %v873_v53  ;;  %v5628_v55 = vadd.f32 %v5547_v4, %v5391_v45  ;;  %v4102_v27 = vadd.f32 -1.0, %v4984_v46  ;;  %v4889_v4 = vld [vmem:[%s8095_s1 + $0xf8] sm:$0xff]   ;;  %v4891_v50 = vld [vmem:[%s8095_s1 + $0x100] sm:$0xff]  }
 0x11b   :  { %v5595_v62 = vpop.f32.mrb[34].mxu0  ;;  %v4988_v26 = vpop.eup %4987  ;;  %v1208_v29 = vrot.slane %v1207_v31, 1  ;;  %4991 = vpow2.f32 %v960_v58  ;;  %v1225_v15 = vrot.slane %v1224_v12, 4  ;;  %4647 = vmatprep.mubr.bf16.mxu1 %v1400_v13  ;;  %v5642_v8 = vadd.f32 %v5542_v54, %v5391_v45  ;;  %4475 = vmatprep.subr.bf16.mxu1 %v4889_v4 }
 0x11c   :  { %v5598_v39 = vpop.f32.mrb[35].mxu0  ;;  %v5646_v20 = vadd.f32 %v5561_v5, %v5391_v45  ;;  %v1122_v38 = vsel %vm802_vm3, %v5486_v0, %v4100_v56  ;;  %v1123_v2 = vsel %vm803_vm5, %v5491_v61, %v4101_v52  ;;  %v5656_v40 = vadd.f32 %v5550_v59, %v5391_v45  ;;  %v4890_v61 = vld [vmem:[%s8095_s1 + $0xb8] sm:$0xff]  }
 0x11d   :  { %v1226_v41 = vmax.f32 %v1224_v12, %v1225_v15  ;;  %v1231_v21 = vmax.f32 %v1122_v38, %v1123_v2  ;;  %v1401_v54 = vpack.c.bf16 %v1123_v2, %v1122_v38  ;;  %vm806_vm11 = vcmp.gt.f32.partialorder %v5501_v9, 0.0  ;;  %4476 = vmatpush3.bf16.msra.mxu1 %v4890_v61 }
 0x11e   :  { %vm807_vm12 = vcmp.gt.f32.partialorder %v5530_v33, 0.0  ;;  %v4103_v5 = vadd.f32 -1.0, %v4988_v26  ;;  %v1213_v43 = vrot.slane %v1212_v16, 2  ;;  %4993 = vpow2.f32 %v962_v17  ;;  %4477 = vmatprep.subr.bf16.mxu1 %v4891_v50 }
 0x11f   :  { %v876_v0 = vmin.f32 %v5628_v55, 0.0  ;;  %v4105_v44 = vadd.f32 -1.0, %v4986_v51  ;;  %v5664_v59 = vmax.f32 %v1200_v23, %v1201_v11  ;;  %v1227_v48 = vrot.slane %v1226_v41, 2  ;;  %4648 = vmatmul.mubr.bf16.gmra.mrb[16].mxu1 %v1401_v54 }
 0x120   :  { %v1232_v49 = vrot.slane %v1231_v21, 4  ;;  %v5669_v53 = vmax.f32 %v1207_v31, %v1208_v29  ;;  %4995 = vpow2.f32 %v966_v14  ;;  %v878_v56 = vmin.f32 %v5642_v8, 0.0 }
 0x121   :  { %v5611_v63 = vpop.f32.mrb[36].mxu0  ;;  %v877_v58 = vmin.f32 %v5646_v20, 0.0  ;;  %v879_v23 = vmin.f32 %v5656_v40, 0.0  ;;  %v1228_v52 = vmax.f32 %v1226_v41, %v1227_v48  ;;  %v5678_v47 = vadd.f32 %v5576_v22, %v5391_v45  ;;  %v4990_v3 = vpop.eup %4989  ;;  %v4892_v22 = vld [vmem:[%s8095_s1 + $0xc0] sm:$0xff]  }
 0x122   :  { %v5622_v36 = vpop.f32.mrb[37].mxu0  ;;  %v1233_v60 = vmax.f32 %v1231_v21, %v1232_v49  ;;  %v5682_v31 = vmax.f32 %v1212_v16, %v1213_v43  ;;  %v968_v11 = vmul.f32 1.442695, %v876_v0  ;;  %v5686_v12 = vadd.f32 %v5580_v30, %v5391_v45  ;;  %4478 = vmatpush3.bf16.msra.mxu1 %v4892_v22 }
 0x123   :  { %v5630_v10 = vpop.f32.mrb[38].mxu0  ;;  %v1125_v13 = vsel %vm805_vm7, %v5533_v37, %v4103_v5  ;;  %v1218_v14 = vrot.slane %v5593_v34, 4  ;;  %v1229_v16 = vrot.slane %v1228_v52, 1  ;;  %v1124_v30 = vsel %vm804_vm8, %v5511_v18, %v4102_v27  ;;  %v4893_v37 = vld [vmem:[%s8095_s1 + $0x108] sm:$0xff]  }
 0x124   :  { %v5635_v35 = vpop.f32.mrb[39].mxu0  ;;  %v1234_v17 = vrot.slane %v1233_v60, 2  ;;  %v972_v26 = vmul.f32 1.442695, %v878_v56  ;;  %v970_v29 = vmul.f32 1.442695, %v877_v58  ;;  %v1238_v15 = vmax.f32 %v1124_v30, %v1125_v13  ;;  %4775 = vmatprep.subr.bf16.mxu1 %v4893_v37 }
 0x125   :  { %v1402_v4 = vpack.c.bf16 %v1125_v13, %v1124_v30  ;;  %v4992_v38 = vpop.eup %4991  ;;  %v974_v2 = vmul.f32 1.442695, %v879_v23  ;;  %v882_v21 = vmin.f32 %v5678_v47, 0.0  ;;  %v5708_v54 = vadd.f32 %v5598_v39, %v5391_v45 }
 0x126   :  { %v1235_v41 = vmax.f32 %v1233_v60, %v1234_v17  ;;  %vm808_vm13 = vcmp.gt.f32.partialorder %v5571_v19, 0.0  ;;  %vm809_vm14 = vcmp.gt.f32.partialorder %v5591_v24, 0.0  ;;  %4997 = vpow2.f32 %v968_v11 }
 0x127   :  { %v880_v18 = vmin.f32 %v5686_v12, 0.0  ;;  %v5715_v27 = vadd.f32 %v5595_v62, %v5391_v45  ;;  %v1239_v5 = vrot.slane %v1238_v15, 4  ;;  %4651 = vmatprep.mubr.bf16.mxu1 %v1402_v4  ;;  %v1230_v43 = vmax.f32 %v1228_v52, %v1229_v16 }
 0x128   :  { %v1236_v0 = vrot.slane %v1235_v41, 1  ;;  %v1126_v39 = vsel %vm806_vm11, %v5501_v9, %v5619_v57  ;;  %v1127_v61 = vsel %vm807_vm12, %v5530_v33, %v4105_v44  ;;  %v4994_v48 = vpop.eup %4993  ;;  %4999 = vpow2.f32 %v970_v29 }
 0x129   :  { %v5673_v46 = vpop.f32.mrb[40].mxu0  ;;  %v1240_v49 = vmax.f32 %v1238_v15, %v1239_v5  ;;  %v1245_v62 = vmax.f32 %v1126_v39, %v1127_v61  ;;  %v1403_v50 = vpack.c.bf16 %v1127_v61, %v1126_v39  ;;  %vm810_vm15 = vcmp.gt.f32.partialorder %v5565_v6, 0.0 }
 0x12a   :  { %v5680_v1 = vpop.f32.mrb[41].mxu0  ;;  %vm811_vm0 = vcmp.gt.f32.partialorder %v5587_v32, 0.0  ;;  %v1219_v58 = vmax.f32 %v5593_v34, %v1218_v14  ;;  %v1237_v23 = vmax.f32 %v1235_v41, %v1236_v0  ;;  %v980_v9 = vmul.f32 1.442695, %v882_v21  ;;  %v4996_v33 = vpop.eup %4995 }
 0x12b   :  { %v5691_v51 = vpop.f32.mrb[42].mxu0  ;;  %v881_v57 = vmin.f32 %v5708_v54, 0.0  ;;  %v976_v44 = vmul.f32 1.442695, %v880_v18  ;;  %v883_v60 = vmin.f32 %v5715_v27, 0.0  ;;  %v1241_v11 = vrot.slane %v1240_v49, 2  ;;  %4652 = vmatmul.mubr.bf16.gmra.mrb[20].mxu1 %v1403_v50 }
 0x12c   :  { %v5700_v25 = vpop.f32.mrb[43].mxu0  ;;  %v5735_v13 = vadd.f32 %v5611_v63, %v5391_v45  ;;  %v4106_v16 = vadd.f32 -1.0, %v4992_v38  ;;  %v4107_v34 = vadd.f32 -1.0, %v4994_v48  ;;  %5001 = vpow2.f32 %v972_v26 }
 0x12d   :  { %v3307_v14 = vsel %vm3293_vm9, %v1237_v23, %v1230_v43  ;;  %v4108_v30 = vadd.f32 -1.0, %v4990_v3  ;;  %5003 = vpow2.f32 %v974_v2  ;;  %v1242_v37 = vmax.f32 %v1240_v49, %v1241_v11 }
 0x12e   :  { %v5744_v29 = vadd.f32 %v5622_v36, %v5391_v45  ;;  %v4109_v15 = vadd.f32 -1.0, %v4996_v33  ;;  %v1220_v4 = vrot.slane %v1219_v58, 2  ;;  %5005 = vpow2.f32 %v980_v9 }
 0x12f   :  { %v978_v63 = vmul.f32 1.442695, %v881_v57  ;;  %5007 = vpow2.f32 %v976_v44  ;;  %v982_v41 = vmul.f32 1.442695, %v883_v60  ;;  %v1243_v38 = vrot.slane %v1242_v37, 1 }
 0x130   :  { %v886_v26 = vmin.f32 %v5735_v13, 0.0  ;;  %v1246_v21 = vrot.slane %v1245_v62, 4  ;;  %v5749_v18 = vadd.f32 %v5630_v10, %v5391_v45  ;;  %v1128_v3 = vsel %vm808_vm13, %v5571_v19, %v4106_v16  ;;  %v4998_v2 = vpop.eup %4997 }
 0x131   :  { %v5724_v56 = vpop.f32.mrb[44].mxu0  ;;  %v1129_v36 = vsel %vm809_vm14, %v5591_v24, %v4107_v34  ;;  %vm812_vm1 = vcmp.gt.f32.partialorder %v5628_v55, 0.0  ;;  %v1244_v5 = vmax.f32 %v1242_v37, %v1243_v38  ;;  %v884_v43 = vmin.f32 %v5744_v29, 0.0 }
 0x132   :  { %v5730_v52 = vpop.f32.mrb[45].mxu0  ;;  %v1252_v0 = vmax.f32 %v1128_v3, %v1129_v36  ;;  %v5761_v39 = vadd.f32 %v5635_v35, %v5391_v45  ;;  %v1215_v61 = vrot.slane %v5682_v31, 1  ;;  %v5766_v19 = vmax.f32 %v1219_v58, %v1220_v4  ;;  %v5000_v49 = vpop.eup %4999 }
 0x133   :  { %v5737_v22 = vpop.f32.mrb[46].mxu0  ;;  %5009 = vpow2.f32 %v978_v63  ;;  %v1404_v48 = vpack.c.bf16 %v1129_v36, %v1128_v3  ;;  %v5771_v50 = vsel %vm3295_vm10, %v1244_v5, %v3307_v14  ;;  %v988_v23 = vmul.f32 1.442695, %v886_v26 }
 0x134   :  { %v5740_v17 = vpop.f32.mrb[47].mxu0  ;;  %8168 = vst [vmem:[#allocation3_spill] sm:$0xff] %v5771_v50  ;;  %v1130_v35 = vsel %vm810_vm15, %v5565_v6, %v4108_v30  ;;  %v1131_v9 = vsel %vm811_vm0, %v5587_v32, %v4109_v15  ;;  %v1247_v58 = vmax.f32 %v1245_v62, %v1246_v21  ;;  %v887_v33 = vmin.f32 %v5749_v18, 0.0 }
 0x135   :  { %4655 = vmatprep.mubr.bf16.mxu1 %v1404_v48  ;;  %v1259_v44 = vmax.f32 %v1130_v35, %v1131_v9  ;;  %v1405_v60 = vpack.c.bf16 %v1131_v9, %v1130_v35  ;;  %vm814_vm2 = vcmp.gt.f32.partialorder %v5642_v8, 0.0  ;;  %5011 = vpow2.f32 %v982_v41 }
 0x136   :  { %v984_v16 = vmul.f32 1.442695, %v884_v43  ;;  %v885_v6 = vmin.f32 %v5761_v39, 0.0  ;;  %v5788_v34 = vadd.f32 %v5673_v46, %v5391_v45  ;;  %v5002_v32 = vpop.eup %5001  ;;  %v4110_v14 = vadd.f32 -1.0, %v4998_v2 }
 0x137   :  { %vm815_vm3 = vcmp.gt.f32.partialorder %v5656_v40, 0.0  ;;  %v4111_v62 = vadd.f32 -1.0, %v5000_v49  ;;  %v1253_v30 = vrot.slane %v1252_v0, 4  ;;  %4656 = vmatmul.mubr.bf16.gmra.mrb[24].mxu1 %v1405_v60  ;;  %v5004_v37 = vpop.eup %5003  ;;  %v5792_v15 = vmax.f32 %v5682_v31, %v1215_v61 }
 0x138   :  { %vm813_vm4 = vcmp.gt.f32.partialorder %v5646_v20, 0.0  ;;  %v1260_v4 = vrot.slane %v1259_v44, 4  ;;  %v5797_v63 = vadd.f32 %v5680_v1, %v5391_v45  ;;  %v5006_v46 = vpop.eup %5005  ;;  %v1248_v38 = vrot.slane %v1247_v58, 2 }
 0x139   :  { %v5763_v10 = vpop.f32.mrb[48].mxu0  ;;  %5013 = vpow2.f32 %v988_v23  ;;  %v990_v26 = vmul.f32 1.442695, %v887_v33  ;;  %v5008_v21 = vpop.eup %5007  ;;  %v4112_v3 = vadd.f32 -1.0, %v5002_v32  ;;  %v986_v36 = vmul.f32 1.442695, %v885_v6 }
 0x13a   :  { %v5768_v24 = vpop.f32.mrb[49].mxu0  ;;  %5015 = vpow2.f32 %v984_v16  ;;  %v890_v31 = vmin.f32 %v5788_v34, 0.0  ;;  %v4113_v5 = vadd.f32 -1.0, %v5004_v37  ;;  %v1254_v43 = vmax.f32 %v1252_v0, %v1253_v30 }
 0x13b   :  { %v5779_v57 = vpop.f32.mrb[50].mxu0  ;;  %v1132_v1 = vsel %vm812_vm1, %v5628_v55, %v4110_v14  ;;  %v1133_v61 = vsel %vm813_vm4, %v5646_v20, %v4111_v62  ;;  %v1261_v49 = vmax.f32 %v1259_v44, %v1260_v4  ;;  %v888_v23 = vmin.f32 %v5797_v63, 0.0 }
 0x13c   :  { %v5782_v11 = vpop.f32.mrb[51].mxu0  ;;  %v1266_v35 = vmax.f32 %v1132_v1, %v1133_v61  ;;  %v1406_v9 = vpack.c.bf16 %v1133_v61, %v1132_v1  ;;  %vm816_vm5 = vcmp.gt.f32.partialorder %v5686_v12, 0.0  ;;  %v1249_v0 = vmax.f32 %v1247_v58, %v1248_v38 }
 0x13d   :  { %v5010_v60 = vpop.eup %5009  ;;  %5017 = vpow2.f32 %v990_v26  ;;  %v5817_v55 = vadd.f32 %v5700_v25, %v5391_v45  ;;  %v996_v20 = vmul.f32 1.442695, %v890_v31  ;;  %v5823_v44 = vadd.f32 %v5691_v51, %v5391_v45 }
 0x13e   :  { %5019 = vpow2.f32 %v986_v36  ;;  %v1267_v6 = vrot.slane %v1266_v35, 4  ;;  %4659 = vmatprep.mubr.bf16.mxu1 %v1406_v9  ;;  %v1255_v32 = vrot.slane %v1254_v43, 2  ;;  %v1134_v58 = vsel %vm814_vm2, %v5642_v8, %v4112_v3 }
 0x13f   :  { %v889_v14 = vmin.f32 %v5817_v55, 0.0  ;;  %v1135_v25 = vsel %vm815_vm3, %v5656_v40, %v4113_v5  ;;  %v5012_v62 = vpop.eup %5011  ;;  %v1262_v30 = vrot.slane %v1261_v49, 2  ;;  %v992_v37 = vmul.f32 1.442695, %v888_v23 }
 0x140   :  { %v1273_v4 = vmax.f32 %v1134_v58, %v1135_v25  ;;  %v1407_v38 = vpack.c.bf16 %v1135_v25, %v1134_v58  ;;  %vm818_vm6 = vcmp.gt.f32.partialorder %v5678_v47, 0.0  ;;  %v4114_v51 = vadd.f32 -1.0, %v5008_v21 }
 0x141   :  { %v5801_v2 = vpop.f32.mrb[52].mxu0  ;;  %vm819_vm7 = vcmp.gt.f32.partialorder %v5715_v27, 0.0  ;;  %v4115_v26 = vadd.f32 -1.0, %v5010_v60  ;;  %v1268_v36 = vmax.f32 %v1266_v35, %v1267_v6  ;;  %v4116_v31 = vadd.f32 -1.0, %v5006_v46 }
 0x142   :  { %v5809_v48 = vpop.f32.mrb[53].mxu0  ;;  %vm817_vm8 = vcmp.gt.f32.partialorder %v5708_v54, 0.0  ;;  %v1250_v8 = vrot.slane %v1249_v0, 1  ;;  %5021 = vpow2.f32 %v996_v20  ;;  %4660 = vmatmul.mubr.bf16.gmra.mrb[28].mxu1 %v1407_v38  ;;  %v4117_v5 = vadd.f32 -1.0, %v5012_v62 }
 0x143   :  { %v5812_v33 = vpop.f32.mrb[54].mxu0  ;;  %v5014_v40 = vpop.eup %5013  ;;  %v1256_v1 = vmax.f32 %v1254_v43, %v1255_v32  ;;  %v891_v61 = vmin.f32 %v5823_v44, 0.0  ;;  %v994_v23 = vmul.f32 1.442695, %v889_v14  ;;  %v1263_v58 = vmax.f32 %v1261_v49, %v1262_v30 }
 0x144   :  { %v5819_v16 = vpop.f32.mrb[55].mxu0  ;;  %v5016_v21 = vpop.eup %5015  ;;  %5023 = vpow2.f32 %v992_v37  ;;  %v5842_v46 = vadd.f32 %v5724_v56, %v5391_v45  ;;  %v5846_v35 = vadd.f32 %v5730_v52, %v5391_v45  ;;  %v1269_v20 = vrot.slane %v1268_v36, 2 }
 0x145   :  { %v1274_v43 = vrot.slane %v1273_v4, 4  ;;  %v1136_v6 = vsel %vm816_vm5, %v5686_v12, %v4114_v51  ;;  %v1137_v49 = vsel %vm817_vm8, %v5708_v54, %v4115_v26  ;;  %v5858_v56 = vmax.f32 %v1249_v0, %v1250_v8 }
 0x146   :  { %v5860_v14 = vadd.f32 -1.0, %v5014_v40  ;;  %v5864_v52 = vadd.f32 %v5737_v22, %v5391_v45  ;;  %v1280_v25 = vmax.f32 %v1136_v6, %v1137_v49  ;;  %vm820_vm11 = vcmp.gt.f32.partialorder %v5744_v29, 0.0 }
 0x147   :  { %8169 = vst [vmem:[#allocation4_spill] sm:$0xff] %v5858_v56  ;;  %v5018_v62 = vpop.eup %5017  ;;  %v4118_v30 = vadd.f32 -1.0, %v5016_v21  ;;  %vm821_vm12 = vcmp.gt.f32.partialorder %v5761_v39, 0.0  ;;  %5025 = vpow2.f32 %v994_v23  ;;  %v1408_v12 = vpack.c.bf16 %v1137_v49, %v1136_v6 }
 0x148   :  { %v5870_v54 = vadd.f32 %v5740_v17, %v5391_v45  ;;  %v5020_v0 = vpop.eup %5019  ;;  %v1257_v37 = vrot.slane %v1256_v1, 1  ;;  %v1264_v38 = vrot.slane %v1263_v58, 1  ;;  %v998_v51 = vmul.f32 1.442695, %v891_v61 }
 0x149   :  { %v5835_v3 = vpop.f32.mrb[56].mxu0  ;;  %v894_v22 = vmin.f32 %v5842_v46, 0.0  ;;  %v5873_v26 = vmax.f32 %v1268_v36, %v1269_v20  ;;  %v5875_v8 = vmax.f32 %v1273_v4, %v1274_v43  ;;  %v892_v40 = vmin.f32 %v5846_v35, 0.0  ;;  %4663 = vmatprep.mubr.bf16.mxu1 %v1408_v12 }
 0x14a   :  { %v5838_v9 = vpop.f32.mrb[57].mxu0  ;;  %v1281_v21 = vrot.slane %v1280_v25, 4  ;;  %v895_v23 = vmin.f32 %v5864_v52, 0.0  ;;  %v893_v6 = vmin.f32 %v5870_v54, 0.0  ;;  %v1138_v17 = vsel %vm818_vm6, %v5678_v47, %v4116_v31 }
 0x14b   :  { %v5848_v60 = vpop.f32.mrb[58].mxu0  ;;  %v1139_v61 = vsel %vm819_vm7, %v5715_v27, %v4117_v5  ;;  %v4121_v4 = vadd.f32 -1.0, %v5018_v62  ;;  %vm822_vm13 = vcmp.gt.f32.partialorder %v5735_v13, 0.0  ;;  %vm823_vm14 = vcmp.gt.f32.partialorder %v5749_v18, 0.0 }
 0x14c   :  { %v5856_v32 = vpop.f32.mrb[59].mxu0  ;;  %v1282_v20 = vmax.f32 %v1280_v25, %v1281_v21  ;;  %v1287_v43 = vmax.f32 %v1138_v17, %v1139_v61  ;;  %v1409_v49 = vpack.c.bf16 %v1139_v61, %v1138_v17  ;;  %v5022_v12 = vpop.eup %5021  ;;  %v5892_v42 = vmax.f32 %v1256_v1, %v1257_v37 }
 0x14d   :  { %v4119_v47 = vadd.f32 -1.0, %v5020_v0  ;;  %5027 = vpow2.f32 %v998_v51  ;;  %v1004_v31 = vmul.f32 1.442695, %v894_v22  ;;  %v5896_v27 = vmax.f32 %v1263_v58, %v1264_v38 }
 0x14e   :  { %v1000_v5 = vmul.f32 1.442695, %v892_v40  ;;  %v1283_v25 = vrot.slane %v1282_v20, 2  ;;  %v1288_v62 = vrot.slane %v1287_v43, 4  ;;  %4664 = vmatmul.mubr.bf16.gmra.mrb[32].mxu1 %v1409_v49  ;;  %v5024_v17 = vpop.eup %5023  ;;  %v1271_v61 = vrot.slane %v5873_v26, 1 }
 0x14f   :  { %v1276_v50 = vrot.slane %v5875_v8, 2  ;;  %v1006_v1 = vmul.f32 1.442695, %v895_v23  ;;  %v1002_v37 = vmul.f32 1.442695, %v893_v6  ;;  %v5902_v0 = vadd.f32 -1.0, %v5022_v12 }
 0x150   :  { %v1284_v51 = vmax.f32 %v1282_v20, %v1283_v25  ;;  %v1289_v22 = vmax.f32 %v1287_v43, %v1288_v62  ;;  %v5906_v58 = vadd.f32 %v5763_v10, %v5391_v45  ;;  %v5910_v38 = vadd.f32 %v5768_v24, %v5391_v45 }
 0x151   :  { %v5886_v36 = vpop.f32.mrb[60].mxu0  ;;  %v5914_v40 = vadd.f32 %v5779_v57, %v5391_v45  ;;  %v1140_v23 = vsel %vm820_vm11, %v5744_v29, %v4118_v30  ;;  %v1141_v6 = vsel %vm821_vm12, %v5761_v39, %v4119_v47  ;;  %v5026_v20 = vpop.eup %5025  ;;  %5029 = vpow2.f32 %v1004_v31 }
 0x152   :  { %v5888_v41 = vpop.f32.mrb[61].mxu0  ;;  %v1285_v10 = vrot.slane %v1284_v51, 1  ;;  %v1290_v43 = vrot.slane %v1289_v22, 2  ;;  %v1294_v49 = vmax.f32 %v1140_v23, %v1141_v6  ;;  %v4122_v12 = vadd.f32 -1.0, %v5024_v17 }
 0x153   :  { %v5894_v56 = vpop.f32.mrb[62].mxu0  ;;  %vm825_vm15 = vcmp.gt.f32.partialorder %v5817_v55, 0.0  ;;  %5031 = vpow2.f32 %v1002_v37  ;;  %v1410_v24 = vpack.c.bf16 %v1141_v6, %v1140_v23  ;;  %v5925_v57 = vadd.f32 %v5782_v11, %v5391_v45 }
 0x154   :  { %v5898_v21 = vpop.f32.mrb[63].mxu0  ;;  %vm824_vm0 = vcmp.gt.f32.partialorder %v5797_v63, 0.0  ;;  %5033 = vpow2.f32 %v1000_v5  ;;  %v1291_v29 = vmax.f32 %v1289_v22, %v1290_v43  ;;  %v898_v39 = vmin.f32 %v5906_v58, 0.0 }
 0x155   :  { %v1295_v30 = vrot.slane %v1294_v49, 4  ;;  %v4123_v47 = vadd.f32 -1.0, %v5026_v20  ;;  %v1286_v31 = vmax.f32 %v1284_v51, %v1285_v10  ;;  %v896_v25 = vmin.f32 %v5910_v38, 0.0  ;;  %4667 = vmatprep.mubr.bf16.mxu1 %v1410_v24 }
 0x156   :  { %v899_v62 = vmin.f32 %v5914_v40, 0.0  ;;  %v1292_v17 = vrot.slane %v1291_v29, 1  ;;  %v1142_v11 = vsel %vm822_vm13, %v5735_v13, %v5860_v14  ;;  %v1143_v5 = vsel %vm823_vm14, %v5749_v18, %v4121_v4 }
 0x157   :  { %v1296_v37 = vmax.f32 %v1294_v49, %v1295_v30  ;;  %v5028_v22 = vpop.eup %5027  ;;  %v897_v23 = vmin.f32 %v5925_v57, 0.0  ;;  %v1301_v51 = vmax.f32 %v1142_v11, %v1143_v5  ;;  %v1411_v6 = vpack.c.bf16 %v1143_v5, %v1142_v11 }
 0x158   :  { %v5941_v20 = vadd.f32 %v5801_v2, %v5391_v45  ;;  %vm826_vm1 = vcmp.gt.f32.partialorder %v5788_v34, 0.0  ;;  %v1293_v10 = vmax.f32 %v1291_v29, %v1292_v17  ;;  %v1012_v43 = vmul.f32 1.442695, %v898_v39 }
 0x159   :  { %v1297_v49 = vrot.slane %v1296_v37, 2  ;;  %v5946_v13 = vadd.f32 %v5809_v48, %v5391_v45  ;;  %vm827_vm2 = vcmp.gt.f32.partialorder %v5823_v44, 0.0  ;;  %v5950_v18 = vmax.f32 %v5873_v26, %v1271_v61  ;;  %4668 = vmatmul.mubr.bf16.gmra.mrb[36].mxu1 %v1411_v6 }
 0x15a   :  { %v1008_v14 = vmul.f32 1.442695, %v896_v25  ;;  %v1302_v4 = vrot.slane %v1301_v51, 4  ;;  %v5954_v2 = vadd.f32 %v5812_v33, %v5391_v45  ;;  %v5957_v24 = vmax.f32 %v5875_v8, %v1276_v50 }
 0x15b   :  { %v3314_v29 = vsel %vm3293_vm9, %v1293_v10, %v1286_v31  ;;  %v1014_v39 = vmul.f32 1.442695, %v899_v62  ;;  %v1298_v48 = vmax.f32 %v1296_v37, %v1297_v49  ;;  %v4125_v30 = vadd.f32 -1.0, %v5028_v22  ;;  %v5030_v61 = vpop.eup %5029 }
 0x15c   :  { %5035 = vpow2.f32 %v1006_v1  ;;  %v1010_v17 = vmul.f32 1.442695, %v897_v23  ;;  %v902_v26 = vmin.f32 %v5941_v20, 0.0  ;;  %v900_v11 = vmin.f32 %v5946_v13, 0.0 }
 0x15d   :  { %5037 = vpow2.f32 %v1012_v43  ;;  %v1299_v25 = vrot.slane %v1298_v48, 1  ;;  %v1145_v33 = vsel %vm825_vm15, %v5817_v55, %v4123_v47  ;;  %v5032_v50 = vpop.eup %5031  ;;  %v1303_v8 = vmax.f32 %v1301_v51, %v1302_v4 }
 0x15e   :  { %5039 = vpow2.f32 %v1008_v14  ;;  %v903_v31 = vmin.f32 %v5954_v2, 0.0  ;;  %v1144_v1 = vsel %vm824_vm0, %v5797_v63, %v4122_v12  ;;  %v5034_v62 = vpop.eup %5033  ;;  %vm829_vm3 = vcmp.gt.f32.partialorder %v5870_v54, 0.0 }
 0x15f   :  { %5041 = vpow2.f32 %v1014_v39  ;;  %v1300_v37 = vmax.f32 %v1298_v48, %v1299_v25  ;;  %v1308_v5 = vmax.f32 %v1144_v1, %v1145_v33  ;;  %vm828_vm4 = vcmp.gt.f32.partialorder %v5846_v35, 0.0 }
 0x160   :  { %5043 = vpow2.f32 %v1010_v17  ;;  %v1020_v22 = vmul.f32 1.442695, %v902_v26  ;;  %v1412_v55 = vpack.c.bf16 %v1145_v33, %v1144_v1  ;;  %v5973_v47 = vadd.f32 %v5819_v16, %v5391_v45 }
 0x161   :  { %v4127_v23 = vadd.f32 -1.0, %v5032_v50  ;;  %v5976_v51 = vsel %vm3295_vm10, %v1300_v37, %v3314_v29  ;;  %v1016_v63 = vmul.f32 1.442695, %v900_v11  ;;  %v1309_v12 = vrot.slane %v1308_v5, 4 }
 0x162   :  { %v1304_v6 = vrot.slane %v1303_v8, 2  ;;  %v1022_v10 = vmul.f32 1.442695, %v903_v31  ;;  %4671 = vmatprep.mubr.bf16.mxu1 %v1412_v55  ;;  %v901_v43 = vmin.f32 %v5973_v47, 0.0  ;;  %v1146_v49 = vsel %vm826_vm1, %v5788_v34, %v5902_v0 }
 0x163   :  { %v1310_v14 = vmax.f32 %v1308_v5, %v1309_v12  ;;  %v1147_v16 = vsel %vm827_vm2, %v5823_v44, %v4125_v30  ;;  %v5988_v4 = vadd.f32 %v5835_v3, %v5391_v45  ;;  %v5992_v29 = vadd.f32 %v5838_v9, %v5391_v45 }
 0x164   :  { %vm830_vm5 = vcmp.gt.f32.partialorder %v5842_v46, 0.0  ;;  %vm831_vm6 = vcmp.gt.f32.partialorder %v5864_v52, 0.0  ;;  %5045 = vpow2.f32 %v1020_v22  ;;  %v1018_v39 = vmul.f32 1.442695, %v901_v43 }
 0x165   :  { %v1315_v34 = vmax.f32 %v1146_v49, %v1147_v16  ;;  %v1413_v0 = vpack.c.bf16 %v1147_v16, %v1146_v49  ;;  %v1278_v48 = vrot.slane %v5957_v24, 1  ;;  %v4126_v17 = vadd.f32 -1.0, %v5034_v62 }
 0x166   :  { %5047 = vpow2.f32 %v1016_v63  ;;  %v906_v44 = vmin.f32 %v5988_v4, 0.0  ;;  %v5036_v3 = vpop.eup %5035  ;;  %v4128_v30 = vadd.f32 -1.0, %v5030_v61  ;;  %v1305_v26 = vmax.f32 %v1303_v8, %v1304_v6 }
 0x167   :  { %v1316_v25 = vrot.slane %v1315_v34, 4  ;;  %4672 = vmatmul.mubr.bf16.gmra.mrb[40].mxu1 %v1413_v0  ;;  %v904_v9 = vmin.f32 %v5992_v29, 0.0  ;;  %v5038_v11 = vpop.eup %5037  ;;  %5049 = vpow2.f32 %v1022_v10  ;;  %v1311_v33 = vrot.slane %v1310_v14, 2 }
 0x168   :  { %v1028_v50 = vmul.f32 1.442695, %v906_v44  ;;  %v6001_v31 = vadd.f32 %v5848_v60, %v5391_v45  ;;  %v5040_v1 = vpop.eup %5039  ;;  %5051 = vpow2.f32 %v1018_v39  ;;  %v1149_v61 = vsel %vm829_vm3, %v5870_v54, %v4127_v23 }
 0x169   :  { %v1317_v62 = vmax.f32 %v1315_v34, %v1316_v25  ;;  %v1024_v37 = vmul.f32 1.442695, %v904_v9  ;;  %v5042_v8 = vpop.eup %5041  ;;  %v4129_v5 = vadd.f32 -1.0, %v5036_v3  ;;  %v1148_v22 = vsel %vm828_vm4, %v5846_v35, %v4126_v17 }
 0x16a   :  { %5053 = vpow2.f32 %v1028_v50  ;;  %v6011_v55 = vadd.f32 %v5856_v32, %v5391_v45  ;;  %v5044_v60 = vpop.eup %5043  ;;  %v6013_v63 = vadd.f32 -1.0, %v5038_v11  ;;  %v1306_v12 = vrot.slane %v1305_v26, 1 }
 0x16b   :  { %v907_v6 = vmin.f32 %v6001_v31, 0.0  ;;  %v1322_v10 = vmax.f32 %v1148_v22, %v1149_v61  ;;  %vm832_vm7 = vcmp.gt.f32.partialorder %v5910_v38, 0.0  ;;  %v4130_v54 = vadd.f32 -1.0, %v5040_v1 }
 0x16c   :  { %v1312_v23 = vmax.f32 %v1310_v14, %v1311_v33  ;;  %5055 = vpow2.f32 %v1024_v37  ;;  %v1414_v43 = vpack.c.bf16 %v1149_v61, %v1148_v22  ;;  %v6017_v49 = vadd.f32 -1.0, %v5042_v8 }
 0x16d   :  { %vm833_vm8 = vcmp.gt.f32.partialorder %v5925_v57, 0.0  ;;  %v1318_v35 = vrot.slane %v1317_v62, 2  ;;  %v1030_v32 = vmul.f32 1.442695, %v907_v6  ;;  %v1323_v16 = vrot.slane %v1322_v10, 4 }
 0x16e   :  { %4675 = vmatprep.mubr.bf16.mxu1 %v1414_v43  ;;  %v905_v39 = vmin.f32 %v6011_v55, 0.0  ;;  %v1150_v34 = vsel %vm830_vm5, %v5842_v46, %v4128_v30  ;;  %v1151_v14 = vsel %vm831_vm6, %v5864_v52, %v4129_v5  ;;  %v6029_v0 = vadd.f32 %v5886_v36, %v5391_v45  ;;  %v5046_v17 = vpop.eup %5045 }
 0x16f   :  { %v6031_v44 = vmax.f32 %v1305_v26, %v1306_v12  ;;  %5057 = vpow2.f32 %v1030_v32  ;;  %v1324_v3 = vmax.f32 %v1322_v10, %v1323_v16  ;;  %v1329_v25 = vmax.f32 %v1150_v34, %v1151_v14 }
 0x170   :  { %v5048_v9 = vpop.eup %5047  ;;  %vm834_vm11 = vcmp.gt.f32.partialorder %v5906_v58, 0.0  ;;  %vm835_vm12 = vcmp.gt.f32.partialorder %v5914_v40, 0.0  ;;  %v1313_v46 = vrot.slane %v1312_v23, 1  ;;  %v1026_v30 = vmul.f32 1.442695, %v905_v39 }
 0x171   :  { %v1415_v11 = vpack.c.bf16 %v1151_v14, %v1150_v34  ;;  %v910_v52 = vmin.f32 %v6029_v0, 0.0  ;;  %v6036_v33 = vmax.f32 %v1317_v62, %v1318_v35  ;;  %v1325_v36 = vrot.slane %v1324_v3, 2  ;;  %v5050_v1 = vpop.eup %5049 }
 0x172   :  { %v1330_v50 = vrot.slane %v1329_v25, 4  ;;  %v6040_v26 = vadd.f32 %v5888_v41, %v5391_v45  ;;  %v4131_v37 = vadd.f32 -1.0, %v5044_v60  ;;  %vm836_vm13 = vcmp.gt.f32.partialorder %v5946_v13, 0.0  ;;  %v5052_v62 = vpop.eup %5051 }
 0x173   :  { %vm837_vm14 = vcmp.gt.f32.partialorder %v5973_v47, 0.0  ;;  %5059 = vpow2.f32 %v1026_v30  ;;  %4676 = vmatmul.mubr.bf16.gmra.mrb[44].mxu1 %v1415_v11  ;;  %v1036_v61 = vmul.f32 1.442695, %v910_v52  ;;  %v6046_v8 = vadd.f32 %v5894_v56, %v5391_v45 }
 0x174   :  { %v4136_v5 = vadd.f32 -1.0, %v5046_v17  ;;  %v4134_v22 = vadd.f32 -1.0, %v5048_v9  ;;  %v1331_v12 = vmax.f32 %v1329_v25, %v1330_v50  ;;  %v908_v41 = vmin.f32 %v6040_v26, 0.0  ;;  %v5054_v6 = vpop.eup %5053 }
 0x175   :  { %vm838_vm15 = vcmp.gt.f32.partialorder %v5941_v20, 0.0  ;;  %vm839_vm0 = vcmp.gt.f32.partialorder %v5954_v2, 0.0  ;;  %v6051_v60 = vmax.f32 %v1312_v23, %v1313_v46  ;;  %v6053_v10 = vmax.f32 %v1324_v3, %v1325_v36 }
 0x176   :  { %5061 = vpow2.f32 %v1036_v61  ;;  %v911_v43 = vmin.f32 %v6046_v8, 0.0  ;;  %v4137_v56 = vadd.f32 -1.0, %v5050_v1  ;;  %v1320_v35 = vrot.slane %v6036_v33, 1  ;;  %v5056_v39 = vpop.eup %5055 }
 0x177   :  { %v1032_v32 = vmul.f32 1.442695, %v908_v41  ;;  %v1152_v16 = vsel %vm832_vm7, %v5910_v38, %v4130_v54  ;;  %vm840_vm1 = vcmp.gt.f32.partialorder %v5992_v29, 0.0  ;;  %vm841_vm2 = vcmp.gt.f32.partialorder %v6011_v55, 0.0 }
 0x178   :  { %v1332_v23 = vrot.slane %v1331_v12, 2  ;;  %v1038_v34 = vmul.f32 1.442695, %v911_v43  ;;  %v1153_v14 = vsel %vm833_vm8, %v5925_v57, %v4131_v37  ;;  %v6067_v17 = vadd.f32 %v5898_v21, %v5391_v45 }
 0x179   :  { %v4135_v3 = vadd.f32 -1.0, %v5052_v62  ;;  %v4140_v25 = vadd.f32 -1.0, %v5054_v6  ;;  %5063 = vpow2.f32 %v1032_v32  ;;  %v1336_v9 = vmax.f32 %v1152_v16, %v1153_v14  ;;  %v5058_v30 = vpop.eup %5057 }
 0x17a   :  { %vm842_vm3 = vcmp.gt.f32.partialorder %v5988_v4, 0.0  ;;  %vm843_vm4 = vcmp.gt.f32.partialorder %v6001_v31, 0.0  ;;  %v1327_v38 = vrot.slane %v6053_v10, 1  ;;  %5065 = vpow2.f32 %v1038_v34 }
 0x17b   :  { %v1416_v54 = vpack.c.bf16 %v1153_v14, %v1152_v16  ;;  %v909_v46 = vmin.f32 %v6067_v17, 0.0  ;;  %v4138_v57 = vadd.f32 -1.0, %v5056_v39  ;;  %vm846_vm5 = vcmp.gt.f32.partialorder %v6029_v0, 0.0 }
 0x17c   :  { %v1337_v45 = vrot.slane %v1336_v9, 4  ;;  %v1154_v21 = vsel %vm834_vm11, %v5906_v58, %v6013_v63  ;;  %v1155_v11 = vsel %vm835_vm12, %v5914_v40, %v6017_v49  ;;  %v6082_v52 = vmax.f32 %v1331_v12, %v1332_v23 }
 0x17d   :  { %4679 = vmatprep.mubr.bf16.mxu1 %v1416_v54  ;;  %v1034_v36 = vmul.f32 1.442695, %v909_v46  ;;  %v1343_v50 = vmax.f32 %v1154_v21, %v1155_v11  ;;  %v1417_v1 = vpack.c.bf16 %v1155_v11, %v1154_v21  ;;  %v4141_v37 = vadd.f32 -1.0, %v5058_v30  ;;  %v5060_v63 = vpop.eup %5059 }
 0x17e   :  { %v1338_v61 = vmax.f32 %v1336_v9, %v1337_v45  ;;  %v1156_v62 = vsel %vm836_vm13, %v5946_v13, %v4134_v22  ;;  %v1157_v58 = vsel %vm837_vm14, %v5973_v47, %v4135_v3  ;;  %vm847_vm6 = vcmp.gt.f32.partialorder %v6046_v8, 0.0 }
 0x17f   :  { %5067 = vpow2.f32 %v1034_v36  ;;  %v1344_v40 = vrot.slane %v1343_v50, 4  ;;  %4680 = vmatmul.mubr.bf16.gmra.mrb[48].mxu1 %v1417_v1  ;;  %v1350_v49 = vmax.f32 %v1156_v62, %v1157_v58  ;;  %v1418_v12 = vpack.c.bf16 %v1157_v58, %v1156_v62 }
 0x180   :  { %v4139_v41 = vadd.f32 -1.0, %v5060_v63  ;;  %v1339_v6 = vrot.slane %v1338_v61, 2  ;;  %v1158_v43 = vsel %vm838_vm15, %v5941_v20, %v4136_v5  ;;  %v1159_v13 = vsel %vm839_vm0, %v5954_v2, %v4137_v56  ;;  %v5062_v22 = vpop.eup %5061 }
 0x181   :  { %v1345_v47 = vmax.f32 %v1343_v50, %v1344_v40  ;;  %v1351_v32 = vrot.slane %v1350_v49, 4  ;;  %4683 = vmatprep.mubr.bf16.mxu1 %v1418_v12  ;;  %v1357_v16 = vmax.f32 %v1158_v43, %v1159_v13  ;;  %v1419_v39 = vpack.c.bf16 %v1159_v13, %v1158_v43 }
 0x182   :  { %v4144_v23 = vadd.f32 -1.0, %v5062_v22  ;;  %v1340_v34 = vmax.f32 %v1338_v61, %v1339_v6  ;;  %v1160_v14 = vsel %vm840_vm1, %v5992_v29, %v4138_v57  ;;  %v1161_v20 = vsel %vm841_vm2, %v6011_v55, %v4139_v41 }
 0x183   :  { %vm844_vm7 = vcmp.gt.f32.partialorder %v6040_v26, 0.0  ;;  %vm845_vm8 = vcmp.gt.f32.partialorder %v6067_v17, 0.0  ;;  %v1346_v2 = vrot.slane %v1345_v47, 2  ;;  %v1352_v5 = vmax.f32 %v1350_v49, %v1351_v32  ;;  %v5064_v9 = vpop.eup %5063 }
 0x184   :  { %v1358_v56 = vrot.slane %v1357_v16, 4  ;;  %v1364_v3 = vmax.f32 %v1160_v14, %v1161_v20  ;;  %v1341_v54 = vrot.slane %v1340_v34, 1  ;;  %vm3297_vm11 = vcmask 1043459   ;;  %v5066_v30 = vpop.eup %5065 }
 0x185   :  { %v1420_v46 = vpack.c.bf16 %v1161_v20, %v1160_v14  ;;  %v1162_v29 = vsel %vm842_vm3, %v5988_v4, %v4140_v25  ;;  %v1163_v55 = vsel %vm843_vm4, %v6001_v31, %v4141_v37  ;;  %v1347_v57 = vmax.f32 %v1345_v47, %v1346_v2 }
 0x186   :  { %v1353_v45 = vrot.slane %v1352_v5, 2  ;;  %v1359_v21 = vmax.f32 %v1357_v16, %v1358_v56  ;;  %vm3299_vm12 = vcmask 1044484   ;;  %v6114_v11 = vsel %vm846_vm5, %v6029_v0, %v4144_v23 }
 0x187   :  { %v4145_v36 = vadd.f32 -1.0, %v5066_v30  ;;  %v1342_v50 = vmax.f32 %v1340_v34, %v1341_v54  ;;  %v1365_v1 = vrot.slane %v1364_v3, 4  ;;  %v1371_v61 = vmax.f32 %v1162_v29, %v1163_v55  ;;  %4684 = vmatmul.mubr.bf16.gmra.mrb[52].mxu1 %v1419_v39 }
 0x188   :  { %v1348_v62 = vrot.slane %v1347_v57, 1  ;;  %v1354_v4 = vmax.f32 %v1352_v5, %v1353_v45  ;;  %v1360_v25 = vrot.slane %v1359_v21, 2  ;;  %v1421_v58 = vpack.c.bf16 %v1163_v55, %v1162_v29  ;;  %4687 = vmatprep.mubr.bf16.mxu1 %v1420_v46 }
 0x189   :  { %v4142_v31 = vadd.f32 -1.0, %v5064_v9  ;;  %v1366_v37 = vmax.f32 %v1364_v3, %v1365_v1  ;;  %v1372_v63 = vrot.slane %v1371_v61, 4  ;;  %v1167_v40 = vsel %vm847_vm6, %v6046_v8, %v4145_v36  ;;  %v5068_v49 = vpop.eup %5067 }
 0x18a   :  { %v1349_v0 = vmax.f32 %v1347_v57, %v1348_v62  ;;  %v1355_v12 = vrot.slane %v1354_v4, 1  ;;  %v1361_v41 = vmax.f32 %v1359_v21, %v1360_v25  ;;  %v1385_v6 = vmax.f32 %v6114_v11, %v1167_v40  ;;  %v8172_v25 = vld [vmem:[#allocation4_spill] sm:$0xff] }
 0x18b   :  { %v4143_v43 = vadd.f32 -1.0, %v5068_v49  ;;  %v1367_v13 = vrot.slane %v1366_v37, 2  ;;  %v1373_v22 = vmax.f32 %v1371_v61, %v1372_v63  ;;  %v1423_v47 = vpack.c.bf16 %v1167_v40, %v6114_v11 }
 0x18c   :  { %v3321_v32 = vsel %vm3293_vm9, %v1349_v0, %v1342_v50  ;;  %v1356_v16 = vmax.f32 %v1354_v4, %v1355_v12  ;;  %v1362_v39 = vrot.slane %v1361_v41, 1  ;;  %v1386_v23 = vrot.slane %v1385_v6, 4  ;;  %v8171_v4 = vld [vmem:[#allocation3_spill] sm:$0xff] }
 0x18d   :  { %v1368_v34 = vmax.f32 %v1366_v37, %v1367_v13  ;;  %v1374_v14 = vrot.slane %v1373_v22, 2  ;;  %v1164_v8 = vsel %vm844_vm7, %v6040_v26, %v4142_v31  ;;  %v1165_v20 = vsel %vm845_vm8, %v6067_v17, %v4143_v43 }
 0x18e   :  { %v3322_v2 = vsel %vm3295_vm10, %v1356_v16, %v3321_v32  ;;  %v1363_v5 = vmax.f32 %v1361_v41, %v1362_v39  ;;  %v1378_v56 = vmax.f32 %v1164_v8, %v1165_v20  ;;  %v1422_v3 = vpack.c.bf16 %v1165_v20, %v1164_v8 }
 0x18f   :  { %v1369_v9 = vrot.slane %v1368_v34, 1  ;;  %v1375_v54 = vmax.f32 %v1373_v22, %v1374_v14  ;;  %v1387_v46 = vmax.f32 %v1385_v6, %v1386_v23  ;;  %v8170_v29 = vrot.slane %v5766_v19, 1  ;;  %4688 = vmatmul.mubr.bf16.gmra.mrb[56].mxu1 %v1421_v58 }
 0x190   :  { %v3323_v30 = vsel %vm3297_vm11, %v1363_v5, %v3322_v2  ;;  %v1379_v26 = vrot.slane %v1378_v56, 4  ;;  %v3298_v17 = vsel %vm3297_vm11, %v5607_v28, %v5526_v7  ;;  %vm3301_vm9 = vcmask 1045509   ;;  %4691 = vmatprep.mubr.bf16.mxu1 %v1422_v3 }
 0x191   :  { %v1223_v55 = vmax.f32 %v5766_v19, %v8170_v29  ;;  %v1370_v57 = vmax.f32 %v1368_v34, %v1369_v9  ;;  %v1376_v45 = vrot.slane %v1375_v54, 1  ;;  %v1388_v21 = vrot.slane %v1387_v46, 2 }
 0x192   :  { %v3300_v11 = vsel %vm3299_vm12, %v5664_v59, %v3298_v17  ;;  %v1380_v36 = vmax.f32 %v1378_v56, %v1379_v26  ;;  %vm3303_vm10 = vcmask 1046534   ;;  %vm3305_vm13 = vcmask 1047559  }
 0x193   :  { %v3302_v19 = vsel %vm3301_vm9, %v5669_v53, %v3300_v11  ;;  %v3324_v50 = vsel %vm3299_vm12, %v1370_v57, %v3323_v30  ;;  %v1377_v1 = vmax.f32 %v1375_v54, %v1376_v45  ;;  %v1389_v61 = vmax.f32 %v1387_v46, %v1388_v21  ;;  %v4894_v30 = vld [vmem:[%s8095_s1 + $0x110] sm:$0xff]   ;;  %v5201_v11 = vld [vmem:[%s8095_s1 + $0x108] sm:$0xff]  }
 0x194   :  { %v3304_v7 = vsel %vm3303_vm10, %v5792_v15, %v3302_v19  ;;  %v1321_v28 = vmax.f32 %v6036_v33, %v1320_v35  ;;  %v1381_v62 = vrot.slane %v1380_v36, 2  ;;  %v3309_v53 = vsel %vm3297_vm11, %v8172_v25, %v8171_v4 }
 0x195   :  { %v3306_v59 = vsel %vm3305_vm13, %v1223_v55, %v3304_v7  ;;  %v1328_v58 = vmax.f32 %v6053_v10, %v1327_v38  ;;  %v1334_v31 = vrot.slane %v6082_v52, 1  ;;  %v3310_v15 = vsel %vm3299_vm12, %v5892_v42, %v3309_v53  ;;  %v8173_v38 = vld [vmem:[#allocation2_spill] sm:$0xff]  ;;  %v4898_v7 = vld [vmem:[%s8095_s1 + $0x130] sm:$0xff]  }
 0x196   :  { %v3325_v37 = vsel %vm3301_vm9, %v1377_v1, %v3324_v50  ;;  %v1382_v63 = vmax.f32 %v1380_v36, %v1381_v62  ;;  %v1390_v33 = vrot.slane %v1389_v61, 1  ;;  %v1279_v35 = vmax.f32 %v5957_v24, %v1278_v48  ;;  %v4895_v36 = vld [vmem:[%s8095_s1 + $0x118] sm:$0xff]   ;;  %v4896_v1 = vld [vmem:[%s8095_s1 + $0x120] sm:$0xff]  }
 0x197   :  { %v3311_v40 = vsel %vm3301_vm9, %v5896_v27, %v3310_v15  ;;  %v3332_v10 = vrot.slane %v3306_v59, 7  ;;  %vm3336_vm14 = vcmp.lt.s32.totalorder %v8173_v38, 1  ;;  %v3353_v0 = vrot.slane %v3306_v59, 1  ;;  %4692 = vmatmul.mubr.bf16.gmra.mrb[60].mxu1 %v1423_v47 }
 0x198   :  { %v3312_v49 = vsel %vm3303_vm10, %v5950_v18, %v3311_v40  ;;  %v1383_v12 = vrot.slane %v1382_v63, 1  ;;  %vm3357_vm15 = vcmp.lt.s32.totalorder %v8173_v38, 7  ;;  %v3316_v24 = vsel %vm3297_vm11, %v6031_v44, %v5976_v51 }
 0x199   :  { %v3313_v42 = vsel %vm3305_vm13, %v1279_v35, %v3312_v49  ;;  %v3209_v6 = vand.u32 15, %v8173_v38  ;;  %v1391_v43 = vmax.f32 %v1389_v61, %v1390_v33  ;;  %v1335_v13 = vmax.f32 %v6082_v52, %v1334_v31  ;;  %v4897_v61 = vld [vmem:[%s8095_s1 + $0x128] sm:$0xff]  }
 0x19a   :  { %v3333_v48 = vrot.slane %v3313_v42, 7  ;;  %v3354_v41 = vrot.slane %v3313_v42, 1  ;;  %v3375_v27 = vpack.c.bf16 %v3313_v42, %v3306_v59  ;;  %v1384_v18 = vmax.f32 %v1382_v63, %v1383_v12  ;;  %v4900_v59 = vld [vmem:[%s8095_s1 + $0x140] sm:$0xff]  }
 0x19b   :  { %v3317_v22 = vsel %vm3299_vm12, %v6051_v60, %v3316_v24  ;;  %v3203_v51 = vadd.s32 16, %v8173_v38  ;;  %vm4346_vm0 = vcmp.ne.s32.totalorder %v3209_v6, 0  ;;  %v3202_v23 = vadd.s32 8, %v8173_v38 }
 0x19c   :  { %v3339_v47 = vsel %vm3336_vm14, %v3332_v10, %v3333_v48  ;;  %3560 = vmatprep.mubr.bf16.mxu1 %v3375_v27  ;;  %v3318_v32 = vsel %vm3301_vm9, %v1321_v28, %v3317_v22  ;;  %v3360_v44 = vsel %vm3357_vm15, %v3353_v0, %v3354_v41  ;;  %v3326_v16 = vsel %vm3303_vm10, %v1384_v18, %v3325_v37  ;;  %v4899_v28 = vld [vmem:[%s8095_s1 + $0x138] sm:$0xff]  }
 0x19d   :  { %v3319_v39 = vsel %vm3303_vm10, %v1328_v58, %v3318_v32  ;;  %v3327_v52 = vsel %vm3305_vm13, %v1391_v43, %v3326_v16  ;;  %v3223_v5 = vand.u32 15, %v3203_v51  ;;  %vm5204_vm1 = vmmov 1   ;;  %v6254_v58 = vld [vmem:[%s8097_s2] sm:$0xff] }
 0x19e   :  { %v3320_v60 = vsel %vm3305_vm13, %v1335_v13, %v3319_v39  ;;  %v3335_v34 = vrot.slane %v3327_v52, 7  ;;  %v3356_v14 = vrot.slane %v3327_v52, 1  ;;  %vm6190_vm2 = vmpackc.low %vm5204_vm1, %vm4346_vm0  ;;  %v8174_v9 = vmov 0 }
 0x19f   :  { %v3334_v8 = vrot.slane %v3320_v60, 7  ;;  %v3355_v20 = vrot.slane %v3320_v60, 1  ;;  %v3378_v2 = vpack.c.bf16 %v3327_v52, %v3320_v60  ;;  %v8175_v9 = vsel %vm6190_vm2, 4294967295, %v8174_v9 }
 0x1a0   :  { %v3340_v56 = vsel %vm3336_vm14, %v3335_v34, %v3332_v10  ;;  %v3361_v3 = vsel %vm3357_vm15, %v3356_v14, %v3353_v0  ;;  %8176 = vst [vmem:[#allocation3_spill] sm:$0xff] %v8175_v9  ;;  %v3216_v45 = vand.u32 15, %v3202_v23  ;;  %vm4347_vm3 = vcmp.ne.s32.totalorder %v3223_v5, 0 }
 0x1a1   :  { %v3358_v54 = vsel %vm3357_vm15, %v3355_v20, %v3356_v14  ;;  %v3337_v46 = vsel %vm3336_vm14, %v3334_v8, %v3335_v34  ;;  %v4284_v29 = vpack.c.bf16 %v3339_v47, %v3340_v56  ;;  %v3338_v26 = vsel %vm3336_vm14, %v3333_v48, %v3334_v8  ;;  %vm6214_vm5 = vmpackc.low %vm5204_vm1, %vm4347_vm3 }
 0x1a2   :  { %v4296_v55 = vpack.c.bf16 %v3361_v3, %v3358_v54  ;;  %v3359_v17 = vsel %vm3357_vm15, %v3354_v41, %v3355_v20  ;;  %v4288_v57 = vpack.c.bf16 %v3337_v46, %v3338_v26  ;;  %vm4348_vm4 = vcmp.ne.s32.totalorder %v3216_v45, 15 }
 0x1a3   :  { %v4292_v21 = vpack.c.bf16 %v3359_v17, %v3360_v44  ;;  %4285 = vmatmul.mubr.msk.bf16.vlgmr.msra.gmra.mrb[64].mxu1 %vm6190_vm2, %v4284_v29  ;;  %v8177_v19 = vmov 0  ;;  %vm6219_vm6 = vmpackc.low %vm4348_vm4, %vm5204_vm1  ;;  %v8180_v50 = vmov 0  ;;  %v3204_v62 = vadd.s32 24, %v8173_v38 }
 0x1a4   :  { %4776 = vmatpush3.bf16.msra.mxu1 %v5201_v11  ;;  %3568 = vmatprep.mubr.bf16.mxu1 %v3378_v2  ;;  %v8178_v19 = vsel %vm6214_vm5, 4294967295, %v8177_v19  ;;  %v8181_v50 = vsel %vm6219_vm6, 4294967295, %v8180_v50  ;;  %v8183_v25 = vmov 0  ;;  %v1426_v53 = vsub.s32 1, %v8173_v38 }
 0x1a5   :  { %4777 = vmatprep.subr.bf16.mxu1 %v4894_v30  ;;  %8179 = vst [vmem:[#allocation4_spill] sm:$0xff] %v8178_v19  ;;  %8182 = vst [vmem:[#allocation2_spill] sm:$0xff] %v8181_v50  ;;  %v3230_v4 = vand.u32 15, %v3204_v62 }
 0x1a6   :  { %v6257_v31 = vrot.slane %v6254_v58, %v1426_v53 }
 0x1a7   :  { %vm4349_vm7 = vcmp.ne.s32.totalorder %v3230_v4, 15 }
 0x1a8   :  { %4778 = vmatpush3.bf16.msra.mxu1 %v4894_v30  ;;  %vm6244_vm8 = vmpackc.low %vm4349_vm7, %vm5204_vm1 }
 0x1a9   :  { %4779 = vmatprep.subr.bf16.mxu1 %v4895_v36  ;;  %v8184_v25 = vsel %vm6244_vm8, 4294967295, %v8183_v25 }
 0x1aa   :  { %8185 = vst [vmem:[#allocation5_spill] sm:$0xff] %v8184_v25 }
 0x1ab   :  { %4289 = vmatmul.mubr.msk.bf16.gmra.mrb[68].mxu1 %vm6214_vm5, %v4288_v57 }
 0x1ac   :  { %4780 = vmatpush3.bf16.msra.mxu1 %v4895_v36  ;;  %4791 = vmatprep.mubr.msk.bf16.mxu1 %vm6219_vm6, %v4292_v21 }
 0x1ad   :  { %4781 = vmatprep.subr.bf16.mxu1 %v4896_v1 }
 0x1b0   :  { %4782 = vmatpush3.bf16.msra.mxu1 %v4896_v1 }
 0x1b1   :  { %4783 = vmatprep.subr.bf16.mxu1 %v4897_v61 }
 0x1b4   :  { %4784 = vmatpush3.bf16.msra.mxu1 %v4897_v61 }
 0x1b5   :  { %4785 = vmatprep.subr.bf16.mxu1 %v4898_v7 }
 0x1b8   :  { %4786 = vmatpush3.bf16.msra.mxu1 %v4898_v7 }
 0x1b9   :  { %4787 = vmatprep.subr.bf16.mxu1 %v4899_v28 }
 0x1bc   :  { %4788 = vmatpush3.bf16.msra.mxu1 %v4899_v28 }
 0x1bd   :  { %4789 = vmatprep.subr.bf16.mxu1 %v4900_v59 }
 0x1c0   :  { %4790 = vmatpush3.bf16.msra.mxu1 %v4900_v59 }
 0x1c3   :  { %4792 = vmatmul.mubr.msk.bf16.vlgmr.msra.gmra.mrb[72].mxu1 %vm6244_vm8, %v4296_v55 }
 0x1c7   :  { %v4633_v15 = vpop.f32.mrb[0].mxu1 }
 0x1c8   :  { %v1510_v37 = vpop.f32.mrb[1].mxu1  ;;  %v6266_v49 = vadd.f32 %v4633_v15, %v6257_v31 }
 0x1c9   :  { %v4634_v63 = vpop.f32.mrb[2].mxu1  ;;  %v6260_v35 = vadd.f32 %v1510_v37, %v6257_v31 }
 0x1ca   :  { %v1513_v33 = vpop.f32.mrb[3].mxu1  ;;  %v6272_v12 = vadd.f32 %v4634_v63, %v6257_v31 }
 0x1cb   :  { %v6263_v40 = vadd.f32 %v1513_v33, %v6257_v31 }
 0x1cd   :  { %v1765_v10 = vadd.f32 %v6263_v40, %v6260_v35 }
 0x1cf   :  { %v1766_v0 = vadd.f32 %v1765_v10, %v6266_v49 }
 0x1d1   :  { %v1767_v24 = vadd.f32 %v1766_v0, %v6272_v12 }
 0x1d2   :  { %v4637_v42 = vpop.f32.mrb[4].mxu1 }
 0x1d3   :  { %v1526_v48 = vpop.f32.mrb[5].mxu1  ;;  %v6284_v22 = vadd.f32 %v4637_v42, %v6257_v31 }
 0x1d4   :  { %v6276_v41 = vadd.f32 %v1526_v48, %v6257_v31  ;;  %v4638_v27 = vpop.f32.mrb[6].mxu1 }
 0x1d5   :  { %v1529_v6 = vpop.f32.mrb[7].mxu1  ;;  %v6288_v32 = vadd.f32 %v4638_v27, %v6257_v31 }
 0x1d6   :  { %v1768_v18 = vadd.f32 %v1767_v24, %v6276_v41  ;;  %v6280_v43 = vadd.f32 %v1529_v6, %v6257_v31 }
 0x1d8   :  { %v1769_v13 = vadd.f32 %v1768_v18, %v6280_v43 }
 0x1da   :  { %v1770_v47 = vadd.f32 %v1769_v13, %v6284_v22 }
 0x1dc   :  { %v1771_v44 = vadd.f32 %v1770_v47, %v6288_v32 }
 0x1de   :  { %v4641_v51 = vpop.f32.mrb[8].mxu1 }
 0x1df   :  { %v1542_v16 = vpop.f32.mrb[9].mxu1  ;;  %v6299_v14 = vadd.f32 %v4641_v51, %v6257_v31 }
 0x1e0   :  { %v6292_v39 = vadd.f32 %v1542_v16, %v6257_v31  ;;  %v4642_v52 = vpop.f32.mrb[10].mxu1 }
 0x1e1   :  { %v1545_v60 = vpop.f32.mrb[11].mxu1  ;;  %v6303_v20 = vadd.f32 %v4642_v52, %v6257_v31 }
 0x1e2   :  { %v1772_v23 = vadd.f32 %v1771_v44, %v6292_v39  ;;  %v6296_v34 = vadd.f32 %v1545_v60, %v6257_v31 }
 0x1e4   :  { %v1773_v8 = vadd.f32 %v1772_v23, %v6296_v34 }
 0x1e6   :  { %v1774_v2 = vadd.f32 %v1773_v8, %v6299_v14 }
 0x1e7   :  { %v4645_v5 = vpop.f32.mrb[12].mxu1 }
 0x1e8   :  { %v1775_v56 = vadd.f32 %v1774_v2, %v6303_v20  ;;  %v1558_v3 = vpop.f32.mrb[13].mxu1  ;;  %v6315_v26 = vadd.f32 %v4645_v5, %v6257_v31 }
 0x1e9   :  { %v6308_v54 = vadd.f32 %v1558_v3, %v6257_v31  ;;  %v4646_v46 = vpop.f32.mrb[14].mxu1 }
 0x1ea   :  { %v1561_v29 = vpop.f32.mrb[15].mxu1  ;;  %v6320_v45 = vadd.f32 %v4646_v46, %v6257_v31 }
 0x1eb   :  { %v1776_v55 = vadd.f32 %v1775_v56, %v6308_v54  ;;  %v6312_v30 = vadd.f32 %v1561_v29, %v6257_v31 }
 0x1ed   :  { %v1777_v17 = vadd.f32 %v1776_v55, %v6312_v30 }
 0x1ef   :  { %v1778_v57 = vadd.f32 %v1777_v17, %v6315_v26 }
 0x1f1   :  { %v1779_v11 = vadd.f32 %v1778_v57, %v6320_v45 }
 0x1f2   :  { %v4649_v21 = vpop.f32.mrb[16].mxu1 }
 0x1f3   :  { %v1574_v36 = vpop.f32.mrb[17].mxu1  ;;  %v6331_v59 = vadd.f32 %v4649_v21, %v6257_v31 }
 0x1f4   :  { %v6324_v1 = vadd.f32 %v1574_v36, %v6257_v31  ;;  %v4650_v61 = vpop.f32.mrb[18].mxu1 }
 0x1f5   :  { %v1577_v7 = vpop.f32.mrb[19].mxu1  ;;  %v6335_v53 = vadd.f32 %v4650_v61, %v6257_v31 }
 0x1f6   :  { %v1780_v28 = vadd.f32 %v1779_v11, %v6324_v1  ;;  %v6328_v62 = vadd.f32 %v1577_v7, %v6257_v31 }
 0x1f8   :  { %v1781_v4 = vadd.f32 %v1780_v28, %v6328_v62 }
 0x1fa   :  { %v1782_v15 = vadd.f32 %v1781_v4, %v6331_v59 }
 0x1fc   :  { %v1783_v37 = vadd.f32 %v1782_v15, %v6335_v53 }
 0x1fe   :  { %v4653_v63 = vpop.f32.mrb[20].mxu1 }
 0x1ff   :  { %v1590_v33 = vpop.f32.mrb[21].mxu1  ;;  %v1599_v27 = vadd.f32 %v4653_v63, %v6257_v31 }
 0x200   :  { %v1591_v10 = vadd.f32 %v1590_v33, %v6257_v31  ;;  %v4654_v0 = vpop.f32.mrb[22].mxu1 }
 0x201   :  { %v1593_v42 = vpop.f32.mrb[23].mxu1  ;;  %v1602_v18 = vadd.f32 %v4654_v0, %v6257_v31 }
 0x202   :  { %v1784_v24 = vadd.f32 %v1783_v37, %v1591_v10  ;;  %v1594_v48 = vadd.f32 %v1593_v42, %v6257_v31 }
 0x204   :  { %v1785_v6 = vadd.f32 %v1784_v24, %v1594_v48 }
 0x206   :  { %v1786_v13 = vadd.f32 %v1785_v6, %v1599_v27 }
 0x208   :  { %v1787_v47 = vadd.f32 %v1786_v13, %v1602_v18 }
 0x20a   :  { %v4657_v51 = vpop.f32.mrb[24].mxu1 }
 0x20b   :  { %v1606_v44 = vpop.f32.mrb[25].mxu1  ;;  %v1615_v2 = vadd.f32 %v4657_v51, %v6257_v31 }
 0x20c   :  { %v1607_v16 = vadd.f32 %v1606_v44, %v6257_v31  ;;  %v4658_v52 = vpop.f32.mrb[26].mxu1 }
 0x20d   :  { %v1609_v60 = vpop.f32.mrb[27].mxu1  ;;  %v1618_v56 = vadd.f32 %v4658_v52, %v6257_v31 }
 0x20e   :  { %v1788_v23 = vadd.f32 %v1787_v47, %v1607_v16  ;;  %v1610_v8 = vadd.f32 %v1609_v60, %v6257_v31 }
 0x210   :  { %v1789_v5 = vadd.f32 %v1788_v23, %v1610_v8 }
 0x212   :  { %v1790_v3 = vadd.f32 %v1789_v5, %v1615_v2 }
 0x214   :  { %v1791_v46 = vadd.f32 %v1790_v3, %v1618_v56 }
 0x215   :  { %v4661_v29 = vpop.f32.mrb[28].mxu1 }
 0x216   :  { %v1622_v55 = vpop.f32.mrb[29].mxu1  ;;  %v1631_v61 = vadd.f32 %v4661_v29, %v6257_v31 }
 0x217   :  { %v1623_v17 = vadd.f32 %v1622_v55, %v6257_v31  ;;  %v4662_v57 = vpop.f32.mrb[30].mxu1 }
 0x218   :  { %v1625_v21 = vpop.f32.mrb[31].mxu1  ;;  %v1634_v28 = vadd.f32 %v4662_v57, %v6257_v31 }
 0x219   :  { %v1792_v11 = vadd.f32 %v1791_v46, %v1623_v17  ;;  %v1626_v36 = vadd.f32 %v1625_v21, %v6257_v31 }
 0x21b   :  { %v1793_v7 = vadd.f32 %v1792_v11, %v1626_v36 }
 0x21d   :  { %v1794_v4 = vadd.f32 %v1793_v7, %v1631_v61 }
 0x21f   :  { %v1795_v15 = vadd.f32 %v1794_v4, %v1634_v28 }
 0x221   :  { %v4665_v37 = vpop.f32.mrb[32].mxu1  ;;  %v1796_v63 = vrot.slane %v1795_v15, 4 }
 0x222   :  { %v1638_v33 = vpop.f32.mrb[33].mxu1  ;;  %v6362_v55 = vadd.f32 %v4665_v37, %v6257_v31 }
 0x223   :  { %v4666_v0 = vpop.f32.mrb[34].mxu1  ;;  %v1797_v42 = vadd.f32 %v1796_v63, %v1795_v15  ;;  %v6355_v60 = vadd.f32 %v1638_v33, %v6257_v31 }
 0x224   :  { %v1641_v24 = vpop.f32.mrb[35].mxu1 }
 0x225   :  { %v1798_v6 = vrot.slane %v1797_v42, 2  ;;  %v6352_v51 = vadd.f32 %v1641_v24, %v6257_v31 }
 0x227   :  { %v1799_v13 = vadd.f32 %v1798_v6, %v1797_v42  ;;  %v1802_v46 = vadd.f32 %v6352_v51, %v6355_v60 }
 0x229   :  { %v1800_v47 = vrot.slane %v1799_v13, 1  ;;  %v1803_v21 = vadd.f32 %v1802_v46, %v6362_v55 }
 0x22b   :  { %v1801_v44 = vadd.f32 %v1800_v47, %v1799_v13 }
 0x22c   :  { %v4669_v52 = vpop.f32.mrb[36].mxu1 }
 0x22d   :  { %v1654_v23 = vpop.f32.mrb[37].mxu1  ;;  %v6357_v3 = vmul.f32 0.00390625, %v1801_v44 }
 0x22e   :  { %v4670_v5 = vpop.f32.mrb[38].mxu1  ;;  %v6442_v24 = vadd.f32 %v1654_v23, %v6257_v31  ;;  %v6459_v23 = vadd.f32 %v4669_v52, %v6257_v31 }
 0x22f   :  { %v1657_v29 = vpop.f32.mrb[39].mxu1  ;;  %v6366_v57 = vsub.f32 %v6320_v45, %v6357_v3  ;;  %v6371_v11 = vsub.f32 %v6324_v1, %v6357_v3  ;;  %v6375_v7 = vsub.f32 %v6328_v62, %v6357_v3  ;;  %v6379_v4 = vsub.f32 %v6331_v59, %v6357_v3 }
 0x230   :  { %v6383_v15 = vsub.f32 %v6335_v53, %v6357_v3  ;;  %v6386_v45 = vsub.f32 %v1591_v10, %v6357_v3  ;;  %v6389_v37 = vsub.f32 %v1594_v48, %v6357_v3  ;;  %v6392_v1 = vsub.f32 %v1599_v27, %v6357_v3 }
 0x231   :  { %8186 = vst [vmem:[#allocation6_spill] sm:$0xff] %v6366_v57  ;;  %8187 = vst [vmem:[#allocation7_spill] sm:$0xff] %v6371_v11  ;;  %v6395_v62 = vsub.f32 %v1602_v18, %v6357_v3  ;;  %v6398_v63 = vsub.f32 %v1607_v16, %v6357_v3  ;;  %v6401_v59 = vsub.f32 %v1610_v8, %v6357_v3 }
 0x232   :  { %8188 = vst [vmem:[#allocation8_spill] sm:$0xff] %v6375_v7  ;;  %8189 = vst [vmem:[#allocation9_spill] sm:$0xff] %v6379_v4  ;;  %v6404_v53 = vsub.f32 %v1615_v2, %v6357_v3  ;;  %v6407_v10 = vsub.f32 %v1618_v56, %v6357_v3  ;;  %v6410_v48 = vsub.f32 %v1623_v17, %v6357_v3 }
 0x233   :  { %8190 = vst [vmem:[#allocation10_spill] sm:$0xff] %v6383_v15  ;;  %8191 = vst [vmem:[#allocation11_spill] sm:$0xff] %v6386_v45  ;;  %v6413_v27 = vsub.f32 %v1626_v36, %v6357_v3  ;;  %v6416_v18 = vsub.f32 %v1631_v61, %v6357_v3  ;;  %v6419_v16 = vsub.f32 %v1634_v28, %v6357_v3 }
 0x234   :  { %8192 = vst [vmem:[#allocation12_spill] sm:$0xff] %v6389_v37  ;;  %8193 = vst [vmem:[#allocation13_spill] sm:$0xff] %v6395_v62  ;;  %v6423_v8 = vsub.f32 %v6260_v35, %v6357_v3  ;;  %v6427_v2 = vsub.f32 %v6263_v40, %v6357_v3  ;;  %v6430_v17 = vadd.f32 %v4666_v0, %v6257_v31 }
 0x235   :  { %8194 = vst [vmem:[#allocation14_spill] sm:$0xff] %v6398_v63  ;;  %8195 = vst [vmem:[#allocation15_spill] sm:$0xff] %v6401_v59  ;;  %v6435_v28 = vsub.f32 %v6266_v49, %v6357_v3  ;;  %v6446_v0 = vsub.f32 %v6272_v12, %v6357_v3  ;;  %v6450_v6 = vsub.f32 %v6276_v41, %v6357_v3 }
 0x236   :  { %8196 = vst [vmem:[#allocation16_spill] sm:$0xff] %v6407_v10  ;;  %8197 = vst [vmem:[#allocation17_spill] sm:$0xff] %v6410_v48  ;;  %v1804_v61 = vadd.f32 %v1803_v21, %v6430_v17  ;;  %v1906_v35 = vmul.f32 %v6423_v8, %v6423_v8  ;;  %v1907_v40 = vmul.f32 %v6427_v2, %v6427_v2 }
 0x237   :  { %8198 = vst [vmem:[#allocation18_spill] sm:$0xff] %v6416_v18  ;;  %8199 = vst [vmem:[#allocation19_spill] sm:$0xff] %v6419_v16  ;;  %v1908_v49 = vmul.f32 %v6435_v28, %v6435_v28  ;;  %v6456_v44 = vadd.f32 %v1657_v29, %v6257_v31  ;;  %v6463_v12 = vsub.f32 %v6280_v43, %v6357_v3 }
 0x238   :  { %v1970_v13 = vadd.f32 %v1907_v40, %v1906_v35  ;;  %v1805_v47 = vadd.f32 %v1804_v61, %v6442_v24  ;;  %v1909_v41 = vmul.f32 %v6446_v0, %v6446_v0  ;;  %v6470_v35 = vsub.f32 %v6284_v22, %v6357_v3 }
 0x239   :  { %8200 = vst [vmem:[#allocation20_spill] sm:$0xff] %v6463_v12  ;;  %v6473_v29 = vadd.f32 %v4670_v5, %v6257_v31  ;;  %v1910_v52 = vmul.f32 %v6450_v6, %v6450_v6  ;;  %v1911_v5 = vmul.f32 %v6463_v12, %v6463_v12 }
 0x23a   :  { %v4673_v56 = vpop.f32.mrb[40].mxu1  ;;  %v1971_v46 = vadd.f32 %v1970_v13, %v1908_v49  ;;  %v1806_v21 = vadd.f32 %v1805_v47, %v6456_v44  ;;  %8201 = vst [vmem:[#allocation21_spill] sm:$0xff] %v6470_v35  ;;  %v6483_v13 = vsub.f32 %v6288_v32, %v6357_v3  ;;  %v4901_v32 = vld [vmem:[%s8095_s1 + $0x48] sm:$0xff]  }
 0x23b   :  { %v1670_v36 = vpop.f32.mrb[41].mxu1  ;;  %4695 = vmatprep.subr.bf16.mxu0 %v4901_v32  ;;  %v6511_v9 = vadd.f32 %v4673_v56, %v6257_v31 }
 0x23c   :  { %v4674_v33 = vpop.f32.mrb[42].mxu1  ;;  %v1972_v40 = vadd.f32 %v1971_v46, %v1909_v41  ;;  %v1807_v43 = vadd.f32 %v1806_v21, %v6459_v23  ;;  %v6479_v25 = vadd.f32 %v1670_v36, %v6257_v31  ;;  %8202 = vst [vmem:[#allocation22_spill] sm:$0xff] %v6483_v13  ;;  %v6493_v36 = vsub.f32 %v6292_v39, %v6357_v3  ;;  %v4902_v46 = vld [vmem:[%s8095_s1 + $0x50] sm:$0xff]  }
 0x23d   :  { %v1673_v42 = vpop.f32.mrb[43].mxu1  ;;  %v1912_v21 = vmul.f32 %v6470_v35, %v6470_v35  ;;  %v1913_v39 = vmul.f32 %v6483_v13, %v6483_v13  ;;  %4696 = vmatpush3.bf16.msra.mxu0 %v4901_v32  ;;  %v6524_v32 = vadd.f32 %v4674_v33, %v6257_v31 }
 0x23e   :  { %v1973_v47 = vadd.f32 %v1972_v40, %v1910_v52  ;;  %v1808_v50 = vadd.f32 %v1807_v43, %v6473_v29  ;;  %v6489_v19 = vadd.f32 %v1673_v42, %v6257_v31  ;;  %8203 = vst [vmem:[#allocation23_spill] sm:$0xff] %v6493_v36  ;;  %v6506_v40 = vsub.f32 %v6296_v34, %v6357_v3  ;;  %v4903_v34 = vld [vmem:[%s8095_s1 + $0x58] sm:$0xff]  }
 0x23f   :  { %4697 = vmatprep.subr.bf16.mxu0 %v4902_v46 }
 0x240   :  { %v1974_v52 = vadd.f32 %v1973_v47, %v1911_v5  ;;  %v1809_v42 = vadd.f32 %v1808_v50, %v6479_v25  ;;  %8204 = vst [vmem:[#allocation24_spill] sm:$0xff] %v6506_v40  ;;  %v6516_v5 = vsub.f32 %v6299_v14, %v6357_v3  ;;  %v1914_v50 = vmul.f32 %v6493_v36, %v6493_v36 }
 0x241   :  { %v6532_v14 = vsub.f32 %v6303_v20, %v6357_v3  ;;  %4698 = vmatpush3.bf16.msra.mxu0 %v4902_v46  ;;  %v4904_v20 = vld [vmem:[%s8095_s1 + $0x60] sm:$0xff]  }
 0x242   :  { %v1975_v43 = vadd.f32 %v1974_v52, %v1912_v21  ;;  %v1810_v12 = vadd.f32 %v1809_v42, %v6489_v19  ;;  %v1915_v42 = vmul.f32 %v6506_v40, %v6506_v40  ;;  %4699 = vmatprep.subr.bf16.mxu0 %v4903_v34 }
 0x243   :  { %8205 = vst [vmem:[#allocation25_spill] sm:$0xff] %v6532_v14 }
 0x244   :  { %v1976_v47 = vadd.f32 %v1975_v43, %v1913_v39  ;;  %v1811_v56 = vadd.f32 %v1810_v12, %v6511_v9  ;;  %v6542_v12 = vsub.f32 %v6308_v54, %v6357_v3  ;;  %v1916_v43 = vmul.f32 %v6516_v5, %v6516_v5 }
 0x245   :  { %v1917_v54 = vmul.f32 %v6532_v14, %v6532_v14  ;;  %4700 = vmatpush3.bf16.msra.mxu0 %v4903_v34  ;;  %v1921_v14 = vmul.f32 %v6366_v57, %v6366_v57 }
 0x246   :  { %v4677_v61 = vpop.f32.mrb[44].mxu1  ;;  %v1977_v36 = vadd.f32 %v1976_v47, %v1914_v50  ;;  %v1812_v13 = vadd.f32 %v1811_v56, %v6524_v32  ;;  %8206 = vst [vmem:[#allocation26_spill] sm:$0xff] %v6542_v12  ;;  %4701 = vmatprep.subr.bf16.mxu0 %v4904_v20 }
 0x247   :  { %v1686_v49 = vpop.f32.mrb[45].mxu1  ;;  %v6557_v40 = vadd.f32 %v4677_v61, %v6257_v31 }
 0x248   :  { %v4678_v22 = vpop.f32.mrb[46].mxu1  ;;  %v6528_v21 = vadd.f32 %v1686_v49, %v6257_v31  ;;  %v1978_v50 = vadd.f32 %v1977_v36, %v1915_v42  ;;  %v6562_v36 = vsub.f32 %v6315_v26, %v6357_v3 }
 0x249   :  { %v1689_v41 = vpop.f32.mrb[47].mxu1  ;;  %v6567_v42 = vadd.f32 %v4678_v22, %v6257_v31  ;;  %4702 = vmatpush3.bf16.msra.mxu0 %v4904_v20  ;;  %v4906_v20 = vld [vmem:[%s8095_s1 + $0x188] sm:$0xff]  }
 0x24a   :  { %v6538_v33 = vadd.f32 %v1689_v41, %v6257_v31  ;;  %v1813_v46 = vadd.f32 %v1812_v13, %v6528_v21  ;;  %v6552_v41 = vsub.f32 %v6312_v30, %v6357_v3  ;;  %v1979_v56 = vadd.f32 %v1978_v50, %v1916_v43  ;;  %8208 = vst [vmem:[#allocation28_spill] sm:$0xff] %v6562_v36 }
 0x24b   :  { %v1918_v13 = vmul.f32 %v6542_v12, %v6542_v12  ;;  %v1920_v22 = vmul.f32 %v6562_v36, %v6562_v36  ;;  %4501 = vmatprep.subr.bf16.mxu1 %v4906_v20  ;;  %v4911_v36 = vld [vmem:[%s8095_s1 + $0x198] sm:$0xff]  }
 0x24c   :  { %8207 = vst [vmem:[#allocation27_spill] sm:$0xff] %v6552_v41  ;;  %v1814_v35 = vadd.f32 %v1813_v46, %v6538_v33  ;;  %v1980_v30 = vadd.f32 %v1979_v56, %v1917_v54  ;;  %v1919_v34 = vmul.f32 %v6552_v41, %v6552_v41 }
 0x24e   :  { %v1815_v43 = vadd.f32 %v1814_v35, %v6557_v40  ;;  %v1981_v46 = vadd.f32 %v1980_v30, %v1918_v13  ;;  %v1922_v30 = vmul.f32 %v6371_v11, %v6371_v11 }
 0x250   :  { %v1816_v26 = vadd.f32 %v1815_v43, %v6567_v42  ;;  %v1982_v35 = vadd.f32 %v1981_v46, %v1919_v34  ;;  %v4907_v43 = vld [vmem:[%s8095_s1 + $0x148] sm:$0xff]  }
 0x251   :  { %4502 = vmatpush3.bf16.msra.mxu1 %v4907_v43 }
 0x252   :  { %v4681_v52 = vpop.f32.mrb[48].mxu1  ;;  %v1983_v41 = vadd.f32 %v1982_v35, %v1920_v22  ;;  %v1923_v35 = vmul.f32 %v6375_v7, %v6375_v7 }
 0x253   :  { %v1702_v39 = vpop.f32.mrb[49].mxu1  ;;  %v6585_v13 = vadd.f32 %v4681_v52, %v6257_v31 }
 0x254   :  { %v4682_v49 = vpop.f32.mrb[50].mxu1  ;;  %v6571_v61 = vadd.f32 %v1702_v39, %v6257_v31  ;;  %v1984_v34 = vadd.f32 %v1983_v41, %v1921_v14 }
 0x255   :  { %v1705_v47 = vpop.f32.mrb[51].mxu1  ;;  %v6597_v46 = vadd.f32 %v4682_v49, %v6257_v31  ;;  %v4908_v49 = vld [vmem:[%s8095_s1 + $0x190] sm:$0xff]  }
 0x256   :  { %v6577_v3 = vadd.f32 %v1705_v47, %v6257_v31  ;;  %v1817_v39 = vadd.f32 %v1816_v26, %v6571_v61  ;;  %4503 = vmatprep.subr.bf16.mxu1 %v4908_v49 }
 0x258   :  { %v1818_v47 = vadd.f32 %v1817_v39, %v6577_v3  ;;  %v1985_v39 = vadd.f32 %v1984_v34, %v1922_v30 }
 0x25a   :  { %v4685_v50 = vpop.f32.mrb[52].mxu1  ;;  %v1819_v52 = vadd.f32 %v1818_v47, %v6585_v13  ;;  %v1924_v47 = vmul.f32 %v6379_v4, %v6379_v4  ;;  %v1986_v20 = vadd.f32 %v1985_v39, %v1923_v35  ;;  %v1926_v35 = vmul.f32 %v6386_v45, %v6386_v45  ;;  %v4915_v4 = vld [vmem:[%s8095_s1 + $0x1a8] sm:$0xff]  }
 0x25b   :  { %v1718_v12 = vpop.f32.mrb[53].mxu1 }
 0x25c   :  { %v4686_v54 = vpop.f32.mrb[54].mxu1  ;;  %v6601_v26 = vadd.f32 %v1718_v12, %v6257_v31  ;;  %v1820_v11 = vadd.f32 %v1819_v52, %v6597_v46  ;;  %v4909_v12 = vld [vmem:[%s8095_s1 + $0x150] sm:$0xff]   ;;  %v1987_v34 = vadd.f32 %v1986_v20, %v1924_v47  ;;  %v6621_v52 = vadd.f32 %v4685_v50, %v6257_v31 }
 0x25d   :  { %v1721_v56 = vpop.f32.mrb[55].mxu1  ;;  %4504 = vmatpush3.bf16.msra.mxu1 %v4909_v12  ;;  %v6633_v49 = vadd.f32 %v4686_v54, %v6257_v31  ;;  %v1927_v20 = vmul.f32 %v6389_v37, %v6389_v37 }
 0x25e   :  { %v6607_v57 = vadd.f32 %v1721_v56, %v6257_v31  ;;  %v1821_v30 = vadd.f32 %v1820_v11, %v6601_v26  ;;  %v1925_v56 = vmul.f32 %v6383_v15, %v6383_v15  ;;  %v4912_v11 = vld [vmem:[%s8095_s1 + $0x158] sm:$0xff]   ;;  %4505 = vmatprep.subr.bf16.mxu1 %v4911_v36  ;;  %v4914_v36 = vld [vmem:[%s8095_s1 + $0x160] sm:$0xff]  }
 0x260   :  { %v1822_v7 = vadd.f32 %v1821_v30, %v6607_v57  ;;  %v1988_v39 = vadd.f32 %v1987_v34, %v1925_v56 }
 0x261   :  { %4506 = vmatpush3.bf16.msra.mxu1 %v4912_v11 }
 0x262   :  { %v4689_v22 = vpop.f32.mrb[56].mxu1  ;;  %v1823_v50 = vadd.f32 %v1822_v7, %v6621_v52  ;;  %v1989_v30 = vadd.f32 %v1988_v39, %v1926_v35  ;;  %v4913_v7 = vld [vmem:[%s8095_s1 + $0x1a0] sm:$0xff]  }
 0x263   :  { %v1734_v14 = vpop.f32.mrb[57].mxu1  ;;  %4507 = vmatprep.subr.bf16.mxu1 %v4913_v7 }
 0x264   :  { %v4690_v41 = vpop.f32.mrb[58].mxu1  ;;  %v6637_v12 = vadd.f32 %v1734_v14, %v6257_v31  ;;  %v1824_v45 = vadd.f32 %v1823_v50, %v6633_v49  ;;  %v1928_v14 = vmul.f32 %v6392_v1, %v6392_v1  ;;  %v1990_v34 = vadd.f32 %v1989_v30, %v1927_v20 }
 0x265   :  { %v1737_v43 = vpop.f32.mrb[59].mxu1  ;;  %4508 = vmatpush3.bf16.msra.mxu1 %v4914_v36  ;;  %v6657_v50 = vadd.f32 %v4689_v22, %v6257_v31  ;;  %v1930_v20 = vmul.f32 %v6398_v63, %v6398_v63  ;;  %v6669_v7 = vadd.f32 %v4690_v41, %v6257_v31  ;;  %v4917_v41 = vld [vmem:[%s8095_s1 + $0x1b0] sm:$0xff]  }
 0x266   :  { %v6643_v15 = vadd.f32 %v1737_v43, %v6257_v31  ;;  %v1825_v35 = vadd.f32 %v1824_v45, %v6637_v12  ;;  %v1929_v43 = vmul.f32 %v6395_v62, %v6395_v62  ;;  %v1991_v39 = vadd.f32 %v1990_v34, %v1928_v14  ;;  %v4916_v45 = vld [vmem:[%s8095_s1 + $0x168] sm:$0xff]   ;;  %4509 = vmatprep.subr.bf16.mxu1 %v4915_v4 }
 0x267   :  { %v1931_v14 = vmul.f32 %v6401_v59, %v6401_v59  ;;  %v1932_v4 = vmul.f32 %v6404_v53, %v6404_v53 }
 0x268   :  { %v1826_v37 = vadd.f32 %v1825_v35, %v6643_v15  ;;  %v1992_v30 = vadd.f32 %v1991_v39, %v1929_v43 }
 0x269   :  { %4510 = vmatpush3.bf16.msra.mxu1 %v4916_v45 }
 0x26a   :  { %v4693_v47 = vpop.f32.mrb[60].mxu1  ;;  %v1827_v22 = vadd.f32 %v1826_v37, %v6657_v50  ;;  %v1993_v34 = vadd.f32 %v1992_v30, %v1930_v20  ;;  %v4918_v37 = vld [vmem:[%s8095_s1 + $0x170] sm:$0xff]   ;;  %4511 = vmatprep.subr.bf16.mxu1 %v4917_v41  ;;  %v4921_v41 = vld [vmem:[%s8095_s1 + $0x178] sm:$0xff]  }
 0x26b   :  { %v1750_v56 = vpop.f32.mrb[61].mxu1  ;;  %v6693_v30 = vadd.f32 %v4693_v47, %v6257_v31 }
 0x26c   :  { %v4694_v54 = vpop.f32.mrb[62].mxu1  ;;  %v6673_v36 = vadd.f32 %v1750_v56, %v6257_v31  ;;  %v1828_v35 = vadd.f32 %v1827_v22, %v6669_v7  ;;  %v1994_v56 = vadd.f32 %v1993_v34, %v1931_v14  ;;  %v4920_v14 = vld [vmem:[%s8095_s1 + $0x1b8] sm:$0xff]   ;;  %v1934_v34 = vmul.f32 %v6410_v48, %v6410_v48  ;;  %v4922_v48 = vld [vmem:[%s8095_s1 + $0x1c0] sm:$0xff]  }
 0x26d   :  { %v1753_v11 = vpop.f32.mrb[63].mxu1  ;;  %4512 = vmatpush3.bf16.msra.mxu1 %v4918_v37  ;;  %v6707_v47 = vadd.f32 %v4694_v54, %v6257_v31 }
 0x26e   :  { %v6679_v63 = vadd.f32 %v1753_v11, %v6257_v31  ;;  %v1829_v43 = vadd.f32 %v1828_v35, %v6673_v36  ;;  %v1933_v11 = vmul.f32 %v6407_v10, %v6407_v10  ;;  %v1995_v45 = vadd.f32 %v1994_v56, %v1932_v4  ;;  %4513 = vmatprep.subr.bf16.mxu1 %v4920_v14  ;;  %v4923_v31 = vld [vmem:[%s8095_s1 + $0x180] sm:$0xff]  }
 0x26f   :  { %v1937_v14 = vmul.f32 %v6419_v16, %v6419_v16 }
 0x270   :  { %v1830_v22 = vadd.f32 %v1829_v43, %v6679_v63  ;;  %v1996_v37 = vadd.f32 %v1995_v45, %v1933_v11  ;;  %v1935_v43 = vmul.f32 %v6413_v27, %v6413_v27 }
 0x271   :  { %4514 = vmatpush3.bf16.msra.mxu1 %v4921_v41 }
 0x272   :  { %v1831_v4 = vadd.f32 %v1830_v22, %v6693_v30  ;;  %4515 = vmatprep.subr.bf16.mxu1 %v4922_v48 }
 0x275   :  { %4516 = vmatpush3.bf16.msra.mxu1 %v4923_v31 }
 0x276   :  { %v4479_v39 = vpop.f32.mrb[64].mxu1 }
 0x277   :  { %v4480_v20 = vpop.f32.mrb[65].mxu1 }
 0x278   :  { %v6696_v59 = vadd.f32 %v4480_v20, %v4479_v39  ;;  %v4482_v62 = vpop.f32.mrb[66].mxu1  ;;  %v1997_v39 = vadd.f32 %v1996_v37, %v1934_v34  ;;  %v1832_v20 = vadd.f32 %v1831_v4, %v6707_v47  ;;  %v6730_v4 = vld [vmem:[%s8095_s1 + $0x1c8] sm:$0xff]  }
 0x279   :  { %v4483_v35 = vpop.f32.mrb[67].mxu1  ;;  %4795 = vmatprep.subr.bf16.mxu1 %v6730_v4 }
 0x27a   :  { %v6710_v56 = vadd.f32 %v4483_v35, %v4482_v62  ;;  %v1936_v62 = vmul.f32 %v6416_v18, %v6416_v18  ;;  %v1998_v54 = vadd.f32 %v1997_v39, %v1935_v43  ;;  %v1833_v11 = vrot.slane %v1832_v20, 4 }
 0x27c   :  { %v1999_v34 = vadd.f32 %v1998_v54, %v1936_v62  ;;  %v1834_v35 = vadd.f32 %v1833_v11, %v1832_v20  ;;  %v4905_v20 = vld [vmem:[%s8095_s1 + $0x68] sm:$0xff]  }
 0x27d   :  { %4703 = vmatprep.subr.bf16.mxu0 %v4905_v20 }
 0x27e   :  { %v4485_v45 = vpop.f32.mrb[68].mxu1  ;;  %v2000_v43 = vadd.f32 %v1999_v34, %v1937_v14  ;;  %v1835_v39 = vrot.slane %v1834_v35, 2  ;;  %4704 = vmatpush3.bf16.msra.mxu0 %v4905_v20 }
 0x27f   :  { %v4486_v22 = vpop.f32.mrb[69].mxu1 }
 0x280   :  { %v6725_v41 = vadd.f32 %v4486_v22, %v4485_v45  ;;  %v4488_v37 = vpop.f32.mrb[70].mxu1  ;;  %v2001_v48 = vrot.slane %v2000_v43, 4  ;;  %v1836_v31 = vadd.f32 %v1835_v39, %v1834_v35 }
 0x281   :  { %v4489_v18 = vpop.f32.mrb[71].mxu1 }
 0x282   :  { %v6732_v10 = vadd.f32 %v4489_v18, %v4488_v37  ;;  %v2002_v16 = vadd.f32 %v2001_v48, %v2000_v43  ;;  %v1837_v62 = vrot.slane %v1836_v31, 1  ;;  %v4910_v18 = vld [vmem:[%s8095_s1 + $0x70] sm:$0xff]  }
 0x283   :  { %4705 = vmatprep.subr.bf16.mxu0 %v4910_v18 }
 0x284   :  { %v2003_v54 = vrot.slane %v2002_v16, 2  ;;  %v1838_v11 = vadd.f32 %v1837_v62, %v1836_v31  ;;  %4706 = vmatpush3.bf16.msra.mxu0 %v4910_v18 }
 0x286   :  { %v2004_v45 = vadd.f32 %v2003_v54, %v2002_v16  ;;  %v6738_v22 = vmul.f32 0.00390625, %v1838_v11  ;;  %v3382_v16 = vsub.s32 5, %v8173_v38 }
 0x288   :  { %v2005_v14 = vrot.slane %v2004_v45, 1  ;;  %v6745_v35 = vsub.f32 %v6479_v25, %v6738_v22  ;;  %v6749_v37 = vsub.f32 %v6489_v19, %v6738_v22  ;;  %v6754_v43 = vsub.f32 %v6511_v9, %v6738_v22  ;;  %v4919_v19 = vld [vmem:[%s8095_s1 + $0x78] sm:$0xff]  }
 0x289   :  { %v6758_v39 = vsub.f32 %v6524_v32, %v6738_v22  ;;  %v6762_v48 = vsub.f32 %v6528_v21, %v6738_v22  ;;  %v6766_v25 = vsub.f32 %v6538_v33, %v6738_v22  ;;  %v6773_v9 = vsub.f32 %v6557_v40, %v6738_v22  ;;  %4707 = vmatprep.subr.bf16.mxu0 %v4919_v19 }
 0x28a   :  { %v2006_v34 = vadd.f32 %v2005_v14, %v2004_v45  ;;  %8209 = vst [vmem:[#allocation29_spill] sm:$0xff] %v6745_v35  ;;  %8210 = vst [vmem:[#allocation30_spill] sm:$0xff] %v6749_v37  ;;  %v6777_v32 = vsub.f32 %v6567_v42, %v6738_v22  ;;  %v6781_v21 = vsub.f32 %v6571_v61, %v6738_v22  ;;  %4708 = vmatpush3.bf16.msra.mxu0 %v4919_v19 }
 0x28b   :  { %8211 = vst [vmem:[#allocation31_spill] sm:$0xff] %v6754_v43  ;;  %8212 = vst [vmem:[#allocation32_spill] sm:$0xff] %v6758_v39  ;;  %v6785_v33 = vsub.f32 %v6577_v3, %v6738_v22  ;;  %v6789_v62 = vsub.f32 %v6585_v13, %v6738_v22  ;;  %v6793_v40 = vsub.f32 %v6597_v46, %v6738_v22  ;;  %v2184_v14 = vsub.s32 3, %v8173_v38 }
 0x28c   :  { %8213 = vst [vmem:[#allocation33_spill] sm:$0xff] %v6762_v48  ;;  %8214 = vst [vmem:[#allocation34_spill] sm:$0xff] %v6766_v25  ;;  %v2044_v31 = vmul.f32 0.00390625, %v2006_v34  ;;  %v6797_v42 = vsub.f32 %v6601_v26, %v6738_v22  ;;  %v6801_v61 = vsub.f32 %v6607_v57, %v6738_v22  ;;  %v6805_v3 = vsub.f32 %v6621_v52, %v6738_v22 }
 0x28d   :  { %8215 = vst [vmem:[#allocation35_spill] sm:$0xff] %v6773_v9  ;;  %8216 = vst [vmem:[#allocation36_spill] sm:$0xff] %v6777_v32  ;;  %v6809_v13 = vsub.f32 %v6633_v49, %v6738_v22  ;;  %v6813_v46 = vsub.f32 %v6637_v12, %v6738_v22  ;;  %v6817_v26 = vsub.f32 %v6643_v15, %v6738_v22  ;;  %v4926_v49 = vld [vmem:[%s8095_s1 + $0x80] sm:$0xff]  }
 0x28e   :  { %8217 = vst [vmem:[#allocation37_spill] sm:$0xff] %v6781_v21  ;;  %8218 = vst [vmem:[#allocation38_spill] sm:$0xff] %v6785_v33  ;;  %v2046_v20 = vadd.f32 1e-05, %v2044_v31  ;;  %v6821_v57 = vsub.f32 %v6657_v50, %v6738_v22  ;;  %v6825_v52 = vsub.f32 %v6669_v7, %v6738_v22  ;;  %v6832_v12 = vsub.f32 %v6673_v36, %v6738_v22 }
 0x28f   :  { %8219 = vst [vmem:[#allocation39_spill] sm:$0xff] %v6789_v62  ;;  %8220 = vst [vmem:[#allocation40_spill] sm:$0xff] %v6793_v40  ;;  %v6836_v15 = vsub.f32 %v6679_v63, %v6738_v22  ;;  %v6840_v50 = vsub.f32 %v6693_v30, %v6738_v22  ;;  %v6844_v7 = vsub.f32 %v6707_v47, %v6738_v22  ;;  %4709 = vmatprep.subr.bf16.mxu0 %v4926_v49 }
 0x290   :  { %8221 = vst [vmem:[#allocation41_spill] sm:$0xff] %v6797_v42  ;;  %8222 = vst [vmem:[#allocation42_spill] sm:$0xff] %v6801_v61  ;;  %5069 = vrsqrt.f32 %v2046_v20  ;;  %4710 = vmatpush3.bf16.msra.mxu0 %v4926_v49  ;;  %v3383_v11 = vrot.slane %v6254_v58, %v3382_v16  ;;  %v2116_v63 = vsub.s32 2, %v8173_v38  ;;  %v6853_v47 = vsub.f32 %v6355_v60, %v6738_v22 }
 0x291   :  { %8223 = vst [vmem:[#allocation43_spill] sm:$0xff] %v6805_v3  ;;  %8224 = vst [vmem:[#allocation44_spill] sm:$0xff] %v6809_v13  ;;  %v6857_v19 = vsub.f32 %v6352_v51, %v6738_v22  ;;  %v6863_v20 = vsub.f32 %v6362_v55, %v6738_v22  ;;  %v6875_v51 = vsub.f32 %v6442_v24, %v6738_v22 }
 0x292   :  { %8225 = vst [vmem:[#allocation45_spill] sm:$0xff] %v6813_v46  ;;  %8226 = vst [vmem:[#allocation46_spill] sm:$0xff] %v6817_v26  ;;  %v3571_v30 = vadd.f32 %v6725_v41, %v3383_v11  ;;  %v3563_v34 = vadd.f32 %v6696_v59, %v3383_v11  ;;  %v3574_v16 = vadd.f32 %v6732_v10, %v3383_v11 }
 0x293   :  { %8227 = vst [vmem:[#allocation47_spill] sm:$0xff] %v6821_v57  ;;  %8228 = vst [vmem:[#allocation48_spill] sm:$0xff] %v6825_v52  ;;  %v3566_v31 = vadd.f32 %v6710_v56, %v3383_v11  ;;  %v6867_v41 = vsub.f32 %v6430_v17, %v6738_v22  ;;  %v6879_v10 = vsub.f32 %v6456_v44, %v6738_v22 }
 0x294   :  { %8229 = vst [vmem:[#allocation49_spill] sm:$0xff] %v6832_v12  ;;  %8230 = vst [vmem:[#allocation50_spill] sm:$0xff] %v6836_v15  ;;  %v6889_v17 = vsub.f32 %v6459_v23, %v6738_v22  ;;  %v6896_v24 = vrot.slane %v6254_v58, %v2116_v63  ;;  %v6899_v44 = vrot.slane %v6254_v58, %v2184_v14  ;;  %v8271_v15 = vld [vmem:[#allocation10_spill] sm:$0xff] }
 0x295   :  { %8231 = vst [vmem:[#allocation51_spill] sm:$0xff] %v6840_v50  ;;  %8232 = vst [vmem:[#allocation52_spill] sm:$0xff] %v6844_v7  ;;  %v1938_v11 = vmul.f32 %v6853_v47, %v6853_v47  ;;  %v6907_v23 = vmul.f32 %v6863_v20, %v6863_v20  ;;  %v6917_v58 = vmul.f32 %v6875_v51, %v6875_v51  ;;  %v8266_v7 = vld [vmem:[#allocation28_spill] sm:$0xff] }
 0x296   :  { %v4793_v54 = vpop.f32.mrb[72].mxu1  ;;  %8233 = vst [vmem:[#allocation53_spill] sm:$0xff] %v6853_v47  ;;  %8234 = vst [vmem:[#allocation54_spill] sm:$0xff] %v6857_v19  ;;  %v6937_v14 = vmul.f32 %v6749_v37, %v6749_v37  ;;  %v6957_v37 = vmul.f32 %v6773_v9, %v6773_v9  ;;  %v6978_v9 = vmul.f32 %v6793_v40, %v6793_v40  ;;  %v8265_v47 = vld [vmem:[#allocation27_spill] sm:$0xff]  ;;  %v8269_v50 = vld [vmem:[#allocation8_spill] sm:$0xff] }
 0x297   :  { %v3611_v36 = vpop.f32.mrb[73].mxu1  ;;  %8235 = vst [vmem:[#allocation55_spill] sm:$0xff] %v6863_v20  ;;  %8236 = vst [vmem:[#allocation56_spill] sm:$0xff] %v6867_v41  ;;  %v6869_v59 = vadd.f32 %v4793_v54, %v3571_v30  ;;  %v6893_v54 = vsub.f32 %v6473_v29, %v6738_v22  ;;  %v6913_v22 = vmul.f32 %v6867_v41, %v6867_v41  ;;  %v8263_v20 = vld [vmem:[#allocation25_spill] sm:$0xff] }
 0x298   :  { %v4794_v45 = vpop.f32.mrb[74].mxu1  ;;  %v6871_v60 = vadd.f32 %v3611_v36, %v3563_v34  ;;  %8237 = vst [vmem:[#allocation57_spill] sm:$0xff] %v6875_v51  ;;  %8238 = vst [vmem:[#allocation58_spill] sm:$0xff] %v6879_v10  ;;  %v1939_v36 = vmul.f32 %v6857_v19, %v6857_v19  ;;  %v6941_v30 = vmul.f32 %v6754_v43, %v6754_v43  ;;  %v8260_v51 = vld [vmem:[#allocation22_spill] sm:$0xff] }
 0x299   :  { %v3614_v18 = vpop.f32.mrb[75].mxu1  ;;  %v6881_v56 = vadd.f32 %v4794_v45, %v3574_v16  ;;  %8239 = vst [vmem:[#allocation59_spill] sm:$0xff] %v6889_v17  ;;  %8240 = vst [vmem:[#allocation60_spill] sm:$0xff] %v6893_v54  ;;  %v6921_v45 = vmul.f32 %v6879_v10, %v6879_v10  ;;  %v6929_v63 = vmul.f32 %v6893_v54, %v6893_v54  ;;  %v8259_v10 = vld [vmem:[#allocation21_spill] sm:$0xff]  ;;  %v8264_v19 = vld [vmem:[#allocation26_spill] sm:$0xff] }
 0x29a   :  { %v6883_v55 = vadd.f32 %v3614_v18, %v3566_v31  ;;  %v6885_v49 = vpop.eup %5069  ;;  %8241 = vst [vmem:[#allocation61_spill] sm:$0xff] %v6896_v24  ;;  %v6925_v18 = vmul.f32 %v6889_v17, %v6889_v17  ;;  %v6945_v34 = vmul.f32 %v6758_v39, %v6758_v39  ;;  %v6949_v16 = vmul.f32 %v6762_v48, %v6762_v48  ;;  %v8258_v17 = vld [vmem:[#allocation20_spill] sm:$0xff] }
 0x29b   :  { %v2079_v29 = vmul.f32 %v6885_v49, %v6413_v27  ;;  %v6933_v27 = vmul.f32 %v6745_v35, %v6745_v35  ;;  %v6953_v31 = vmul.f32 %v6766_v25, %v6766_v25  ;;  %8242 = vst [vmem:[#allocation62_spill] sm:$0xff] %v6957_v37  ;;  %v6961_v43 = vmul.f32 %v6777_v32, %v6777_v32 }
 0x29c   :  { %v6965_v39 = vmul.f32 %v6781_v21, %v6781_v21  ;;  %v6969_v48 = vmul.f32 %v6785_v33, %v6785_v33  ;;  %v6974_v25 = vmul.f32 %v6789_v62, %v6789_v62  ;;  %8247 = vst [vmem:[#allocation67_spill] sm:$0xff] %v6978_v9  ;;  %v6982_v32 = vmul.f32 %v6797_v42, %v6797_v42  ;;  %v8279_v9 = vld [vmem:[#allocation18_spill] sm:$0xff] }
 0x29d   :  { %8243 = vst [vmem:[#allocation63_spill] sm:$0xff] %v6961_v43  ;;  %v2147_v35 = vmul.f32 %v6896_v24, %v2079_v29  ;;  %v6986_v21 = vmul.f32 %v6801_v61, %v6801_v61  ;;  %v6990_v33 = vmul.f32 %v6805_v3, %v6805_v3  ;;  %v6994_v29 = vmul.f32 %v6809_v13, %v6809_v13 }
 0x29e   :  { %8244 = vst [vmem:[#allocation64_spill] sm:$0xff] %v6965_v39  ;;  %8245 = vst [vmem:[#allocation65_spill] sm:$0xff] %v6969_v48  ;;  %v6998_v40 = vmul.f32 %v6813_v46, %v6813_v46  ;;  %v7002_v42 = vmul.f32 %v6817_v26, %v6817_v26  ;;  %v7006_v61 = vmul.f32 %v6821_v57, %v6821_v57 }
 0x29f   :  { %8246 = vst [vmem:[#allocation66_spill] sm:$0xff] %v6974_v25  ;;  %8248 = vst [vmem:[#allocation68_spill] sm:$0xff] %v6982_v32  ;;  %v7010_v3 = vmul.f32 %v6825_v52, %v6825_v52  ;;  %v7014_v13 = vmul.f32 %v6832_v12, %v6832_v12  ;;  %v2050_v46 = vmul.f32 %v6885_v49, %v6423_v8  ;;  %v8278_v32 = vld [vmem:[#allocation17_spill] sm:$0xff]  ;;  %v8280_v25 = vld [vmem:[#allocation19_spill] sm:$0xff] }
 0x2a0   :  { %8249 = vst [vmem:[#allocation69_spill] sm:$0xff] %v6986_v21  ;;  %8250 = vst [vmem:[#allocation70_spill] sm:$0xff] %v6990_v33  ;;  %v2051_v62 = vmul.f32 %v6885_v49, %v6427_v2  ;;  %v2052_v26 = vmul.f32 %v6885_v49, %v6435_v28  ;;  %v7022_v54 = vadd.f32 %v1939_v36, %v1938_v11  ;;  %v8261_v11 = vld [vmem:[#allocation23_spill] sm:$0xff]  ;;  %v8275_v33 = vld [vmem:[#allocation14_spill] sm:$0xff] }
 0x2a1   :  { %8251 = vst [vmem:[#allocation71_spill] sm:$0xff] %v6994_v29  ;;  %8252 = vst [vmem:[#allocation72_spill] sm:$0xff] %v6998_v40  ;;  %v7025_v57 = vadd.f32 %v6899_v44, %v2147_v35  ;;  %v2053_v52 = vmul.f32 %v6885_v49, %v6446_v0  ;;  %v2054_v12 = vmul.f32 %v6885_v49, %v6450_v6  ;;  %v8262_v35 = vld [vmem:[#allocation24_spill] sm:$0xff]  ;;  %v8274_v29 = vld [vmem:[#allocation13_spill] sm:$0xff] }
 0x2a2   :  { %8253 = vst [vmem:[#allocation73_spill] sm:$0xff] %v7002_v42  ;;  %8254 = vst [vmem:[#allocation74_spill] sm:$0xff] %v7006_v61  ;;  %v2055_v8 = vmul.f32 %v6885_v49, %v8258_v17  ;;  %v2056_v2 = vmul.f32 %v6885_v49, %v8259_v10  ;;  %v2057_v28 = vmul.f32 %v6885_v49, %v8260_v51  ;;  %v8270_v61 = vld [vmem:[#allocation9_spill] sm:$0xff]  ;;  %v8272_v42 = vld [vmem:[#allocation11_spill] sm:$0xff] }
 0x2a3   :  { %8255 = vst [vmem:[#allocation75_spill] sm:$0xff] %v7010_v3  ;;  %8256 = vst [vmem:[#allocation76_spill] sm:$0xff] %v7014_v13  ;;  %v2058_v36 = vmul.f32 %v6885_v49, %v8261_v11  ;;  %v2059_v41 = vmul.f32 %v6885_v49, %v8262_v35  ;;  %v2060_v0 = vmul.f32 %v6885_v49, %v6516_v5  ;;  %v8267_v13 = vld [vmem:[#allocation6_spill] sm:$0xff]  ;;  %v8268_v3 = vld [vmem:[#allocation7_spill] sm:$0xff] }
 0x2a4   :  { %8257 = vst [vmem:[#allocation77_spill] sm:$0xff] %v7025_v57  ;;  %v2061_v6 = vmul.f32 %v6885_v49, %v8263_v20  ;;  %v2062_v17 = vmul.f32 %v6885_v49, %v8264_v19  ;;  %v2063_v10 = vmul.f32 %v6885_v49, %v8265_v47  ;;  %v2064_v51 = vmul.f32 %v6885_v49, %v8266_v7  ;;  %v8273_v40 = vld [vmem:[#allocation12_spill] sm:$0xff]  ;;  %v8276_v57 = vld [vmem:[#allocation15_spill] sm:$0xff] }
 0x2a5   :  { %v2065_v11 = vmul.f32 %v6885_v49, %v8267_v13  ;;  %v2066_v35 = vmul.f32 %v6885_v49, %v8268_v3  ;;  %v2067_v5 = vmul.f32 %v6885_v49, %v8269_v50  ;;  %v2068_v19 = vmul.f32 %v6885_v49, %v8270_v61  ;;  %v8277_v21 = vld [vmem:[#allocation16_spill] sm:$0xff] }
 0x2a6   :  { %v2069_v47 = vmul.f32 %v6885_v49, %v8271_v15  ;;  %v2070_v7 = vmul.f32 %v6885_v49, %v8272_v42  ;;  %v2071_v13 = vmul.f32 %v6885_v49, %v8273_v40  ;;  %v2072_v3 = vmul.f32 %v6885_v49, %v6392_v1 }
 0x2a7   :  { %v2073_v50 = vmul.f32 %v6885_v49, %v8274_v29  ;;  %v2074_v20 = vmul.f32 %v6885_v49, %v8275_v33  ;;  %v2075_v61 = vmul.f32 %v6885_v49, %v8276_v57  ;;  %v2076_v15 = vmul.f32 %v6885_v49, %v6404_v53 }
 0x2a8   :  { %v2077_v42 = vmul.f32 %v6885_v49, %v8277_v21  ;;  %v2078_v40 = vmul.f32 %v6885_v49, %v8278_v32  ;;  %v2080_v1 = vmul.f32 %v6885_v49, %v8279_v9  ;;  %v7084_v29 = vmul.f32 %v6885_v49, %v8280_v25 }
 0x2a9   :  { %v2118_v33 = vmul.f32 %v6896_v24, %v2050_v46  ;;  %v2119_v57 = vmul.f32 %v6896_v24, %v2051_v62  ;;  %v2120_v48 = vmul.f32 %v6896_v24, %v2052_v26  ;;  %v2121_v53 = vmul.f32 %v6896_v24, %v2053_v52 }
 0x2aa   :  { %8281 = vst [vmem:[#allocation20_spill] sm:$0xff] %v7084_v29  ;;  %v2122_v21 = vmul.f32 %v6896_v24, %v2054_v12  ;;  %v2123_v39 = vmul.f32 %v6896_v24, %v2055_v8  ;;  %v2124_v32 = vmul.f32 %v6896_v24, %v2056_v2  ;;  %v2125_v9 = vmul.f32 %v6896_v24, %v2057_v28 }
 0x2ab   :  { %v2126_v43 = vmul.f32 %v6896_v24, %v2058_v36  ;;  %v2127_v25 = vmul.f32 %v6896_v24, %v2059_v41  ;;  %v2128_v46 = vmul.f32 %v6896_v24, %v2060_v0  ;;  %v2129_v62 = vmul.f32 %v6896_v24, %v2061_v6 }
 0x2ac   :  { %v2130_v26 = vmul.f32 %v6896_v24, %v2062_v17  ;;  %v2131_v52 = vmul.f32 %v6896_v24, %v2063_v10  ;;  %v2132_v12 = vmul.f32 %v6896_v24, %v2064_v51  ;;  %v2133_v49 = vmul.f32 %v6896_v24, %v2065_v11 }
 0x2ad   :  { %v2134_v8 = vmul.f32 %v6896_v24, %v2066_v35  ;;  %v2135_v2 = vmul.f32 %v6896_v24, %v2067_v5  ;;  %v2136_v28 = vmul.f32 %v6896_v24, %v2068_v19  ;;  %v7106_v41 = vmul.f32 %v6896_v24, %v2069_v47 }
 0x2ae   :  { %v7109_v36 = vmul.f32 %v6896_v24, %v2070_v7  ;;  %v7112_v0 = vmul.f32 %v6896_v24, %v2071_v13  ;;  %v7115_v6 = vmul.f32 %v6896_v24, %v2072_v3  ;;  %v7118_v17 = vmul.f32 %v6896_v24, %v2073_v50 }
 0x2af   :  { %v7121_v10 = vadd.f32 %v6899_v44, %v2120_v48  ;;  %v7124_v51 = vadd.f32 %v6899_v44, %v2121_v53  ;;  %v7127_v11 = vmul.f32 %v6896_v24, %v2074_v20  ;;  %v7130_v35 = vmul.f32 %v6896_v24, %v2075_v61 }
 0x2b0   :  { %v7133_v5 = vmul.f32 %v6896_v24, %v2076_v15  ;;  %v7136_v19 = vmul.f32 %v6896_v24, %v2077_v42  ;;  %v7139_v47 = vmul.f32 %v6896_v24, %v2078_v40  ;;  %v7142_v48 = vmul.f32 %v6896_v24, %v2080_v1 }
 0x2b1   :  { %8282 = vst [vmem:[#allocation21_spill] sm:$0xff] %v7130_v35  ;;  %v7145_v7 = vadd.f32 %v6899_v44, %v2118_v33  ;;  %v7148_v20 = vadd.f32 %v6899_v44, %v2119_v57  ;;  %v7151_v13 = vadd.f32 %v6899_v44, %v2122_v21  ;;  %v7154_v3 = vadd.f32 %v6899_v44, %v2123_v39 }
 0x2b2   :  { %8283 = vst [vmem:[#allocation22_spill] sm:$0xff] %v7133_v5  ;;  %8284 = vst [vmem:[#allocation23_spill] sm:$0xff] %v7136_v19  ;;  %v7157_v50 = vadd.f32 %v6899_v44, %v2124_v32  ;;  %v7160_v61 = vadd.f32 %v6899_v44, %v2125_v9  ;;  %v7163_v15 = vadd.f32 %v6899_v44, %v2126_v43  ;;  %v2316_v40 = vmin.f32 %v7121_v10, 0.0 }
 0x2b3   :  { %8285 = vst [vmem:[#allocation24_spill] sm:$0xff] %v7139_v47  ;;  %8286 = vst [vmem:[#allocation25_spill] sm:$0xff] %v7142_v48  ;;  %v7166_v42 = vadd.f32 %v6899_v44, %v2127_v25  ;;  %v2317_v1 = vmin.f32 %v7124_v51, 0.0  ;;  %v7171_v33 = vadd.f32 %v6899_v44, %v2128_v46  ;;  %v7174_v39 = vadd.f32 %v6899_v44, %v2129_v62 }
 0x2b4   :  { %8287 = vst [vmem:[#allocation26_spill] sm:$0xff] %v7157_v50  ;;  %v7177_v57 = vadd.f32 %v6899_v44, %v2130_v26  ;;  %v7180_v53 = vadd.f32 %v6899_v44, %v2131_v52  ;;  %v7183_v43 = vadd.f32 %v6899_v44, %v2132_v12  ;;  %v7186_v21 = vadd.f32 %v6899_v44, %v2133_v49 }
 0x2b5   :  { %v7189_v32 = vadd.f32 %v6899_v44, %v2134_v8  ;;  %v7192_v9 = vadd.f32 %v6899_v44, %v2135_v2  ;;  %v7195_v25 = vadd.f32 %v6899_v44, %v2136_v28  ;;  %v2314_v46 = vmin.f32 %v7145_v7, 0.0 }
 0x2b6   :  { %v2315_v62 = vmin.f32 %v7148_v20, 0.0  ;;  %v2318_v26 = vmin.f32 %v7151_v13, 0.0  ;;  %v2319_v52 = vmin.f32 %v7154_v3, 0.0  ;;  %v2320_v12 = vmin.f32 %v7157_v50, 0.0 }
 0x2b7   :  { %v2382_v49 = vmul.f32 1.442695, %v2316_v40  ;;  %v2384_v48 = vmul.f32 1.442695, %v2317_v1  ;;  %v2008_v8 = vadd.f32 %v7022_v54, %v6907_v23  ;;  %v3628_v2 = vrot.slane %v6869_v59, 7 }
 0x2b8   :  { %v3640_v28 = vrot.slane %v6869_v59, 1  ;;  %v3626_v47 = vrot.slane %v6871_v60, 7  ;;  %v3638_v24 = vrot.slane %v6871_v60, 1  ;;  %v3629_v29 = vrot.slane %v6881_v56, 7 }
 0x2b9   :  { %5071 = vpow2.f32 %v2382_v49  ;;  %v3641_v19 = vrot.slane %v6881_v56, 1  ;;  %v2009_v40 = vadd.f32 %v2008_v8, %v6913_v22  ;;  %v3627_v1 = vrot.slane %v6883_v55, 7 }
 0x2ba   :  { %5073 = vpow2.f32 %v2384_v48  ;;  %v3639_v54 = vrot.slane %v6883_v55, 1  ;;  %v3633_v23 = vsel %vm3336_vm14, %v3629_v29, %v3626_v47  ;;  %v3651_v48 = vpack.c.bf16 %v6883_v55, %v6871_v60 }
 0x2bb   :  { %v7217_v5 = vsel %vm3357_vm15, %v3640_v28, %v3641_v19  ;;  %v7221_v49 = vsel %vm3357_vm15, %v3641_v19, %v3638_v24  ;;  %v2010_v22 = vadd.f32 %v2009_v40, %v6917_v58  ;;  %v3632_v35 = vsel %vm3336_vm14, %v3626_v47, %v3627_v1  ;;  %v4925_v19 = vld [vmem:[%s8095_s1 + $0x1d0] sm:$0xff]  }
 0x2bc   :  { %v3654_v50 = vpack.c.bf16 %v6881_v56, %v6869_v59  ;;  %v4324_v37 = vpack.c.bf16 %v3632_v35, %v3633_v23  ;;  %3836 = vmatprep.mubr.bf16.mxu1 %v3651_v48  ;;  %v3630_v60 = vsel %vm3336_vm14, %v3628_v2, %v3629_v29  ;;  %v3631_v55 = vsel %vm3336_vm14, %v3627_v1, %v3628_v2 }
 0x2bd   :  { %v3643_v58 = vsel %vm3357_vm15, %v3639_v54, %v3640_v28  ;;  %v2321_v47 = vmin.f32 %v7160_v61, 0.0  ;;  %v2011_v40 = vadd.f32 %v2010_v22, %v6921_v45  ;;  %v4328_v59 = vpack.c.bf16 %v3630_v60, %v3631_v55 }
 0x2be   :  { %v3644_v56 = vsel %vm3357_vm15, %v3638_v24, %v3639_v54  ;;  %v2322_v35 = vmin.f32 %v7163_v15, 0.0  ;;  %4325 = vmatmul.mubr.msk.bf16.vlgmr.msra.gmra.mrb[76].mxu1 %vm6190_vm2, %v4324_v37  ;;  %v2378_v48 = vmul.f32 1.442695, %v2314_v46  ;;  %v2380_v8 = vmul.f32 1.442695, %v2315_v62 }
 0x2bf   :  { %v4332_v29 = vpack.c.bf16 %v3643_v58, %v3644_v56  ;;  %v7250_v2 = vadd.f32 %v6899_v44, %v7106_v41  ;;  %v2323_v28 = vmin.f32 %v7166_v42, 0.0  ;;  %v2012_v45 = vadd.f32 %v2011_v40, %v6925_v18  ;;  %4796 = vmatpush3.bf16.msra.mxu1 %v6730_v4  ;;  %3844 = vmatprep.mubr.bf16.mxu1 %v3654_v50  ;;  %v4927_v41 = vld [vmem:[%s8095_s1 + $0x1d8] sm:$0xff]  }
 0x2c0   :  { %v2386_v24 = vmul.f32 1.442695, %v2318_v26  ;;  %v7257_v1 = vadd.f32 %v6899_v44, %v7109_v36  ;;  %v7261_v37 = vadd.f32 %v6899_v44, %v7112_v0  ;;  %4797 = vmatprep.subr.bf16.mxu1 %v4925_v19  ;;  %5075 = vpow2.f32 %v2378_v48 }
 0x2c1   :  { %v2388_v46 = vmul.f32 1.442695, %v2319_v52  ;;  %v2013_v18 = vadd.f32 %v2012_v45, %v6929_v63  ;;  %5077 = vpow2.f32 %v2380_v8  ;;  %v2390_v4 = vmul.f32 1.442695, %v2320_v12  ;;  %v4928_v8 = vld [vmem:[%s8095_s1 + $0x1e0] sm:$0xff]  }
 0x2c2   :  { %v2392_v50 = vmul.f32 1.442695, %v2321_v47  ;;  %v7269_v36 = vadd.f32 %v6899_v44, %v7115_v6  ;;  %v2324_v0 = vmin.f32 %v7171_v33, 0.0  ;;  %5079 = vpow2.f32 %v2386_v24 }
 0x2c3   :  { %v5072_v62 = vpop.eup %5071  ;;  %v2394_v26 = vmul.f32 1.442695, %v2322_v35  ;;  %v2325_v22 = vmin.f32 %v7174_v39, 0.0  ;;  %v2014_v60 = vadd.f32 %v2013_v18, %v6933_v27  ;;  %4798 = vmatpush3.bf16.msra.mxu1 %v4925_v19  ;;  %5081 = vpow2.f32 %v2388_v46 }
 0x2c4   :  { %v5074_v54 = vpop.eup %5073  ;;  %v2396_v63 = vmul.f32 1.442695, %v2323_v28  ;;  %v7276_v52 = vadd.f32 %v6899_v44, %v7118_v17  ;;  %v7280_v6 = vadd.f32 %v6899_v44, %v7127_v11  ;;  %v2326_v12 = vmin.f32 %v7177_v57, 0.0  ;;  %4799 = vmatprep.subr.bf16.mxu1 %v4927_v41 }
 0x2c5   :  { %5083 = vpow2.f32 %v2390_v4  ;;  %vm2252_vm11 = vcmp.gt.f32.partialorder %v7121_v10, 0.0  ;;  %v2327_v27 = vmin.f32 %v7180_v53, 0.0  ;;  %v2015_v19 = vadd.f32 %v2014_v60, %v6937_v14 }
 0x2c6   :  { %5085 = vpow2.f32 %v2392_v50  ;;  %vm2253_vm12 = vcmp.gt.f32.partialorder %v7124_v51, 0.0  ;;  %v4156_v17 = vadd.f32 -1.0, %v5072_v62  ;;  %4329 = vmatmul.mubr.msk.bf16.gmra.mrb[80].mxu1 %vm6214_vm5, %v4328_v59  ;;  %v2398_v55 = vmul.f32 1.442695, %v2324_v0  ;;  %v4929_v59 = vld [vmem:[%s8095_s1 + $0x1e8] sm:$0xff]   ;;  %v4930_v62 = vld [vmem:[%s8095_s1 + $0x1f0] sm:$0xff]  }
 0x2c7   :  { %5087 = vpow2.f32 %v2394_v26  ;;  %v4157_v58 = vadd.f32 -1.0, %v5074_v54  ;;  %v2016_v47 = vadd.f32 %v2015_v19, %v6941_v30  ;;  %4800 = vmatpush3.bf16.msra.mxu1 %v4927_v41  ;;  %4811 = vmatprep.mubr.msk.bf16.mxu1 %vm6219_vm6, %v4332_v29  ;;  %v2400_v56 = vmul.f32 1.442695, %v2325_v22 }
 0x2c8   :  { %5089 = vpow2.f32 %v2396_v63  ;;  %v2328_v14 = vmin.f32 %v7183_v43, 0.0  ;;  %v2329_v35 = vmin.f32 %v7186_v21, 0.0  ;;  %v2330_v23 = vmin.f32 %v7189_v32, 0.0  ;;  %4801 = vmatprep.subr.bf16.mxu1 %v4928_v8 }
 0x2c9   :  { %v2402_v48 = vmul.f32 1.442695, %v2326_v12  ;;  %v2331_v30 = vmin.f32 %v7192_v9, 0.0  ;;  %v2332_v28 = vmin.f32 %v7195_v25, 0.0  ;;  %v2017_v29 = vadd.f32 %v2016_v47, %v6945_v34 }
 0x2ca   :  { %v2404_v45 = vmul.f32 1.442695, %v2327_v27  ;;  %v5076_v24 = vpop.eup %5075  ;;  %vm2250_vm9 = vcmp.gt.f32.partialorder %v7145_v7, 0.0  ;;  %vm2251_vm10 = vcmp.gt.f32.partialorder %v7148_v20, 0.0  ;;  %v2572_v41 = vsel %vm2252_vm11, %v7121_v10, %v4156_v17  ;;  %v8291_v27 = vld [vmem:[#allocation62_spill] sm:$0xff] }
 0x2cb   :  { %5091 = vpow2.f32 %v2398_v55  ;;  %v5078_v46 = vpop.eup %5077  ;;  %v2018_v18 = vadd.f32 %v2017_v29, %v6949_v16  ;;  %4802 = vmatpush3.bf16.msra.mxu1 %v4928_v8  ;;  %v4154_v4 = vadd.f32 -1.0, %v5076_v24  ;;  %v2573_v34 = vsel %vm2253_vm12, %v7124_v51, %v4157_v58  ;;  %v4931_v58 = vld [vmem:[%s8095_s1 + $0x1f8] sm:$0xff]  }
 0x2cc   :  { %5093 = vpow2.f32 %v2400_v56  ;;  %v5080_v50 = vpop.eup %5079  ;;  %4803 = vmatprep.subr.bf16.mxu1 %v4929_v59  ;;  %v4155_v0 = vadd.f32 -1.0, %v5078_v46  ;;  %vm2254_vm13 = vcmp.gt.f32.partialorder %v7151_v13, 0.0  ;;  %vm2255_vm14 = vcmp.gt.f32.partialorder %v7154_v3, 0.0 }
 0x2cd   :  { %5095 = vpow2.f32 %v2402_v48  ;;  %v5082_v16 = vpop.eup %5081  ;;  %v2019_v10 = vadd.f32 %v2018_v18, %v6953_v31  ;;  %v2570_v51 = vsel %vm2250_vm9, %v7145_v7, %v4154_v4  ;;  %v4158_v26 = vadd.f32 -1.0, %v5080_v50  ;;  %v4932_v18 = vld [vmem:[%s8095_s1 + $0x200] sm:$0xff]  }
 0x2ce   :  { %5097 = vpow2.f32 %v2404_v45  ;;  %v2571_v22 = vsel %vm2251_vm10, %v7148_v20, %v4155_v0  ;;  %v2635_v60 = vpack.c.bf16 %v2573_v34, %v2572_v41  ;;  %v4159_v63 = vadd.f32 -1.0, %v5082_v16  ;;  %v8293_v41 = vld [vmem:[#allocation64_spill] sm:$0xff]  ;;  %v8295_v34 = vld [vmem:[#allocation65_spill] sm:$0xff] }
 0x2cf   :  { %v5084_v54 = vpop.eup %5083  ;;  %v2406_v12 = vmul.f32 1.442695, %v2328_v14  ;;  %v2020_v19 = vadd.f32 %v2019_v10, %v8291_v27  ;;  %4804 = vmatpush3.bf16.msra.mxu1 %v4929_v59  ;;  %v2634_v17 = vpack.c.bf16 %v2571_v22, %v2570_v51  ;;  %v2574_v31 = vsel %vm2254_vm13, %v7151_v13, %v4158_v26  ;;  %v8292_v14 = vld [vmem:[#allocation63_spill] sm:$0xff]  ;;  %v8296_v10 = vld [vmem:[#allocation21_spill] sm:$0xff] }
 0x2d0   :  { %v5086_v8 = vpop.eup %5085  ;;  %v2408_v7 = vmul.f32 1.442695, %v2329_v35  ;;  %v2333_v55 = vmin.f32 %v7250_v2, 0.0  ;;  %4805 = vmatprep.subr.bf16.mxu1 %v4930_v62  ;;  %v2575_v20 = vsel %vm2255_vm14, %v7154_v3, %v4159_v63  ;;  %v2410_v47 = vmul.f32 1.442695, %v2330_v23  ;;  %v8294_v23 = vld [vmem:[#allocation26_spill] sm:$0xff] }
 0x2d1   :  { %v5088_v11 = vpop.eup %5087  ;;  %v2412_v40 = vmul.f32 1.442695, %v2331_v30  ;;  %v2021_v59 = vadd.f32 %v2020_v19, %v8292_v14  ;;  %4711 = vmatprep.mubr.bf16.mxu0 %v2634_v17  ;;  %v2636_v13 = vpack.c.bf16 %v2575_v20, %v2574_v31  ;;  %v4160_v35 = vadd.f32 -1.0, %v5084_v54  ;;  %v8297_v63 = vld [vmem:[#allocation22_spill] sm:$0xff] }
 0x2d2   :  { %v5090_v56 = vpop.eup %5089  ;;  %v4161_v48 = vadd.f32 -1.0, %v5086_v8  ;;  %v2334_v29 = vmin.f32 %v7257_v1, 0.0  ;;  %4712 = vmatmul.mubr.bf16.vlgmr.msra.gmra.mrb[64].mxu0 %v2635_v60  ;;  %v4162_v45 = vadd.f32 -1.0, %v5088_v11  ;;  %5099 = vpow2.f32 %v2406_v12  ;;  %v8298_v8 = vld [vmem:[#allocation66_spill] sm:$0xff] }
 0x2d3   :  { %v4163_v24 = vadd.f32 -1.0, %v5090_v56  ;;  %v2335_v3 = vmin.f32 %v7261_v37, 0.0  ;;  %v2022_v46 = vadd.f32 %v2021_v59, %v8293_v41  ;;  %4806 = vmatpush3.bf16.msra.mxu1 %v4930_v62  ;;  %4715 = vmatprep.mubr.bf16.mxu0 %v2636_v13  ;;  %vm2256_vm15 = vcmp.gt.f32.partialorder %v8294_v23, 0.0  ;;  %v8302_v41 = vld [vmem:[#allocation23_spill] sm:$0xff] }
 0x2d4   :  { %5101 = vpow2.f32 %v2408_v7  ;;  %4807 = vmatprep.subr.bf16.mxu1 %v4931_v58  ;;  %vm2257_vm0 = vcmp.gt.f32.partialorder %v7160_v61, 0.0  ;;  %vm2258_vm1 = vcmp.gt.f32.partialorder %v7163_v15, 0.0  ;;  %vm2259_vm2 = vcmp.gt.f32.partialorder %v7166_v42, 0.0  ;;  %v8299_v7 = vld [vmem:[#allocation67_spill] sm:$0xff] }
 0x2d5   :  { %v5092_v30 = vpop.eup %5091  ;;  %5103 = vpow2.f32 %v2410_v47  ;;  %v2023_v50 = vadd.f32 %v2022_v46, %v8295_v34  ;;  %v2576_v62 = vsel %vm2256_vm15, %v8294_v23, %v4160_v35  ;;  %v2577_v0 = vsel %vm2257_vm0, %v7160_v61, %v4161_v48  ;;  %v8301_v48 = vld [vmem:[#allocation69_spill] sm:$0xff] }
 0x2d6   :  { %v5094_v4 = vpop.eup %5093  ;;  %5105 = vpow2.f32 %v2412_v40  ;;  %v7352_v51 = vadd.f32 %v6899_v44, %v8296_v10  ;;  %v2578_v26 = vsel %vm2258_vm1, %v7163_v15, %v4162_v45  ;;  %v2579_v54 = vsel %vm2259_vm2, %v7166_v42, %v4163_v24  ;;  %v8308_v10 = vld [vmem:[#allocation70_spill] sm:$0xff] }
 0x2d7   :  { %v5096_v16 = vpop.eup %5095  ;;  %v2414_v22 = vmul.f32 1.442695, %v2332_v28  ;;  %v7360_v12 = vadd.f32 %v6899_v44, %v8297_v63  ;;  %v2336_v61 = vmin.f32 %v7269_v36, 0.0  ;;  %v2024_v27 = vadd.f32 %v2023_v50, %v8298_v8  ;;  %4808 = vmatpush3.bf16.msra.mxu1 %v4931_v58  ;;  %v8305_v50 = vld [vmem:[#allocation20_spill] sm:$0xff] }
 0x2d8   :  { %v5098_v60 = vpop.eup %5097  ;;  %v2416_v19 = vmul.f32 1.442695, %v2333_v55  ;;  %v2337_v17 = vmin.f32 %v7276_v52, 0.0  ;;  %4809 = vmatprep.subr.bf16.mxu1 %v4932_v18  ;;  %v2637_v15 = vpack.c.bf16 %v2577_v0, %v2576_v62  ;;  %v4164_v31 = vadd.f32 -1.0, %v5092_v30  ;;  %v8300_v55 = vld [vmem:[#allocation68_spill] sm:$0xff] }
 0x2d9   :  { %v2418_v42 = vmul.f32 1.442695, %v2334_v29  ;;  %v2025_v11 = vadd.f32 %v2024_v27, %v8299_v7  ;;  %v2638_v28 = vpack.c.bf16 %v2579_v54, %v2578_v26  ;;  %v4165_v20 = vadd.f32 -1.0, %v5094_v4  ;;  %v8307_v0 = vld [vmem:[#allocation24_spill] sm:$0xff] }
 0x2da   :  { %v2420_v47 = vmul.f32 1.442695, %v2335_v3  ;;  %v2338_v40 = vmin.f32 %v7280_v6, 0.0  ;;  %4716 = vmatmul.mubr.bf16.gmra.mrb[68].mxu0 %v2637_v15  ;;  %v4166_v56 = vadd.f32 -1.0, %v5096_v16  ;;  %v4167_v14 = vadd.f32 -1.0, %v5098_v60 }
 0x2db   :  { %5107 = vpow2.f32 %v2414_v22  ;;  %v2339_v58 = vmin.f32 %v7352_v51, 0.0  ;;  %v2026_v59 = vadd.f32 %v2025_v11, %v8300_v55  ;;  %4810 = vmatpush3.bf16.msra.mxu1 %v4932_v18  ;;  %4719 = vmatprep.mubr.bf16.mxu0 %v2638_v28  ;;  %vm2260_vm3 = vcmp.gt.f32.partialorder %v7171_v33, 0.0  ;;  %v8311_v28 = vld [vmem:[#allocation73_spill] sm:$0xff] }
 0x2dc   :  { %5109 = vpow2.f32 %v2416_v19  ;;  %v5100_v13 = vpop.eup %5099  ;;  %vm2261_vm4 = vcmp.gt.f32.partialorder %v7174_v39, 0.0  ;;  %vm2262_vm5 = vcmp.gt.f32.partialorder %v7177_v57, 0.0  ;;  %vm2263_vm6 = vcmp.gt.f32.partialorder %v7180_v53, 0.0 }
 0x2dd   :  { %5111 = vpow2.f32 %v2418_v42  ;;  %v2027_v29 = vadd.f32 %v2026_v59, %v8301_v48  ;;  %v2580_v45 = vsel %vm2260_vm3, %v7171_v33, %v4164_v31  ;;  %v2581_v24 = vsel %vm2261_vm4, %v7174_v39, %v4165_v20  ;;  %v8306_v39 = vld [vmem:[#allocation61_spill] sm:$0xff]  ;;  %v8310_v42 = vld [vmem:[#allocation72_spill] sm:$0xff] }
 0x2de   :  { %v5102_v35 = vpop.eup %5101  ;;  %5113 = vpow2.f32 %v2420_v47  ;;  %v7378_v46 = vadd.f32 %v6899_v44, %v8302_v41  ;;  %v8303_v23 = vpack.c.bf16 %v7221_v49, %v7217_v5  ;;  %v2582_v18 = vsel %vm2262_vm5, %v7177_v57, %v4166_v56  ;;  %v8309_v57 = vld [vmem:[#allocation71_spill] sm:$0xff] }
 0x2df   :  { %v5104_v3 = vpop.eup %5103  ;;  %v2583_v4 = vsel %vm2263_vm6, %v7180_v53, %v4167_v14  ;;  %v2422_v34 = vmul.f32 1.442695, %v2336_v61  ;;  %v2149_v62 = vmul.f32 %v8306_v39, %v8305_v50  ;;  %v7391_v16 = vadd.f32 %v6899_v44, %v8307_v0  ;;  %v8312_v14 = vld [vmem:[#allocation25_spill] sm:$0xff] }
 0x2e0   :  { %4812 = vmatmul.mubr.msk.bf16.vlgmr.msra.gmra.mrb[84].mxu1 %vm6244_vm8, %v8303_v23  ;;  %v5106_v33 = vpop.eup %5105  ;;  %v2028_v26 = vadd.f32 %v2027_v29, %v8308_v10  ;;  %v2424_v54 = vmul.f32 1.442695, %v2337_v17  ;;  %v2340_v5 = vmin.f32 %v7360_v12, 0.0  ;;  %v2639_v49 = vpack.c.bf16 %v2581_v24, %v2580_v45  ;;  %v8313_v29 = vld [vmem:[#allocation50_spill] sm:$0xff] }
 0x2e1   :  { %v4168_v22 = vadd.f32 -1.0, %v5100_v13  ;;  %v2426_v60 = vmul.f32 1.442695, %v2338_v40  ;;  %v2640_v53 = vpack.c.bf16 %v2583_v4, %v2582_v18  ;;  %v4169_v61 = vadd.f32 -1.0, %v5102_v35  ;;  %v8314_v45 = vld [vmem:[#allocation74_spill] sm:$0xff] }
 0x2e2   :  { %v2029_v63 = vadd.f32 %v2028_v26, %v8309_v57  ;;  %v2428_v8 = vmul.f32 1.442695, %v2339_v58  ;;  %v2341_v27 = vmin.f32 %v7378_v46, 0.0  ;;  %4720 = vmatmul.mubr.bf16.gmra.mrb[72].mxu0 %v2639_v49  ;;  %v4170_v19 = vadd.f32 -1.0, %v5104_v3  ;;  %v8315_v3 = vld [vmem:[#allocation51_spill] sm:$0xff] }
 0x2e3   :  { %v4171_v15 = vadd.f32 -1.0, %v5106_v33  ;;  %5115 = vpow2.f32 %v2422_v34  ;;  %v2342_v31 = vmin.f32 %v7391_v16, 0.0  ;;  %4723 = vmatprep.mubr.bf16.mxu0 %v2640_v53  ;;  %vm2264_vm7 = vcmp.gt.f32.partialorder %v7183_v43, 0.0  ;;  %v8317_v33 = vld [vmem:[#allocation77_spill] sm:$0xff] }
 0x2e4   :  { %v2030_v17 = vadd.f32 %v2029_v63, %v8310_v42  ;;  %5117 = vpow2.f32 %v2424_v54  ;;  %vm2265_vm8 = vcmp.gt.f32.partialorder %v7186_v21, 0.0  ;;  %vm2266_vm11 = vcmp.gt.f32.partialorder %v7189_v32, 0.0 }
 0x2e5   :  { %v5108_v7 = vpop.eup %5107  ;;  %vm2267_vm12 = vcmp.gt.f32.partialorder %v7192_v9, 0.0  ;;  %5119 = vpow2.f32 %v2426_v60  ;;  %v2584_v47 = vsel %vm2264_vm7, %v7183_v43, %v4168_v22  ;;  %v2585_v40 = vsel %vm2265_vm8, %v7186_v21, %v4169_v61 }
 0x2e6   :  { %v5110_v11 = vpop.eup %5109  ;;  %v2031_v20 = vadd.f32 %v2030_v17, %v8311_v28  ;;  %5121 = vpow2.f32 %v2428_v8  ;;  %v7408_v58 = vadd.f32 %v6899_v44, %v8312_v14  ;;  %v2586_v55 = vsel %vm2266_vm11, %v7189_v32, %v4170_v19  ;;  %v8316_v32 = vld [vmem:[#allocation75_spill] sm:$0xff] }
 0x2e7   :  { %v5112_v56 = vpop.eup %5111  ;;  %v2587_v59 = vsel %vm2267_vm12, %v7192_v9, %v4171_v15  ;;  %v2430_v13 = vmul.f32 1.442695, %v2340_v5  ;;  %v7413_v48 = vadd.f32 %v6899_v44, %v2149_v62  ;;  %v1967_v43 = vmul.f32 %v8313_v29, %v8313_v29  ;;  %v8319_v5 = vld [vmem:[#allocation76_spill] sm:$0xff] }
 0x2e8   :  { %v5114_v35 = vpop.eup %5113  ;;  %v2032_v21 = vadd.f32 %v2031_v20, %v8314_v45  ;;  %v2432_v24 = vmul.f32 1.442695, %v2341_v27  ;;  %v1968_v41 = vmul.f32 %v8315_v3, %v8315_v3  ;;  %v2641_v23 = vpack.c.bf16 %v2585_v40, %v2584_v47  ;;  %v8320_v15 = vld [vmem:[#allocation52_spill] sm:$0xff] }
 0x2e9   :  { %v4172_v30 = vadd.f32 -1.0, %v5108_v7  ;;  %v2434_v18 = vmul.f32 1.442695, %v2342_v31  ;;  %v2642_v9 = vpack.c.bf16 %v2587_v59, %v2586_v55  ;;  %v4173_v34 = vadd.f32 -1.0, %v5110_v11 }
 0x2ea   :  { %v2033_v4 = vadd.f32 %v2032_v21, %v8316_v32  ;;  %v8318_v50 = vmin.f32 %v8317_v33, 0.0  ;;  %v2344_v0 = vmin.f32 %v7408_v58, 0.0  ;;  %4724 = vmatmul.mubr.bf16.gmra.mrb[76].mxu0 %v2641_v23  ;;  %v4174_v10 = vadd.f32 -1.0, %v5112_v56 }
 0x2eb   :  { %v4175_v26 = vadd.f32 -1.0, %v5114_v35  ;;  %5123 = vpow2.f32 %v2430_v13  ;;  %v2345_v54 = vmin.f32 %v7413_v48, 0.0  ;;  %4727 = vmatprep.mubr.bf16.mxu0 %v2642_v9  ;;  %vm2268_vm9 = vcmp.gt.f32.partialorder %v7195_v25, 0.0 }
 0x2ec   :  { %v2436_v62 = vmul.f32 1.442695, %v8318_v50  ;;  %v2034_v49 = vadd.f32 %v2033_v4, %v8319_v5  ;;  %5125 = vpow2.f32 %v2432_v24  ;;  %vm2269_vm10 = vcmp.gt.f32.partialorder %v7250_v2, 0.0 }
 0x2ed   :  { %v5116_v22 = vpop.eup %5115  ;;  %vm2270_vm13 = vcmp.gt.f32.partialorder %v7257_v1, 0.0  ;;  %vm2271_vm14 = vcmp.gt.f32.partialorder %v7261_v37, 0.0  ;;  %5127 = vpow2.f32 %v2434_v18  ;;  %v2588_v63 = vsel %vm2268_vm9, %v7195_v25, %v4172_v30 }
 0x2ee   :  { %v5118_v60 = vpop.eup %5117  ;;  %v2035_v57 = vadd.f32 %v2034_v49, %v1967_v43  ;;  %v2589_v53 = vsel %vm2269_vm10, %v7250_v2, %v4173_v34  ;;  %5129 = vpow2.f32 %v2436_v62  ;;  %v2590_v8 = vsel %vm2270_vm13, %v7257_v1, %v4174_v10 }
 0x2ef   :  { %v5120_v61 = vpop.eup %5119  ;;  %v2591_v27 = vsel %vm2271_vm14, %v7261_v37, %v4175_v26  ;;  %v1969_v31 = vmul.f32 %v8320_v15, %v8320_v15  ;;  %v2438_v17 = vmul.f32 1.442695, %v2344_v0  ;;  %v2643_v7 = vpack.c.bf16 %v2589_v53, %v2588_v63 }
 0x2f0   :  { %v5122_v19 = vpop.eup %5121  ;;  %v2036_v42 = vadd.f32 %v2035_v57, %v1968_v41  ;;  %v2440_v11 = vmul.f32 1.442695, %v2345_v54  ;;  %v2644_v20 = vpack.c.bf16 %v2591_v27, %v2590_v8  ;;  %v4176_v47 = vadd.f32 -1.0, %v5116_v22  ;;  %v8322_v27 = vld [vmem:[#allocation54_spill] sm:$0xff] }
 0x2f1   :  { %v4177_v25 = vadd.f32 -1.0, %v5118_v60  ;;  %v4178_v2 = vadd.f32 -1.0, %v5120_v61  ;;  %v4179_v40 = vadd.f32 -1.0, %v5122_v19  ;;  %5131 = vpow2.f32 %v2438_v17  ;;  %v8321_v61 = vld [vmem:[#allocation53_spill] sm:$0xff]  ;;  %v8323_v19 = vld [vmem:[#allocation55_spill] sm:$0xff] }
 0x2f2   :  { %v2037_v28 = vadd.f32 %v2036_v42, %v1969_v31  ;;  %4728 = vmatmul.mubr.bf16.gmra.mrb[80].mxu0 %v2643_v7  ;;  %vm2272_vm15 = vcmp.gt.f32.partialorder %v7269_v36, 0.0  ;;  %vm2273_vm0 = vcmp.gt.f32.partialorder %v7276_v52, 0.0  ;;  %vm2274_vm1 = vcmp.gt.f32.partialorder %v7280_v6, 0.0  ;;  %v8324_v31 = vld [vmem:[#allocation56_spill] sm:$0xff]  ;;  %v8325_v17 = vld [vmem:[#allocation57_spill] sm:$0xff] }
 0x2f3   :  { %4731 = vmatprep.mubr.bf16.mxu0 %v2644_v20  ;;  %5133 = vpow2.f32 %v2440_v11  ;;  %v2592_v55 = vsel %vm2272_vm15, %v7269_v36, %v4176_v47  ;;  %v2593_v59 = vsel %vm2273_vm0, %v7276_v52, %v4177_v25  ;;  %vm2275_vm2 = vcmp.gt.f32.partialorder %v7352_v51, 0.0  ;;  %v4933_v52 = vld [vmem:[%s8095_s1 + $0x208] sm:$0xff]   ;;  %v8326_v11 = vld [vmem:[#allocation58_spill] sm:$0xff]  ;;  %v8328_v25 = vld [vmem:[#allocation60_spill] sm:$0xff] }
 0x2f4   :  { %v2038_v56 = vrot.slane %v2037_v28, 4  ;;  %v2594_v35 = vsel %vm2274_vm1, %v7280_v6, %v4178_v2  ;;  %v2595_v43 = vsel %vm2275_vm2, %v7352_v51, %v4179_v40  ;;  %v2645_v24 = vpack.c.bf16 %v2593_v59, %v2592_v55  ;;  %v4934_v6 = vld [vmem:[%s8095_s1 + $0x210] sm:$0xff]   ;;  %4815 = vmatprep.subr.bf16.mxu0 %v4933_v52  ;;  %v8327_v20 = vld [vmem:[#allocation59_spill] sm:$0xff]  ;;  %v8329_v40 = vld [vmem:[#allocation29_spill] sm:$0xff] }
 0x2f5   :  { %v5124_v1 = vpop.eup %5123  ;;  %v2646_v23 = vpack.c.bf16 %v2595_v43, %v2594_v35  ;;  %vm2276_vm3 = vcmp.gt.f32.partialorder %v7360_v12, 0.0  ;;  %vm2277_vm4 = vcmp.gt.f32.partialorder %v7378_v46, 0.0  ;;  %vm2278_vm5 = vcmp.gt.f32.partialorder %v7391_v16, 0.0  ;;  %4816 = vmatpush3.bf16.msra.mxu0 %v4933_v52  ;;  %v8332_v59 = vld [vmem:[#allocation32_spill] sm:$0xff]  ;;  %v8333_v35 = vld [vmem:[#allocation33_spill] sm:$0xff] }
 0x2f6   :  { %v5126_v37 = vpop.eup %5125  ;;  %v2039_v14 = vadd.f32 %v2038_v56, %v2037_v28  ;;  %v4180_v30 = vadd.f32 -1.0, %v5124_v1  ;;  %vm2279_vm6 = vcmp.gt.f32.partialorder %v8317_v33, 0.0  ;;  %4817 = vmatprep.subr.bf16.mxu0 %v4934_v6  ;;  %vm2280_vm7 = vcmp.gt.f32.partialorder %v7408_v58, 0.0  ;;  %v8330_v1 = vld [vmem:[#allocation30_spill] sm:$0xff] }
 0x2f7   :  { %v5128_v13 = vpop.eup %5127  ;;  %v4181_v18 = vadd.f32 -1.0, %v5126_v37  ;;  %vm2281_vm8 = vcmp.gt.f32.partialorder %v7413_v48, 0.0 }
 0x2f8   :  { %v5130_v45 = vpop.eup %5129  ;;  %v2040_v21 = vrot.slane %v2039_v14, 2  ;;  %v4182_v32 = vadd.f32 -1.0, %v5128_v13  ;;  %v2596_v9 = vsel %vm2276_vm3, %v7360_v12, %v4180_v30  ;;  %v4935_v12 = vld [vmem:[%s8095_s1 + $0x218] sm:$0xff]   ;;  %v8336_v30 = vld [vmem:[#allocation36_spill] sm:$0xff] }
 0x2f9   :  { %v4183_v4 = vadd.f32 -1.0, %v5130_v45  ;;  %v2597_v34 = vsel %vm2277_vm4, %v7378_v46, %v4181_v18  ;;  %4818 = vmatpush3.bf16.msra.mxu0 %v4934_v6  ;;  %v8339_v6 = vld [vmem:[#allocation39_spill] sm:$0xff] }
 0x2fa   :  { %v2041_v41 = vadd.f32 %v2040_v21, %v2039_v14  ;;  %4732 = vmatmul.mubr.bf16.gmra.mrb[84].mxu0 %v2645_v24  ;;  %v2598_v62 = vsel %vm2278_vm5, %v7391_v16, %v4182_v32  ;;  %v2647_v26 = vpack.c.bf16 %v2597_v34, %v2596_v9  ;;  %4819 = vmatprep.subr.bf16.mxu0 %v4935_v12  ;;  %v8331_v14 = vld [vmem:[#allocation31_spill] sm:$0xff]  ;;  %v8334_v21 = vld [vmem:[#allocation34_spill] sm:$0xff]  ;;  %v8337_v32 = vld [vmem:[#allocation37_spill] sm:$0xff] }
 0x2fb   :  { %4735 = vmatprep.mubr.bf16.mxu0 %v2646_v23  ;;  %v5132_v51 = vpop.eup %5131  ;;  %v2599_v0 = vsel %vm2279_vm6, %v8317_v33, %v4183_v4  ;;  %v8340_v9 = vld [vmem:[#allocation40_spill] sm:$0xff] }
 0x2fc   :  { %v2042_v36 = vrot.slane %v2041_v41, 1  ;;  %v2648_v54 = vpack.c.bf16 %v2599_v0, %v2598_v62  ;;  %v4184_v46 = vadd.f32 -1.0, %v5132_v51  ;;  %v8342_v0 = vld [vmem:[#allocation42_spill] sm:$0xff] }
 0x2fd   :  { %v5134_v50 = vpop.eup %5133  ;;  %4820 = vmatpush3.bf16.msra.mxu0 %v4935_v12 }
 0x2fe   :  { %v2043_v10 = vadd.f32 %v2042_v36, %v2041_v41  ;;  %v4185_v5 = vadd.f32 -1.0, %v5134_v50  ;;  %v2600_v16 = vsel %vm2280_vm7, %v7408_v58, %v4184_v46  ;;  %v8335_v41 = vld [vmem:[#allocation35_spill] sm:$0xff]  ;;  %v8338_v36 = vld [vmem:[#allocation38_spill] sm:$0xff]  ;;  %v8341_v50 = vld [vmem:[#allocation41_spill] sm:$0xff] }
 0x300   :  { %v2045_v49 = vmul.f32 0.00390625, %v2043_v10  ;;  %v2601_v33 = vsel %vm2281_vm8, %v7413_v48, %v4185_v5  ;;  %v8344_v5 = vld [vmem:[#allocation44_spill] sm:$0xff] }
 0x301   :  { %v2649_v60 = vpack.c.bf16 %v2601_v33, %v2600_v16 }
 0x302   :  { %4736 = vmatmul.mubr.bf16.gmra.mrb[88].mxu0 %v2647_v26  ;;  %v2047_v22 = vadd.f32 1e-05, %v2045_v49 }
 0x303   :  { %4739 = vmatprep.mubr.bf16.mxu0 %v2648_v54  ;;  %v8343_v54 = vld [vmem:[#allocation43_spill] sm:$0xff] }
 0x304   :  { %5135 = vrsqrt.f32 %v2047_v22  ;;  %v8345_v22 = vld [vmem:[#allocation45_spill] sm:$0xff] }
 0x30a   :  { %4740 = vmatmul.mubr.bf16.gmra.mrb[92].mxu0 %v2649_v60 }
 0x30e   :  { %v7465_v57 = vpop.eup %5135 }
 0x30f   :  { %v2111_v63 = vmul.f32 %v7465_v57, %v8313_v29  ;;  %v2082_v8 = vmul.f32 %v7465_v57, %v8321_v61  ;;  %v2083_v58 = vmul.f32 %v7465_v57, %v8322_v27  ;;  %v2084_v48 = vmul.f32 %v7465_v57, %v8323_v19  ;;  %v4936_v29 = vld [vmem:[%s8095_s1 + $0x220] sm:$0xff]   ;;  %v8347_v61 = vld [vmem:[#allocation47_spill] sm:$0xff] }
 0x310   :  { %v2085_v42 = vmul.f32 %v7465_v57, %v8324_v31  ;;  %v2086_v7 = vmul.f32 %v7465_v57, %v8325_v17  ;;  %v2087_v28 = vmul.f32 %v7465_v57, %v8326_v11  ;;  %v2088_v47 = vmul.f32 %v7465_v57, %v8327_v20  ;;  %4821 = vmatprep.subr.bf16.mxu0 %v4936_v29 }
 0x311   :  { %v2179_v53 = vmul.f32 %v8306_v39, %v2111_v63  ;;  %v2089_v2 = vmul.f32 %v7465_v57, %v8328_v25  ;;  %v2090_v56 = vmul.f32 %v7465_v57, %v8329_v40  ;;  %v2091_v37 = vmul.f32 %v7465_v57, %v8330_v1  ;;  %4822 = vmatpush3.bf16.msra.mxu0 %v4936_v29  ;;  %v8346_v63 = vld [vmem:[#allocation46_spill] sm:$0xff] }
 0x312   :  { %v2092_v55 = vmul.f32 %v7465_v57, %v8331_v14  ;;  %v2093_v13 = vmul.f32 %v7465_v57, %v8332_v59  ;;  %v2094_v43 = vmul.f32 %v7465_v57, %v8333_v35  ;;  %v2095_v24 = vmul.f32 %v7465_v57, %v8334_v21 }
 0x313   :  { %v7500_v45 = vadd.f32 %v6899_v44, %v2179_v53  ;;  %v2096_v23 = vmul.f32 %v7465_v57, %v8335_v41  ;;  %v2097_v18 = vmul.f32 %v7465_v57, %v8336_v30  ;;  %v2098_v4 = vmul.f32 %v7465_v57, %v8337_v32 }
 0x314   :  { %v2099_v52 = vmul.f32 %v7465_v57, %v8338_v36  ;;  %v2100_v51 = vmul.f32 %v7465_v57, %v8339_v6  ;;  %v2101_v34 = vmul.f32 %v7465_v57, %v8340_v9  ;;  %v2102_v62 = vmul.f32 %v7465_v57, %v8341_v50 }
 0x315   :  { %v2103_v10 = vmul.f32 %v7465_v57, %v8342_v0  ;;  %v2150_v26 = vmul.f32 %v8306_v39, %v2082_v8  ;;  %v2151_v12 = vmul.f32 %v8306_v39, %v2083_v58  ;;  %v2104_v46 = vmul.f32 %v7465_v57, %v8343_v54  ;;  %v8348_v58 = vld [vmem:[#allocation48_spill] sm:$0xff] }
 0x316   :  { %v7526_v49 = vmul.f32 %v7465_v57, %v8344_v5  ;;  %v2152_v16 = vmul.f32 %v8306_v39, %v2084_v48  ;;  %v2153_v33 = vmul.f32 %v8306_v39, %v2085_v42  ;;  %v7532_v60 = vmul.f32 %v7465_v57, %v8345_v22  ;;  %v8349_v48 = vld [vmem:[#allocation49_spill] sm:$0xff] }
 0x317   :  { %v7536_v53 = vmul.f32 %v7465_v57, %v8346_v63  ;;  %v7540_v8 = vmul.f32 %v7465_v57, %v8347_v61  ;;  %v2154_v27 = vmul.f32 %v8306_v39, %v2086_v7  ;;  %v7545_v19 = vmul.f32 %v7465_v57, %v8348_v58 }
 0x318   :  { %v7549_v31 = vmul.f32 %v7465_v57, %v8349_v48  ;;  %v7553_v42 = vmul.f32 %v7465_v57, %v8315_v3  ;;  %v2155_v17 = vmul.f32 %v8306_v39, %v2087_v28  ;;  %v2156_v29 = vmul.f32 %v8306_v39, %v2088_v47 }
 0x319   :  { %v2157_v11 = vmul.f32 %v8306_v39, %v2089_v2  ;;  %v7559_v7 = vadd.f32 %v6899_v44, %v2150_v26  ;;  %v7562_v20 = vadd.f32 %v6899_v44, %v2151_v12  ;;  %v2158_v25 = vmul.f32 %v8306_v39, %v2090_v56  ;;  %v4937_v56 = vld [vmem:[%s8095_s1 + $0x228] sm:$0xff]  }
 0x31a   :  { %v2159_v40 = vmul.f32 %v8306_v39, %v2091_v37  ;;  %v7567_v1 = vadd.f32 %v6899_v44, %v2152_v16  ;;  %v7570_v3 = vadd.f32 %v6899_v44, %v2153_v33  ;;  %v2160_v28 = vmul.f32 %v8306_v39, %v2092_v55  ;;  %v4938_v55 = vld [vmem:[%s8095_s1 + $0x230] sm:$0xff]   ;;  %4823 = vmatprep.subr.bf16.mxu0 %v4937_v56 }
 0x31b   :  { %v2161_v47 = vmul.f32 %v8306_v39, %v2093_v13  ;;  %v2162_v2 = vmul.f32 %v8306_v39, %v2094_v43  ;;  %v7576_v14 = vadd.f32 %v6899_v44, %v2154_v27  ;;  %v2163_v37 = vmul.f32 %v8306_v39, %v2095_v24  ;;  %4824 = vmatpush3.bf16.msra.mxu0 %v4937_v56 }
 0x31c   :  { %v2164_v59 = vmul.f32 %v8306_v39, %v2096_v23  ;;  %v2165_v35 = vmul.f32 %v8306_v39, %v2097_v18  ;;  %v7585_v21 = vadd.f32 %v6899_v44, %v2155_v17  ;;  %v2166_v13 = vmul.f32 %v8306_v39, %v2098_v4  ;;  %4825 = vmatprep.subr.bf16.mxu0 %v4938_v55 }
 0x31d   :  { %v7592_v43 = vadd.f32 %v6899_v44, %v2156_v29  ;;  %v2346_v41 = vmin.f32 %v7559_v7, 0.0  ;;  %v2347_v24 = vmin.f32 %v7562_v20, 0.0  ;;  %v2167_v23 = vmul.f32 %v8306_v39, %v2099_v52 }
 0x31e   :  { %v7598_v30 = vadd.f32 %v6899_v44, %v2157_v11  ;;  %v2348_v18 = vmin.f32 %v7567_v1, 0.0  ;;  %v2349_v32 = vmin.f32 %v7570_v3, 0.0  ;;  %v2168_v4 = vmul.f32 %v8306_v39, %v2100_v51 }
 0x31f   :  { %v2169_v36 = vmul.f32 %v8306_v39, %v2101_v34  ;;  %v7605_v6 = vadd.f32 %v6899_v44, %v2158_v25  ;;  %v2350_v9 = vmin.f32 %v7576_v14, 0.0  ;;  %v2170_v52 = vmul.f32 %v8306_v39, %v2102_v62  ;;  %4826 = vmatpush3.bf16.msra.mxu0 %v4938_v55 }
 0x320   :  { %v2171_v50 = vmul.f32 %v8306_v39, %v2103_v10  ;;  %v7611_v0 = vadd.f32 %v6899_v44, %v2159_v40  ;;  %v2351_v26 = vmin.f32 %v7585_v21, 0.0  ;;  %v7615_v12 = vmul.f32 %v8306_v39, %v2104_v46  ;;  %v4939_v40 = vld [vmem:[%s8095_s1 + $0x238] sm:$0xff]  }
 0x321   :  { %v2352_v51 = vmin.f32 %v7592_v43, 0.0  ;;  %v2442_v34 = vmul.f32 1.442695, %v2346_v41  ;;  %v2444_v54 = vmul.f32 1.442695, %v2347_v24  ;;  %v7619_v5 = vadd.f32 %v6899_v44, %v2160_v28  ;;  %4827 = vmatprep.subr.bf16.mxu0 %v4939_v40 }
 0x322   :  { %v2353_v16 = vmin.f32 %v7598_v30, 0.0  ;;  %v2446_v62 = vmul.f32 1.442695, %v2348_v18  ;;  %v2448_v33 = vmul.f32 1.442695, %v2349_v32  ;;  %v7623_v10 = vadd.f32 %v6899_v44, %v2161_v47 }
 0x323   :  { %v2354_v22 = vmin.f32 %v7605_v6, 0.0  ;;  %5137 = vpow2.f32 %v2442_v34  ;;  %v2450_v46 = vmul.f32 1.442695, %v2350_v9  ;;  %v7627_v63 = vadd.f32 %v6899_v44, %v2162_v2  ;;  %4828 = vmatpush3.bf16.msra.mxu0 %v4939_v40 }
 0x324   :  { %v2355_v61 = vmin.f32 %v7611_v0, 0.0  ;;  %5139 = vpow2.f32 %v2444_v54  ;;  %v2452_v27 = vmul.f32 1.442695, %v2351_v26  ;;  %v7632_v58 = vmul.f32 %v8306_v39, %v7526_v49 }
 0x325   :  { %v7635_v48 = vadd.f32 %v6899_v44, %v2163_v37  ;;  %5141 = vpow2.f32 %v2446_v62  ;;  %v2454_v17 = vmul.f32 1.442695, %v2352_v51  ;;  %v7639_v29 = vmul.f32 %v8306_v39, %v7532_v60 }
 0x326   :  { %v2356_v11 = vmin.f32 %v7619_v5, 0.0  ;;  %5143 = vpow2.f32 %v2448_v33  ;;  %v2456_v25 = vmul.f32 1.442695, %v2353_v16  ;;  %v7647_v49 = vmul.f32 %v8306_v39, %v7536_v53 }
 0x327   :  { %v2357_v28 = vmin.f32 %v7623_v10, 0.0  ;;  %5145 = vpow2.f32 %v2450_v46  ;;  %v2458_v47 = vmul.f32 1.442695, %v2354_v22  ;;  %v7651_v2 = vadd.f32 %v6899_v44, %v2164_v59 }
 0x328   :  { %v2358_v60 = vmin.f32 %v7627_v63, 0.0  ;;  %5147 = vpow2.f32 %v2452_v27  ;;  %v2460_v56 = vmul.f32 1.442695, %v2355_v61  ;;  %v7655_v37 = vadd.f32 %v6899_v44, %v2165_v35  ;;  %v4940_v35 = vld [vmem:[%s8095_s1 + $0x240] sm:$0xff]  }
 0x329   :  { %v7658_v55 = vadd.f32 %v6899_v44, %v2166_v13  ;;  %v2359_v53 = vmin.f32 %v7635_v48, 0.0  ;;  %5149 = vpow2.f32 %v2454_v17  ;;  %v7662_v41 = vadd.f32 %v6899_v44, %v2167_v23  ;;  %4829 = vmatprep.subr.bf16.mxu0 %v4940_v35 }
 0x32a   :  { %v7665_v59 = vadd.f32 %v6899_v44, %v2168_v4  ;;  %5151 = vpow2.f32 %v2456_v25  ;;  %v2462_v24 = vmul.f32 1.442695, %v2356_v11  ;;  %v7672_v13 = vmul.f32 %v8306_v39, %v7540_v8  ;;  %4830 = vmatpush3.bf16.msra.mxu0 %v4940_v35 }
 0x32b   :  { %v7675_v18 = vadd.f32 %v6899_v44, %v2169_v36  ;;  %5153 = vpow2.f32 %v2458_v47  ;;  %v2464_v32 = vmul.f32 1.442695, %v2357_v28  ;;  %v7678_v23 = vadd.f32 %v6899_v44, %v2170_v52 }
 0x32c   :  { %v7681_v4 = vadd.f32 %v6899_v44, %v2171_v50  ;;  %5155 = vpow2.f32 %v2460_v56  ;;  %v2466_v9 = vmul.f32 1.442695, %v2358_v60  ;;  %v2360_v51 = vmin.f32 %v7651_v2, 0.0 }
 0x32d   :  { %v5138_v26 = vpop.eup %5137  ;;  %v2361_v8 = vmin.f32 %v7655_v37, 0.0  ;;  %v2362_v34 = vmin.f32 %v7658_v55, 0.0  ;;  %v2468_v36 = vmul.f32 1.442695, %v2359_v53  ;;  %v2363_v16 = vmin.f32 %v7662_v41, 0.0 }
 0x32e   :  { %v5140_v54 = vpop.eup %5139  ;;  %v2364_v52 = vmin.f32 %v7665_v59, 0.0  ;;  %v4186_v62 = vadd.f32 -1.0, %v5138_v26  ;;  %5157 = vpow2.f32 %v2462_v24  ;;  %vm2282_vm11 = vcmp.gt.f32.partialorder %v7559_v7, 0.0 }
 0x32f   :  { %v5142_v50 = vpop.eup %5141  ;;  %vm2283_vm12 = vcmp.gt.f32.partialorder %v7562_v20, 0.0  ;;  %v4187_v33 = vadd.f32 -1.0, %v5140_v54  ;;  %5159 = vpow2.f32 %v2464_v32  ;;  %vm2284_vm9 = vcmp.gt.f32.partialorder %v7567_v1, 0.0 }
 0x330   :  { %v5144_v22 = vpop.eup %5143  ;;  %v2602_v46 = vsel %vm2282_vm11, %v7559_v7, %v4186_v62  ;;  %v4188_v61 = vadd.f32 -1.0, %v5142_v50  ;;  %5161 = vpow2.f32 %v2466_v9  ;;  %vm2285_vm10 = vcmp.gt.f32.partialorder %v7570_v3, 0.0 }
 0x331   :  { %v5146_v27 = vpop.eup %5145  ;;  %v2603_v17 = vsel %vm2283_vm12, %v7562_v20, %v4187_v33  ;;  %v4189_v11 = vadd.f32 -1.0, %v5144_v22  ;;  %5163 = vpow2.f32 %v2468_v36  ;;  %v2470_v60 = vmul.f32 1.442695, %v2360_v51 }
 0x332   :  { %v5148_v25 = vpop.eup %5147  ;;  %v2650_v40 = vpack.c.bf16 %v2603_v17, %v2602_v46  ;;  %v2604_v28 = vsel %vm2284_vm9, %v7567_v1, %v4188_v61  ;;  %v4190_v47 = vadd.f32 -1.0, %v5146_v27  ;;  %vm2286_vm13 = vcmp.gt.f32.partialorder %v7576_v14, 0.0 }
 0x333   :  { %v5150_v56 = vpop.eup %5149  ;;  %v2605_v7 = vsel %vm2285_vm10, %v7570_v3, %v4189_v11  ;;  %v4191_v53 = vadd.f32 -1.0, %v5148_v25  ;;  %v2472_v24 = vmul.f32 1.442695, %v2361_v8  ;;  %vm2287_vm14 = vcmp.gt.f32.partialorder %v7585_v21, 0.0 }
 0x334   :  { %v5152_v35 = vpop.eup %5151  ;;  %4743 = vmatprep.mubr.bf16.mxu0 %v2650_v40  ;;  %v2651_v20 = vpack.c.bf16 %v2605_v7, %v2604_v28  ;;  %v2606_v32 = vsel %vm2286_vm13, %v7576_v14, %v4190_v47  ;;  %v2474_v9 = vmul.f32 1.442695, %v2362_v34  ;;  %v4192_v36 = vadd.f32 -1.0, %v5150_v56 }
 0x335   :  { %v5154_v26 = vpop.eup %5153  ;;  %v2607_v1 = vsel %vm2287_vm14, %v7585_v21, %v4191_v53  ;;  %v4193_v51 = vadd.f32 -1.0, %v5152_v35  ;;  %v2476_v54 = vmul.f32 1.442695, %v2363_v16  ;;  %v2365_v3 = vmin.f32 %v7675_v18, 0.0 }
 0x336   :  { %v5156_v62 = vpop.eup %5155  ;;  %4744 = vmatmul.mubr.bf16.gmra.mrb[96].mxu0 %v2651_v20  ;;  %v2652_v50 = vpack.c.bf16 %v2607_v1, %v2606_v32  ;;  %v4194_v8 = vadd.f32 -1.0, %v5154_v26  ;;  %5165 = vpow2.f32 %v2470_v60  ;;  %v2366_v33 = vmin.f32 %v7678_v23, 0.0 }
 0x337   :  { %v2367_v22 = vmin.f32 %v7681_v4, 0.0  ;;  %v4195_v46 = vadd.f32 -1.0, %v5156_v62  ;;  %5167 = vpow2.f32 %v2472_v24  ;;  %vm2288_vm15 = vcmp.gt.f32.partialorder %v7592_v43, 0.0 }
 0x338   :  { %v5158_v14 = vpop.eup %5157  ;;  %4747 = vmatprep.mubr.bf16.mxu0 %v2652_v50  ;;  %vm2289_vm0 = vcmp.gt.f32.partialorder %v7598_v30, 0.0  ;;  %vm2290_vm1 = vcmp.gt.f32.partialorder %v7605_v6, 0.0  ;;  %5169 = vpow2.f32 %v2474_v9  ;;  %v2608_v34 = vsel %vm2288_vm15, %v7592_v43, %v4192_v36 }
 0x339   :  { %v5160_v21 = vpop.eup %5159  ;;  %v2609_v16 = vsel %vm2289_vm0, %v7598_v30, %v4193_v51  ;;  %vm2291_vm2 = vcmp.gt.f32.partialorder %v7611_v0, 0.0  ;;  %5171 = vpow2.f32 %v2476_v54  ;;  %v7711_v27 = vadd.f32 %v6899_v44, %v7615_v12 }
 0x33a   :  { %v5162_v61 = vpop.eup %5161  ;;  %v2610_v17 = vsel %vm2290_vm1, %v7605_v6, %v4194_v8  ;;  %v2611_v11 = vsel %vm2291_vm2, %v7611_v0, %v4195_v46  ;;  %v2478_v25 = vmul.f32 1.442695, %v2364_v52  ;;  %v7719_v43 = vadd.f32 %v6899_v44, %v7632_v58 }
 0x33b   :  { %v5164_v40 = vpop.eup %5163  ;;  %v7723_v30 = vadd.f32 %v6899_v44, %v7639_v29  ;;  %v7727_v12 = vadd.f32 %v6899_v44, %v7647_v49  ;;  %v2480_v28 = vmul.f32 1.442695, %v2365_v3  ;;  %v2177_v6 = vmul.f32 %v8306_v39, %v7545_v19 }
 0x33c   :  { %v2178_v0 = vmul.f32 %v8306_v39, %v7549_v31  ;;  %v2653_v52 = vpack.c.bf16 %v2609_v16, %v2608_v34  ;;  %v2482_v47 = vmul.f32 1.442695, %v2366_v33  ;;  %v2654_v60 = vpack.c.bf16 %v2611_v11, %v2610_v17 }
 0x33d   :  { %v4196_v58 = vadd.f32 -1.0, %v5158_v14  ;;  %v4197_v56 = vadd.f32 -1.0, %v5160_v21  ;;  %v2484_v7 = vmul.f32 1.442695, %v2367_v22  ;;  %v2368_v29 = vmin.f32 %v7711_v27, 0.0 }
 0x33e   :  { %4748 = vmatmul.mubr.bf16.gmra.mrb[100].mxu0 %v2653_v52  ;;  %v4198_v53 = vadd.f32 -1.0, %v5162_v61  ;;  %v4199_v24 = vadd.f32 -1.0, %v5164_v40  ;;  %5173 = vpow2.f32 %v2478_v25  ;;  %v2369_v49 = vmin.f32 %v7719_v43, 0.0 }
 0x33f   :  { %v2370_v35 = vmin.f32 %v7723_v30, 0.0  ;;  %v2371_v19 = vmin.f32 %v7727_v12, 0.0  ;;  %4751 = vmatprep.mubr.bf16.mxu0 %v2654_v60  ;;  %5175 = vpow2.f32 %v2480_v28  ;;  %vm2292_vm3 = vcmp.gt.f32.partialorder %v7619_v5, 0.0 }
 0x340   :  { %v5166_v31 = vpop.eup %5165  ;;  %vm2293_vm4 = vcmp.gt.f32.partialorder %v7623_v10, 0.0  ;;  %vm2294_vm5 = vcmp.gt.f32.partialorder %v7627_v63, 0.0  ;;  %5177 = vpow2.f32 %v2482_v47  ;;  %v2612_v32 = vsel %vm2292_vm3, %v7619_v5, %v4196_v58 }
 0x341   :  { %v5168_v20 = vpop.eup %5167  ;;  %v2613_v9 = vsel %vm2293_vm4, %v7623_v10, %v4197_v56  ;;  %vm2295_vm6 = vcmp.gt.f32.partialorder %v7635_v48, 0.0  ;;  %5179 = vpow2.f32 %v2484_v7  ;;  %v7745_v1 = vadd.f32 %v6899_v44, %v7672_v13 }
 0x342   :  { %v5170_v26 = vpop.eup %5169  ;;  %v2614_v36 = vsel %vm2294_vm5, %v7627_v63, %v4198_v53  ;;  %v2615_v51 = vsel %vm2295_vm6, %v7635_v48, %v4199_v24  ;;  %v2486_v54 = vmul.f32 1.442695, %v2368_v29  ;;  %v2113_v3 = vmul.f32 %v7465_v57, %v8320_v15 }
 0x343   :  { %v5172_v62 = vpop.eup %5171  ;;  %v7752_v5 = vadd.f32 %v6899_v44, %v2177_v6  ;;  %v7755_v10 = vadd.f32 %v6899_v44, %v2178_v0  ;;  %v2488_v50 = vmul.f32 1.442695, %v2369_v49  ;;  %v2375_v8 = vmin.f32 %v7500_v45, 0.0 }
 0x344   :  { %v2180_v13 = vmul.f32 %v8306_v39, %v7553_v42  ;;  %v2655_v63 = vpack.c.bf16 %v2613_v9, %v2612_v32  ;;  %v2490_v33 = vmul.f32 1.442695, %v2370_v35  ;;  %v2656_v48 = vpack.c.bf16 %v2615_v51, %v2614_v36 }
 0x345   :  { %v4200_v22 = vadd.f32 -1.0, %v5166_v31  ;;  %v4201_v46 = vadd.f32 -1.0, %v5168_v20  ;;  %v2492_v14 = vmul.f32 1.442695, %v2371_v19  ;;  %v2372_v15 = vmin.f32 %v7745_v1, 0.0 }
 0x346   :  { %4752 = vmatmul.mubr.bf16.gmra.mrb[104].mxu0 %v2655_v63  ;;  %v4202_v57 = vadd.f32 -1.0, %v5170_v26  ;;  %v4203_v21 = vadd.f32 -1.0, %v5172_v62  ;;  %5181 = vpow2.f32 %v2486_v54  ;;  %v2181_v34 = vmul.f32 %v8306_v39, %v2113_v3 }
 0x347   :  { %v2373_v16 = vmin.f32 %v7752_v5, 0.0  ;;  %v2374_v61 = vmin.f32 %v7755_v10, 0.0  ;;  %4755 = vmatprep.mubr.bf16.mxu0 %v2656_v48  ;;  %5183 = vpow2.f32 %v2488_v50  ;;  %vm2296_vm7 = vcmp.gt.f32.partialorder %v7651_v2, 0.0 }
 0x348   :  { %v5174_v42 = vpop.eup %5173  ;;  %vm2297_vm8 = vcmp.gt.f32.partialorder %v7655_v37, 0.0  ;;  %vm2298_vm11 = vcmp.gt.f32.partialorder %v7658_v55, 0.0  ;;  %5185 = vpow2.f32 %v2490_v33  ;;  %v2616_v11 = vsel %vm2296_vm7, %v7651_v2, %v4200_v22 }
 0x349   :  { %v5176_v17 = vpop.eup %5175  ;;  %v2617_v25 = vsel %vm2297_vm8, %v7655_v37, %v4201_v46  ;;  %vm2299_vm12 = vcmp.gt.f32.partialorder %v7662_v41, 0.0  ;;  %5187 = vpow2.f32 %v2492_v14  ;;  %v2618_v40 = vsel %vm2298_vm11, %v7658_v55, %v4202_v57 }
 0x34a   :  { %v5178_v39 = vpop.eup %5177  ;;  %v2619_v28 = vsel %vm2299_vm12, %v7662_v41, %v4203_v21  ;;  %v2494_v6 = vmul.f32 1.442695, %v2372_v15  ;;  %v7773_v52 = vadd.f32 %v6899_v44, %v2180_v13  ;;  %v7776_v47 = vadd.f32 %v6899_v44, %v2181_v34 }
 0x34b   :  { %v5180_v0 = vpop.eup %5179  ;;  %v2496_v60 = vmul.f32 1.442695, %v2373_v16  ;;  %v2657_v2 = vpack.c.bf16 %v2617_v25, %v2616_v11  ;;  %v2498_v58 = vmul.f32 1.442695, %v2374_v61  ;;  %v2658_v37 = vpack.c.bf16 %v2619_v28, %v2618_v40 }
 0x34c   :  { %v4204_v56 = vadd.f32 -1.0, %v5174_v42  ;;  %v4205_v7 = vadd.f32 -1.0, %v5176_v17  ;;  %v2500_v29 = vmul.f32 1.442695, %v2375_v8  ;;  %v4206_v53 = vadd.f32 -1.0, %v5178_v39 }
 0x34d   :  { %v4207_v55 = vadd.f32 -1.0, %v5180_v0  ;;  %5189 = vpow2.f32 %v2494_v6  ;;  %v2376_v41 = vmin.f32 %v7773_v52, 0.0  ;;  %v2377_v24 = vmin.f32 %v7776_v47, 0.0 }
 0x34e   :  { %4756 = vmatmul.mubr.bf16.gmra.mrb[108].mxu0 %v2657_v2  ;;  %5191 = vpow2.f32 %v2496_v60  ;;  %vm2300_vm9 = vcmp.gt.f32.partialorder %v7665_v59, 0.0  ;;  %vm2301_vm10 = vcmp.gt.f32.partialorder %v7675_v18, 0.0  ;;  %vm2302_vm13 = vcmp.gt.f32.partialorder %v7678_v23, 0.0 }
 0x34f   :  { %4759 = vmatprep.mubr.bf16.mxu0 %v2658_v37  ;;  %5193 = vpow2.f32 %v2498_v58  ;;  %v2620_v35 = vsel %vm2300_vm9, %v7665_v59, %v4204_v56  ;;  %v2621_v19 = vsel %vm2301_vm10, %v7675_v18, %v4205_v7  ;;  %vm2303_vm14 = vcmp.gt.f32.partialorder %v7681_v4, 0.0 }
 0x350   :  { %v5182_v49 = vpop.eup %5181  ;;  %5195 = vpow2.f32 %v2500_v29  ;;  %v2622_v20 = vsel %vm2302_vm13, %v7678_v23, %v4206_v53  ;;  %v2623_v32 = vsel %vm2303_vm14, %v7681_v4, %v4207_v55  ;;  %v2502_v26 = vmul.f32 1.442695, %v2376_v41 }
 0x351   :  { %v5184_v44 = vpop.eup %5183  ;;  %v2659_v36 = vpack.c.bf16 %v2621_v19, %v2620_v35  ;;  %v2504_v51 = vmul.f32 1.442695, %v2377_v24  ;;  %v2660_v54 = vpack.c.bf16 %v2623_v32, %v2622_v20  ;;  %v4208_v62 = vadd.f32 -1.0, %v5182_v49 }
 0x352   :  { %v5186_v31 = vpop.eup %5185  ;;  %v4209_v3 = vadd.f32 -1.0, %v5184_v44  ;;  %5197 = vpow2.f32 %v2502_v26  ;;  %vm2304_vm15 = vcmp.gt.f32.partialorder %v7711_v27, 0.0  ;;  %vm2305_vm0 = vcmp.gt.f32.partialorder %v7719_v43, 0.0 }
 0x353   :  { %v5188_v9 = vpop.eup %5187  ;;  %v4210_v50 = vadd.f32 -1.0, %v5186_v31  ;;  %5199 = vpow2.f32 %v2504_v51  ;;  %v2624_v4 = vsel %vm2304_vm15, %v7711_v27, %v4208_v62  ;;  %vm2306_vm1 = vcmp.gt.f32.partialorder %v7723_v30, 0.0 }
 0x354   :  { %v4211_v59 = vadd.f32 -1.0, %v5188_v9  ;;  %v2625_v8 = vsel %vm2305_vm0, %v7719_v43, %v4209_v3  ;;  %vm2307_vm2 = vcmp.gt.f32.partialorder %v7727_v12, 0.0  ;;  %vm2308_vm3 = vcmp.gt.f32.partialorder %v7745_v1, 0.0 }
 0x355   :  { %v2626_v63 = vsel %vm2306_vm1, %v7723_v30, %v4210_v50  ;;  %v2661_v22 = vpack.c.bf16 %v2625_v8, %v2624_v4  ;;  %vm2309_vm4 = vcmp.gt.f32.partialorder %v7752_v5, 0.0  ;;  %vm2310_vm5 = vcmp.gt.f32.partialorder %v7755_v10, 0.0 }
 0x356   :  { %4760 = vmatmul.mubr.bf16.gmra.mrb[112].mxu0 %v2659_v36  ;;  %v2627_v33 = vsel %vm2307_vm2, %v7727_v12, %v4211_v59  ;;  %vm2311_vm6 = vcmp.gt.f32.partialorder %v7500_v45, 0.0  ;;  %vm2312_vm7 = vcmp.gt.f32.partialorder %v7773_v52, 0.0  ;;  %vm2313_vm8 = vcmp.gt.f32.partialorder %v7776_v47, 0.0 }
 0x357   :  { %4763 = vmatprep.mubr.bf16.mxu0 %v2660_v54  ;;  %v5190_v18 = vpop.eup %5189  ;;  %v2662_v46 = vpack.c.bf16 %v2627_v33, %v2626_v63  ;;  %v2668_v7 = vsub.s32 4, %v8173_v38  ;;  %v3658_v49 = vsub.s32 6, %v8173_v38 }
 0x358   :  { %v5192_v23 = vpop.eup %5191  ;;  %v4212_v14 = vadd.f32 -1.0, %v5190_v18 }
 0x359   :  { %v5194_v13 = vpop.eup %5193  ;;  %v4213_v15 = vadd.f32 -1.0, %v5192_v23 }
 0x35a   :  { %v5196_v48 = vpop.eup %5195  ;;  %v4214_v57 = vadd.f32 -1.0, %v5194_v13  ;;  %v2628_v43 = vsel %vm2308_vm3, %v7745_v1, %v4212_v14 }
 0x35b   :  { %v4215_v21 = vadd.f32 -1.0, %v5196_v48  ;;  %v2629_v30 = vsel %vm2309_vm4, %v7752_v5, %v4213_v15 }
 0x35c   :  { %v5198_v27 = vpop.eup %5197  ;;  %v2630_v34 = vsel %vm2310_vm5, %v7755_v10, %v4214_v57  ;;  %v2663_v61 = vpack.c.bf16 %v2629_v30, %v2628_v43 }
 0x35d   :  { %v5200_v12 = vpop.eup %5199  ;;  %v2631_v16 = vsel %vm2311_vm6, %v7500_v45, %v4215_v21  ;;  %v4216_v17 = vadd.f32 -1.0, %v5198_v27 }
 0x35e   :  { %4764 = vmatmul.mubr.bf16.gmra.mrb[116].mxu0 %v2661_v22  ;;  %v2664_v42 = vpack.c.bf16 %v2631_v16, %v2630_v34  ;;  %v4217_v11 = vadd.f32 -1.0, %v5200_v12 }
 0x35f   :  { %4767 = vmatprep.mubr.bf16.mxu0 %v2662_v46  ;;  %v2632_v1 = vsel %vm2312_vm7, %v7773_v52, %v4216_v17  ;;  %v7812_v52 = vld [vmem:[%s8097_s2] sm:$0xff] }
 0x360   :  { %v2633_v5 = vsel %vm2313_vm8, %v7776_v47, %v4217_v11  ;;  %v7815_v47 = vrot.slane %v7812_v52, %v2668_v7  ;;  %v3659_v19 = vrot.slane %v7812_v52, %v3658_v49 }
 0x361   :  { %v2665_v25 = vpack.c.bf16 %v2633_v5, %v2632_v1 }
 0x366   :  { %4768 = vmatmul.mubr.bf16.gmra.mrb[120].mxu0 %v2663_v61 }
 0x367   :  { %4771 = vmatprep.mubr.bf16.mxu0 %v2664_v42 }
 0x36e   :  { %4772 = vmatmul.mubr.bf16.gmra.mrb[124].mxu0 %v2665_v25 }
 0x391   :  { %v4517_v39 = vpop.f32.mrb[76].mxu1 }
 0x392   :  { %v4518_v10 = vpop.f32.mrb[77].mxu1 }
 0x393   :  { %v4519_v40 = vadd.f32 %v4518_v10, %v4517_v39  ;;  %v4520_v45 = vpop.f32.mrb[78].mxu1 }
 0x394   :  { %v4521_v28 = vpop.f32.mrb[79].mxu1 }
 0x395   :  { %v4522_v6 = vadd.f32 %v4521_v28, %v4520_v45  ;;  %v3839_v51 = vadd.f32 %v4519_v40, %v3659_v19 }
 0x397   :  { %v3842_v23 = vadd.f32 %v4522_v6, %v3659_v19 }
 0x399   :  { %v4523_v0 = vpop.f32.mrb[80].mxu1 }
 0x39a   :  { %v4524_v60 = vpop.f32.mrb[81].mxu1 }
 0x39b   :  { %v4525_v2 = vadd.f32 %v4524_v60, %v4523_v0  ;;  %v4526_v58 = vpop.f32.mrb[82].mxu1 }
 0x39c   :  { %v4527_v37 = vpop.f32.mrb[83].mxu1 }
 0x39d   :  { %v4528_v56 = vadd.f32 %v4527_v37, %v4526_v58  ;;  %v3847_v9 = vadd.f32 %v4525_v2, %v3659_v19 }
 0x39f   :  { %v3850_v3 = vadd.f32 %v4528_v56, %v3659_v19 }
 0x3a5   :  { %v4713_v29 = vpop.f32.mrb[64].mxu0 }
 0x3a6   :  { %v2752_v53 = vpop.f32.mrb[65].mxu0  ;;  %v2761_v20 = vadd.f32 %v4713_v29, %v7815_v47 }
 0x3a7   :  { %v4714_v55 = vpop.f32.mrb[66].mxu0  ;;  %v2753_v41 = vadd.f32 %v2752_v53, %v7815_v47 }
 0x3a8   :  { %v2755_v24 = vpop.f32.mrb[67].mxu0  ;;  %v2764_v50 = vadd.f32 %v4714_v55, %v7815_v47 }
 0x3a9   :  { %3007 = vxpose.xlu0.b32.start [1/16] %v2753_v41, 128  ;;  %v2756_v44 = vadd.f32 %v2755_v24, %v7815_v47 }
 0x3ad   :  { %v4717_v35 = vpop.f32.mrb[68].mxu0  ;;  %3008 = vxpose.xlu0.b32.cont [2/16] %v2756_v44, 128 }
 0x3ae   :  { %v2768_v31 = vpop.f32.mrb[69].mxu0  ;;  %v2777_v43 = vadd.f32 %v4717_v35, %v7815_v47 }
 0x3af   :  { %v4718_v32 = vpop.f32.mrb[70].mxu0  ;;  %v2769_v22 = vadd.f32 %v2768_v31, %v7815_v47 }
 0x3b0   :  { %v2771_v26 = vpop.f32.mrb[71].mxu0  ;;  %v2780_v34 = vadd.f32 %v4718_v32, %v7815_v47 }
 0x3b1   :  { %3009 = vxpose.xlu0.b32.cont [3/16] %v2761_v20, 128  ;;  %v2772_v57 = vadd.f32 %v2771_v26, %v7815_v47 }
 0x3b3   :  { %v4813_v36 = vpop.f32.mrb[84].mxu1 }
 0x3b4   :  { %v3896_v54 = vadd.f32 %v4813_v36, %v3847_v9  ;;  %v3887_v62 = vpop.f32.mrb[85].mxu1 }
 0x3b5   :  { %v3888_v59 = vadd.f32 %v3887_v62, %v3839_v51  ;;  %v4814_v18 = vpop.f32.mrb[86].mxu1  ;;  %v4721_v63 = vpop.f32.mrb[72].mxu0  ;;  %3010 = vxpose.xlu0.b32.cont [4/16] %v2764_v50, 128 }
 0x3b6   :  { %v3899_v4 = vadd.f32 %v4814_v18, %v3850_v3  ;;  %v3890_v8 = vpop.f32.mrb[87].mxu1  ;;  %v2784_v48 = vpop.f32.mrb[73].mxu0  ;;  %v2793_v40 = vadd.f32 %v4721_v63, %v7815_v47 }
 0x3b7   :  { %v3891_v13 = vadd.f32 %v3890_v8, %v3842_v23  ;;  %v4722_v14 = vpop.f32.mrb[74].mxu0  ;;  %v2785_v42 = vadd.f32 %v2784_v48, %v7815_v47 }
 0x3b8   :  { %v3903_v33 = vpack.c.bf16 %v3899_v4, %v3896_v54  ;;  %v2787_v15 = vpop.f32.mrb[75].mxu0  ;;  %v2796_v0 = vadd.f32 %v4722_v14, %v7815_v47 }
 0x3b9   :  { %v3902_v46 = vpack.c.bf16 %v3891_v13, %v3888_v59  ;;  %3011 = vxpose.xlu0.b32.cont [5/16] %v2769_v22, 128  ;;  %v2788_v5 = vadd.f32 %v2787_v15, %v7815_v47 }
 0x3bb   :  { %4831 = vmatprep.mubr.bf16.mxu0 %v3902_v46 }
 0x3bc   :  { %4832 = vmatmul.mubr.bf16.vlgmr.msra.gmra.mrb[128].mxu0 %v3903_v33 }
 0x3bd   :  { %v4725_v21 = vpop.f32.mrb[76].mxu0  ;;  %3012 = vxpose.xlu0.b32.cont [6/16] %v2772_v57, 128 }
 0x3be   :  { %v2800_v27 = vpop.f32.mrb[77].mxu0  ;;  %v2809_v49 = vadd.f32 %v4725_v21, %v7815_v47 }
 0x3bf   :  { %v4726_v30 = vpop.f32.mrb[78].mxu0  ;;  %v2801_v37 = vadd.f32 %v2800_v27, %v7815_v47 }
 0x3c0   :  { %v2803_v12 = vpop.f32.mrb[79].mxu0  ;;  %v2812_v31 = vadd.f32 %v4726_v30, %v7815_v47 }
 0x3c1   :  { %3013 = vxpose.xlu0.b32.cont [7/16] %v2777_v43, 128  ;;  %v2804_v53 = vadd.f32 %v2803_v12, %v7815_v47 }
 0x3c5   :  { %v4729_v16 = vpop.f32.mrb[80].mxu0  ;;  %3014 = vxpose.xlu0.b32.cont [8/16] %v2780_v34, 128 }
 0x3c6   :  { %v2816_v61 = vpop.f32.mrb[81].mxu0  ;;  %v2825_v45 = vadd.f32 %v4729_v16, %v7815_v47 }
 0x3c7   :  { %v4730_v17 = vpop.f32.mrb[82].mxu0  ;;  %v2817_v11 = vadd.f32 %v2816_v61, %v7815_v47 }
 0x3c8   :  { %v2819_v1 = vpop.f32.mrb[83].mxu0  ;;  %v2828_v60 = vadd.f32 %v4730_v17, %v7815_v47 }
 0x3c9   :  { %3039 = vxpose.xlu1.b32.start [1/16] %v2817_v11, 128  ;;  %3015 = vxpose.xlu0.b32.cont [9/16] %v2785_v42, 128  ;;  %v2820_v25 = vadd.f32 %v2819_v1, %v7815_v47 }
 0x3cd   :  { %v4733_v39 = vpop.f32.mrb[84].mxu0  ;;  %3040 = vxpose.xlu1.b32.cont [2/16] %v2820_v25, 128  ;;  %3016 = vxpose.xlu0.b32.cont [10/16] %v2788_v5, 128 }
 0x3ce   :  { %v2832_v10 = vpop.f32.mrb[85].mxu0  ;;  %v2841_v44 = vadd.f32 %v4733_v39, %v7815_v47 }
 0x3cf   :  { %v4734_v28 = vpop.f32.mrb[86].mxu0  ;;  %v2833_v56 = vadd.f32 %v2832_v10, %v7815_v47 }
 0x3d0   :  { %v2835_v6 = vpop.f32.mrb[87].mxu0  ;;  %v2844_v20 = vadd.f32 %v4734_v28, %v7815_v47 }
 0x3d1   :  { %3041 = vxpose.xlu1.b32.cont [3/16] %v2825_v45, 128  ;;  %3017 = vxpose.xlu0.b32.cont [11/16] %v2793_v40, 128  ;;  %v2836_v55 = vadd.f32 %v2835_v6, %v7815_v47 }
 0x3d5   :  { %v4737_v2 = vpop.f32.mrb[88].mxu0  ;;  %3042 = vxpose.xlu1.b32.cont [4/16] %v2828_v60, 128  ;;  %3018 = vxpose.xlu0.b32.cont [12/16] %v2796_v0, 128 }
 0x3d6   :  { %v2848_v58 = vpop.f32.mrb[89].mxu0  ;;  %v2857_v26 = vadd.f32 %v4737_v2, %v7815_v47 }
 0x3d7   :  { %v4738_v7 = vpop.f32.mrb[90].mxu0  ;;  %v2849_v32 = vadd.f32 %v2848_v58, %v7815_v47 }
 0x3d8   :  { %v2851_v29 = vpop.f32.mrb[91].mxu0  ;;  %v2860_v36 = vadd.f32 %v4738_v7, %v7815_v47 }
 0x3d9   :  { %3043 = vxpose.xlu1.b32.cont [5/16] %v2833_v56, 128  ;;  %3019 = vxpose.xlu0.b32.cont [13/16] %v2801_v37, 128  ;;  %v2852_v9 = vadd.f32 %v2851_v29, %v7815_v47 }
 0x3dd   :  { %v4741_v41 = vpop.f32.mrb[92].mxu0  ;;  %3044 = vxpose.xlu1.b32.cont [6/16] %v2836_v55, 128  ;;  %3020 = vxpose.xlu0.b32.cont [14/16] %v2804_v53, 128 }
 0x3de   :  { %v2864_v24 = vpop.f32.mrb[93].mxu0  ;;  %v2873_v62 = vadd.f32 %v4741_v41, %v7815_v47 }
 0x3df   :  { %v4742_v35 = vpop.f32.mrb[94].mxu0  ;;  %v2865_v51 = vadd.f32 %v2864_v24, %v7815_v47 }
 0x3e0   :  { %v2867_v19 = vpop.f32.mrb[95].mxu0  ;;  %v2876_v3 = vadd.f32 %v4742_v35, %v7815_v47 }
 0x3e1   :  { %3045 = vxpose.xlu1.b32.cont [7/16] %v2841_v44, 128  ;;  %3021 = vxpose.xlu0.b32.cont [15/16] %v2809_v49, 128  ;;  %v2868_v54 = vadd.f32 %v2867_v19, %v7815_v47 }
 0x3e5   :  { %3046 = vxpose.xlu1.b32.cont [8/16] %v2844_v20, 128  ;;  %3022 = vxpose.xlu0.b32.end [16/16] %v2812_v31, 128 }
 0x3e9   :  { %3047 = vxpose.xlu1.b32.cont [9/16] %v2849_v32, 128 }
 0x3ed   :  { %3048 = vxpose.xlu1.b32.cont [10/16] %v2852_v9, 128 }
 0x3f1   :  { %3049 = vxpose.xlu1.b32.cont [11/16] %v2857_v26, 128 }
 0x3f5   :  { %3050 = vxpose.xlu1.b32.cont [12/16] %v2860_v36, 128 }
 0x3f9   :  { %3051 = vxpose.xlu1.b32.cont [13/16] %v2865_v51, 128 }
 0x3fd   :  { %3052 = vxpose.xlu1.b32.cont [14/16] %v2868_v54, 128 }
 0x401   :  { %3053 = vxpose.xlu1.b32.cont [15/16] %v2873_v62, 128 }
 0x405   :  { %3054 = vxpose.xlu1.b32.end [16/16] %v2876_v3, 128 }
 0x409   :  { %v4745_v50 = vpop.f32.mrb[96].mxu0 }
 0x40a   :  { %v2880_v59 = vpop.f32.mrb[97].mxu0  ;;  %v2889_v33 = vadd.f32 %v4745_v50, %v7815_v47 }
 0x40b   :  { %v2881_v18 = vadd.f32 %v2880_v59, %v7815_v47  ;;  %v4746_v23 = vpop.f32.mrb[98].mxu0 }
 0x40c   :  { %v2883_v4 = vpop.f32.mrb[99].mxu0  ;;  %v2892_v46 = vadd.f32 %v4746_v23, %v7815_v47 }
 0x40d   :  { %3103 = vxpose.xlu0.b32.start [1/16] %v2881_v18, 128  ;;  %v2884_v8 = vadd.f32 %v2883_v4, %v7815_v47 }
 0x411   :  { %v4749_v13 = vpop.f32.mrb[100].mxu0  ;;  %3104 = vxpose.xlu0.b32.cont [2/16] %v2884_v8, 128 }
 0x412   :  { %v2896_v63 = vpop.f32.mrb[101].mxu0  ;;  %v2905_v61 = vadd.f32 %v4749_v13, %v7815_v47 }
 0x413   :  { %v4750_v48 = vpop.f32.mrb[102].mxu0  ;;  %v2897_v57 = vadd.f32 %v2896_v63, %v7815_v47 }
 0x414   :  { %v2899_v22 = vpop.f32.mrb[103].mxu0  ;;  %v2908_v1 = vadd.f32 %v4750_v48, %v7815_v47 }
 0x415   :  { %3105 = vxpose.xlu0.b32.cont [3/16] %v2889_v33, 128  ;;  %v2900_v30 = vadd.f32 %v2899_v22, %v7815_v47 }
 0x419   :  { %v4753_v14 = vpop.f32.mrb[104].mxu0  ;;  %3106 = vxpose.xlu0.b32.cont [4/16] %v2892_v46, 128 }
 0x41a   :  { %v2912_v15 = vpop.f32.mrb[105].mxu0  ;;  %v2921_v56 = vadd.f32 %v4753_v14, %v7815_v47 }
 0x41b   :  { %v4754_v21 = vpop.f32.mrb[106].mxu0  ;;  %v2913_v10 = vadd.f32 %v2912_v15, %v7815_v47 }
 0x41c   :  { %v2915_v27 = vpop.f32.mrb[107].mxu0  ;;  %v2924_v41 = vadd.f32 %v4754_v21, %v7815_v47 }
 0x41d   :  { %3107 = vxpose.xlu0.b32.cont [5/16] %v2897_v57, 128  ;;  %v2916_v0 = vadd.f32 %v2915_v27, %v7815_v47 }
 0x421   :  { %v7860_v34 = vpop.f32.mrb[108].mxu0  ;;  %3108 = vxpose.xlu0.b32.cont [6/16] %v2900_v30, 128 }
 0x422   :  { %v2928_v16 = vpop.f32.mrb[109].mxu0  ;;  %v2937_v59 = vadd.f32 %v7860_v34, %v7815_v47 }
 0x423   :  { %v7866_v42 = vpop.f32.mrb[110].mxu0  ;;  %v2929_v19 = vadd.f32 %v2928_v16, %v7815_v47 }
 0x424   :  { %v2931_v17 = vpop.f32.mrb[111].mxu0  ;;  %v2940_v63 = vadd.f32 %v7866_v42, %v7815_v47 }
 0x425   :  { %3109 = vxpose.xlu0.b32.cont [7/16] %v2905_v61, 128  ;;  %v2932_v36 = vadd.f32 %v2931_v17, %v7815_v47 }
 0x429   :  { %v3023_v43 = vpop.trf.xlu0  ;;  %v4761_v25 = vpop.f32.mrb[112].mxu0  ;;  %3110 = vxpose.xlu0.b32.cont [8/16] %v2908_v1, 128 }
 0x42a   :  { %3071 = vst [vmem:[%s8098_s3] sm:$0xff] %v3023_v43  ;;  %v2944_v39 = vpop.f32.mrb[113].mxu0  ;;  %v2953_v7 = vadd.f32 %v4761_v25, %v7815_v47 }
 0x42b   :  { %v2945_v40 = vadd.f32 %v2944_v39, %v7815_v47  ;;  %v4762_v45 = vpop.f32.mrb[114].mxu0 }
 0x42c   :  { %v2947_v28 = vpop.f32.mrb[115].mxu0  ;;  %v2956_v24 = vadd.f32 %v4762_v45, %v7815_v47 }
 0x42d   :  { %v3024_v12 = vpop.trf.xlu0  ;;  %3135 = vxpose.xlu1.b32.start [1/16] %v2945_v40, 128  ;;  %3111 = vxpose.xlu0.b32.cont [9/16] %v2913_v10, 128  ;;  %v2948_v60 = vadd.f32 %v2947_v28, %v7815_v47 }
 0x42e   :  { %3073 = vst [vmem:[%s8098_s3 + $0x10] sm:$0xff] %v3024_v12 }
 0x431   :  { %v3025_v11 = vpop.trf.xlu0  ;;  %v4765_v58 = vpop.f32.mrb[116].mxu0  ;;  %3136 = vxpose.xlu1.b32.cont [2/16] %v2948_v60, 128  ;;  %3112 = vxpose.xlu0.b32.cont [10/16] %v2916_v0, 128 }
 0x432   :  { %3075 = vst [vmem:[%s8098_s3 + $0x20] sm:$0xff] %v3025_v11  ;;  %v2960_v37 = vpop.f32.mrb[117].mxu0  ;;  %v2969_v18 = vadd.f32 %v4765_v58, %v7815_v47 }
 0x433   :  { %v4766_v29 = vpop.f32.mrb[118].mxu0  ;;  %v2961_v31 = vadd.f32 %v2960_v37, %v7815_v47 }
 0x434   :  { %v2963_v53 = vpop.f32.mrb[119].mxu0  ;;  %v2972_v33 = vadd.f32 %v4766_v29, %v7815_v47 }
 0x435   :  { %v3026_v5 = vpop.trf.xlu0  ;;  %3137 = vxpose.xlu1.b32.cont [3/16] %v2953_v7, 128  ;;  %3113 = vxpose.xlu0.b32.cont [11/16] %v2921_v56, 128  ;;  %v2964_v51 = vadd.f32 %v2963_v53, %v7815_v47 }
 0x436   :  { %3077 = vst [vmem:[%s8098_s3 + $0x30] sm:$0xff] %v3026_v5 }
 0x439   :  { %v3027_v6 = vpop.trf.xlu0  ;;  %v4769_v44 = vpop.f32.mrb[120].mxu0  ;;  %3138 = vxpose.xlu1.b32.cont [4/16] %v2956_v24, 128  ;;  %3114 = vxpose.xlu0.b32.cont [12/16] %v2924_v41, 128 }
 0x43a   :  { %3079 = vst [vmem:[%s8098_s3 + $0x40] sm:$0xff] %v3027_v6  ;;  %v2976_v35 = vpop.f32.mrb[121].mxu0  ;;  %v2985_v43 = vadd.f32 %v4769_v44, %v7815_v47  ;;  %v3906_v6 = vsub.s32 7, %v8173_v38 }
 0x43b   :  { %v4770_v20 = vpop.f32.mrb[122].mxu0  ;;  %v2977_v46 = vadd.f32 %v2976_v35, %v7815_v47 }
 0x43c   :  { %v2979_v32 = vpop.f32.mrb[123].mxu0  ;;  %v2988_v34 = vadd.f32 %v4770_v20, %v7815_v47  ;;  %v3907_v0 = vrot.slane %v7812_v52, %v3906_v6 }
 0x43d   :  { %v3028_v2 = vpop.trf.xlu0  ;;  %3139 = vxpose.xlu1.b32.cont [5/16] %v2961_v31, 128  ;;  %3115 = vxpose.xlu0.b32.cont [13/16] %v2929_v19, 128  ;;  %v2980_v57 = vadd.f32 %v2979_v32, %v7815_v47 }
 0x43e   :  { %3081 = vst [vmem:[%s8098_s3 + $0x50] sm:$0xff] %v3028_v2 }
 0x441   :  { %v3029_v55 = vpop.trf.xlu0  ;;  %v4773_v62 = vpop.f32.mrb[124].mxu0  ;;  %3140 = vxpose.xlu1.b32.cont [6/16] %v2964_v51, 128  ;;  %3116 = vxpose.xlu0.b32.cont [14/16] %v2932_v36, 128 }
 0x442   :  { %3083 = vst [vmem:[%s8098_s3 + $0x60] sm:$0xff] %v3029_v55  ;;  %v2992_v50 = vpop.f32.mrb[125].mxu0  ;;  %v3001_v5 = vadd.f32 %v4773_v62, %v7815_v47 }
 0x443   :  { %v4774_v23 = vpop.f32.mrb[126].mxu0  ;;  %v2993_v42 = vadd.f32 %v2992_v50, %v7815_v47 }
 0x444   :  { %v2995_v4 = vpop.f32.mrb[127].mxu0  ;;  %v3004_v39 = vadd.f32 %v4774_v23, %v7815_v47 }
 0x445   :  { %v3030_v49 = vpop.trf.xlu0  ;;  %3141 = vxpose.xlu1.b32.cont [7/16] %v2969_v18, 128  ;;  %3117 = vxpose.xlu0.b32.cont [15/16] %v2937_v59, 128  ;;  %v2996_v11 = vadd.f32 %v2995_v4, %v7815_v47 }
 0x446   :  { %3085 = vst [vmem:[%s8098_s3 + $0x70] sm:$0xff] %v3030_v49 }
 0x449   :  { %v3055_v9 = vpop.trf.xlu1  ;;  %v3031_v26 = vpop.trf.xlu0  ;;  %3142 = vxpose.xlu1.b32.cont [8/16] %v2972_v33, 128  ;;  %3118 = vxpose.xlu0.b32.end [16/16] %v2940_v63, 128 }
 0x44a   :  { %3072 = vst [vmem:[%s8098_s3 + $0x8] sm:$0xff] %v3055_v9  ;;  %3087 = vst [vmem:[%s8098_s3 + $0x80] sm:$0xff] %v3031_v26 }
 0x44d   :  { %v3056_v54 = vpop.trf.xlu1  ;;  %v3032_v3 = vpop.trf.xlu0  ;;  %3143 = vxpose.xlu1.b32.cont [9/16] %v2977_v46, 128 }
 0x44e   :  { %3074 = vst [vmem:[%s8098_s3 + $0x18] sm:$0xff] %v3056_v54  ;;  %3089 = vst [vmem:[%s8098_s3 + $0x90] sm:$0xff] %v3032_v3 }
 0x451   :  { %v3057_v8 = vpop.trf.xlu1  ;;  %v3033_v13 = vpop.trf.xlu0  ;;  %3144 = vxpose.xlu1.b32.cont [10/16] %v2980_v57, 128 }
 0x452   :  { %3076 = vst [vmem:[%s8098_s3 + $0x28] sm:$0xff] %v3057_v8  ;;  %3091 = vst [vmem:[%s8098_s3 + $0xa0] sm:$0xff] %v3033_v13 }
 0x455   :  { %v3058_v48 = vpop.trf.xlu1  ;;  %v3034_v22 = vpop.trf.xlu0  ;;  %3145 = vxpose.xlu1.b32.cont [11/16] %v2985_v43, 128 }
 0x456   :  { %3078 = vst [vmem:[%s8098_s3 + $0x38] sm:$0xff] %v3058_v48  ;;  %3093 = vst [vmem:[%s8098_s3 + $0xb0] sm:$0xff] %v3034_v22 }
 0x459   :  { %v3059_v14 = vpop.trf.xlu1  ;;  %v3035_v15 = vpop.trf.xlu0  ;;  %3146 = vxpose.xlu1.b32.cont [12/16] %v2988_v34, 128 }
 0x45a   :  { %3080 = vst [vmem:[%s8098_s3 + $0x48] sm:$0xff] %v3059_v14  ;;  %3095 = vst [vmem:[%s8098_s3 + $0xc0] sm:$0xff] %v3035_v15 }
 0x45d   :  { %v3060_v21 = vpop.trf.xlu1  ;;  %v3036_v27 = vpop.trf.xlu0  ;;  %3147 = vxpose.xlu1.b32.cont [13/16] %v2993_v42, 128 }
 0x45e   :  { %3082 = vst [vmem:[%s8098_s3 + $0x58] sm:$0xff] %v3060_v21  ;;  %3097 = vst [vmem:[%s8098_s3 + $0xd0] sm:$0xff] %v3036_v27 }
 0x461   :  { %v3061_v30 = vpop.trf.xlu1  ;;  %v3037_v12 = vpop.trf.xlu0  ;;  %3148 = vxpose.xlu1.b32.cont [14/16] %v2996_v11, 128 }
 0x462   :  { %3084 = vst [vmem:[%s8098_s3 + $0x68] sm:$0xff] %v3061_v30  ;;  %3099 = vst [vmem:[%s8098_s3 + $0xe0] sm:$0xff] %v3037_v12 }
 0x465   :  { %v3062_v16 = vpop.trf.xlu1  ;;  %v3038_v61 = vpop.trf.xlu0  ;;  %3149 = vxpose.xlu1.b32.cont [15/16] %v3001_v5, 128 }
 0x466   :  { %3086 = vst [vmem:[%s8098_s3 + $0x78] sm:$0xff] %v3062_v16  ;;  %3101 = vst [vmem:[%s8098_s3 + $0xf0] sm:$0xff] %v3038_v61 }
 0x469   :  { %v3063_v17 = vpop.trf.xlu1  ;;  %3150 = vxpose.xlu1.b32.end [16/16] %v3004_v39, 128 }
 0x46a   :  { %3088 = vst [vmem:[%s8098_s3 + $0x88] sm:$0xff] %v3063_v17 }
 0x46d   :  { %v3064_v1 = vpop.trf.xlu1 }
 0x46e   :  { %3090 = vst [vmem:[%s8098_s3 + $0x98] sm:$0xff] %v3064_v1 }
 0x471   :  { %v3065_v25 = vpop.trf.xlu1 }
 0x472   :  { %3092 = vst [vmem:[%s8098_s3 + $0xa8] sm:$0xff] %v3065_v25 }
 0x475   :  { %v3066_v10 = vpop.trf.xlu1 }
 0x476   :  { %3094 = vst [vmem:[%s8098_s3 + $0xb8] sm:$0xff] %v3066_v10 }
 0x479   :  { %v3067_v40 = vpop.trf.xlu1 }
 0x47a   :  { %3096 = vst [vmem:[%s8098_s3 + $0xc8] sm:$0xff] %v3067_v40 }
 0x47d   :  { %v3068_v45 = vpop.trf.xlu1 }
 0x47e   :  { %3098 = vst [vmem:[%s8098_s3 + $0xd8] sm:$0xff] %v3068_v45 }
 0x481   :  { %v3069_v28 = vpop.trf.xlu1 }
 0x482   :  { %3100 = vst [vmem:[%s8098_s3 + $0xe8] sm:$0xff] %v3069_v28 }
 0x485   :  { %v3070_v47 = vpop.trf.xlu1 }
 0x486   :  { %3102 = vst [vmem:[%s8098_s3 + $0xf8] sm:$0xff] %v3070_v47 }
 0x48d   :  { %v3119_v38 = vpop.trf.xlu0 }
 0x48e   :  { %4226 = vst [vmem:[%s8098_s3 + $0x100] sm:$0xff] %v3119_v38 }
 0x48f   :  { %v4833_v60 = vpop.f32.mrb[128].mxu0 }
 0x490   :  { %v3999_v2 = vadd.f32 %v4833_v60, %v3907_v0  ;;  %v3990_v58 = vpop.f32.mrb[129].mxu0 }
 0x491   :  { %v3991_v37 = vadd.f32 %v3990_v58, %v3907_v0  ;;  %v4834_v56 = vpop.f32.mrb[130].mxu0  ;;  %v3120_v52 = vpop.trf.xlu0 }
 0x492   :  { %4007 = vst [vmem:[%s8099_s4 + $0x10] sm:$0xff] %v3999_v2  ;;  %v4002_v7 = vadd.f32 %v4834_v56, %v3907_v0  ;;  %v3993_v29 = vpop.f32.mrb[131].mxu0  ;;  %4228 = vst [vmem:[%s8098_s3 + $0x110] sm:$0xff] %v3120_v52 }
 0x493   :  { %4005 = vst [vmem:[%s8099_s4] sm:$0xff] %v3991_v37  ;;  %v3994_v53 = vadd.f32 %v3993_v29, %v3907_v0 }
 0x494   :  { %4008 = vst [vmem:[%s8099_s4 + $0x18] sm:$0xff] %v4002_v7 }
 0x495   :  { %4006 = vst [vmem:[%s8099_s4 + $0x8] sm:$0xff] %v3994_v53  ;;  %v3121_v55 = vpop.trf.xlu0 }
 0x496   :  { %4230 = vst [vmem:[%s8098_s3 + $0x120] sm:$0xff] %v3121_v55 }
 0x499   :  { %v3122_v41 = vpop.trf.xlu0 }
 0x49a   :  { %4232 = vst [vmem:[%s8098_s3 + $0x130] sm:$0xff] %v3122_v41 }
 0x49d   :  { %v3123_v24 = vpop.trf.xlu0 }
 0x49e   :  { %4234 = vst [vmem:[%s8098_s3 + $0x140] sm:$0xff] %v3123_v24 }
 0x4a1   :  { %v3124_v49 = vpop.trf.xlu0 }
 0x4a2   :  { %4236 = vst [vmem:[%s8098_s3 + $0x150] sm:$0xff] %v3124_v49 }
 0x4a5   :  { %v3125_v44 = vpop.trf.xlu0 }
 0x4a6   :  { %4238 = vst [vmem:[%s8098_s3 + $0x160] sm:$0xff] %v3125_v44 }
 0x4a9   :  { %v3126_v35 = vpop.trf.xlu0 }
 0x4aa   :  { %4240 = vst [vmem:[%s8098_s3 + $0x170] sm:$0xff] %v3126_v35 }
 0x4ad   :  { %v3151_v19 = vpop.trf.xlu1  ;;  %v3127_v31 = vpop.trf.xlu0 }
 0x4ae   :  { %4227 = vst [vmem:[%s8098_s3 + $0x108] sm:$0xff] %v3151_v19  ;;  %4242 = vst [vmem:[%s8098_s3 + $0x180] sm:$0xff] %v3127_v31 }
 0x4b1   :  { %v3152_v20 = vpop.trf.xlu1  ;;  %v3128_v32 = vpop.trf.xlu0 }
 0x4b2   :  { %4229 = vst [vmem:[%s8098_s3 + $0x118] sm:$0xff] %v3152_v20  ;;  %4244 = vst [vmem:[%s8098_s3 + $0x190] sm:$0xff] %v3128_v32 }
 0x4b5   :  { %v3153_v9 = vpop.trf.xlu1  ;;  %v3129_v26 = vpop.trf.xlu0 }
 0x4b6   :  { %4231 = vst [vmem:[%s8098_s3 + $0x128] sm:$0xff] %v3153_v9  ;;  %4246 = vst [vmem:[%s8098_s3 + $0x1a0] sm:$0xff] %v3129_v26 }
 0x4b9   :  { %v3154_v36 = vpop.trf.xlu1  ;;  %v3130_v51 = vpop.trf.xlu0 }
 0x4ba   :  { %4233 = vst [vmem:[%s8098_s3 + $0x138] sm:$0xff] %v3154_v36  ;;  %4248 = vst [vmem:[%s8098_s3 + $0x1b0] sm:$0xff] %v3130_v51 }
 0x4bd   :  { %v3155_v54 = vpop.trf.xlu1  ;;  %v3131_v62 = vpop.trf.xlu0 }
 0x4be   :  { %4235 = vst [vmem:[%s8098_s3 + $0x148] sm:$0xff] %v3155_v54  ;;  %4250 = vst [vmem:[%s8098_s3 + $0x1c0] sm:$0xff] %v3131_v62 }
 0x4c1   :  { %v3156_v3 = vpop.trf.xlu1  ;;  %v3132_v50 = vpop.trf.xlu0 }
 0x4c2   :  { %4237 = vst [vmem:[%s8098_s3 + $0x158] sm:$0xff] %v3156_v3  ;;  %4252 = vst [vmem:[%s8098_s3 + $0x1d0] sm:$0xff] %v3132_v50 }
 0x4c5   :  { %v3157_v59 = vpop.trf.xlu1  ;;  %v3133_v18 = vpop.trf.xlu0 }
 0x4c6   :  { %4239 = vst [vmem:[%s8098_s3 + $0x168] sm:$0xff] %v3157_v59  ;;  %4254 = vst [vmem:[%s8098_s3 + $0x1e0] sm:$0xff] %v3133_v18 }
 0x4c9   :  { %v3158_v23 = vpop.trf.xlu1  ;;  %v3134_v4 = vpop.trf.xlu0 }
 0x4ca   :  { %4241 = vst [vmem:[%s8098_s3 + $0x178] sm:$0xff] %v3158_v23  ;;  %4256 = vst [vmem:[%s8098_s3 + $0x1f0] sm:$0xff] %v3134_v4 }
 0x4cd   :  { %v3159_v8 = vpop.trf.xlu1 }
 0x4ce   :  { %4243 = vst [vmem:[%s8098_s3 + $0x188] sm:$0xff] %v3159_v8 }
 0x4d1   :  { %v3160_v13 = vpop.trf.xlu1 }
 0x4d2   :  { %4245 = vst [vmem:[%s8098_s3 + $0x198] sm:$0xff] %v3160_v13 }
 0x4d5   :  { %v3161_v63 = vpop.trf.xlu1 }
 0x4d6   :  { %4247 = vst [vmem:[%s8098_s3 + $0x1a8] sm:$0xff] %v3161_v63 }
 0x4d9   :  { %v3162_v33 = vpop.trf.xlu1 }
 0x4da   :  { %4249 = vst [vmem:[%s8098_s3 + $0x1b8] sm:$0xff] %v3162_v33 }
 0x4dd   :  { %v3163_v48 = vpop.trf.xlu1 }
 0x4de   :  { %4251 = vst [vmem:[%s8098_s3 + $0x1c8] sm:$0xff] %v3163_v48 }
 0x4e1   :  { %v3164_v22 = vpop.trf.xlu1 }
 0x4e2   :  { %4253 = vst [vmem:[%s8098_s3 + $0x1d8] sm:$0xff] %v3164_v22 }
 0x4e5   :  { %v3165_v46 = vpop.trf.xlu1 }
 0x4e6   :  { %4255 = vst [vmem:[%s8098_s3 + $0x1e8] sm:$0xff] %v3165_v46 }
 0x4e9   :  { %v3166_v14 = vpop.trf.xlu1 }
 0x4ea   :  { %4257 = vst [vmem:[%s8098_s3 + $0x1f8] sm:$0xff] %v3166_v14 }

</bundles_post_ra>
